<compile_context>
chip_gen: v5e
topology: v5e:2x2
jax: 0.10.0
libtpu: 0.0.40
codegen_flags: <defaults>
</compile_context>

<pallas_src>
import functools

import jax
import jax.numpy as jnp
from jax.experimental import pallas as pl
from jax.experimental.pallas import tpu as pltpu


# --------------------------------------------------------------------------- #
# Pallas kernel: TILE_N samples per grid step, channel-major lane-dense slabs.
# --------------------------------------------------------------------------- #
def _ppgn_kernel(x2_ref, mask_ref, maskt_ref,
                 w1a_ref, b1a_ref, w1b_ref, b1b_ref,
                 w2a_ref, b2a_ref, w2b_ref, b2b_ref,
                 wsx_ref, wsm_ref, bs_ref,
                 o_ref, *, c_in, c_out, tile_n, m, p_pad):
    p = m * m
    f32 = jnp.float32
    cdt = x2_ref.dtype                      # MXU input dtype (bf16 or f32)

    x2 = x2_ref[...]                        # (2*c_in, tile_n*p_pad) = [x ; x^T]
    x = x2[:c_in, :]                        # untransposed x slab
    mask = mask_ref[...]                    # (1, tile_n*p_pad) f32, 0/1
    maskt = maskt_ref[...]                  # (1, tile_n*p_pad) f32, 0/1 (mask^T)

    # ---- mlp1 branch, computed spatially TRANSPOSED (lane order (j, i)):
    #      conv1x1 on cat([x, x^T])^T == [W_right | W_left] @ [x ; x^T]
    #      (single fused dot, no in-kernel transpose / concat).
    h = jnp.dot(w1a_ref[...], x2, preferred_element_type=f32) + b1a_ref[...]
    h = jnp.maximum(h, 0.0)
    h = jnp.dot(w1b_ref[...], h.astype(cdt), preferred_element_type=f32) + b1b_ref[...]
    h = jnp.maximum(h, 0.0)
    mlp1t = h * maskt                       # (c_out, L) f32 == mlp1^T (spatial)

    # ---- mlp2 branch (untransposed, lane order (j, k))
    g = jnp.dot(w2a_ref[...], x, preferred_element_type=f32) + b2a_ref[...]
    g = jnp.maximum(g, 0.0)
    g = jnp.dot(w2b_ref[...], g.astype(cdt), preferred_element_type=f32) + b2b_ref[...]
    g = jnp.maximum(g, 0.0)
    mlp2 = g * mask                         # (c_out, L) f32

    # ---- mult = mlp1 @ mlp2 (per sample, per channel) as m rank-1 updates:
    #      mult[c, i, k] = sum_j mlp1t[c, (j, i)] * mlp2[c, (j, k)]
    # Both per-j operands are contiguous m-lane chunks (because mlp1 was
    # computed transposed), so this is pure VPU outer-product accumulation.
    chunks = []
    for s in range(tile_n):
        base = s * p_pad
        acc3 = None
        for j in range(m):
            u = mlp1t[:, base + j * m: base + (j + 1) * m]   # column j of mlp1, over i
            v = mlp2[:, base + j * m: base + (j + 1) * m]    # row j of mlp2, over k
            term = u[:, :, None] * v[:, None, :]             # (c_out, m, m)
            acc3 = term if acc3 is None else acc3 + term
        acc = acc3.reshape(c_out, p)                         # lane order (i, k)
        if p_pad > p:
            acc = jnp.concatenate(
                [acc, jnp.zeros((c_out, p_pad - p), f32)], axis=1)
        chunks.append(acc)
    mult = chunks[0] if tile_n == 1 else jnp.concatenate(chunks, axis=1)

    # ---- skip: conv1x1(cat([x, mult])) * mask, as a split dot (no concat)
    out = (jnp.dot(wsx_ref[...], x, preferred_element_type=f32)
           + jnp.dot(wsm_ref[...], mult.astype(cdt), preferred_element_type=f32)
           + bs_ref[...])
    out = out * mask
    o_ref[...] = out.astype(o_ref.dtype)


# --------------------------------------------------------------------------- #
# Wrapper: layout plumbing, generation-aware tiling policy, pallas_call.
# --------------------------------------------------------------------------- #
def _round_up(a, b):
    return (a + b - 1) // b * b


def _vmem_capacity_bytes():
    try:
        info = pltpu.get_tpu_info()
        cap = getattr(info, "vmem_capacity_bytes", None)
        if cap:
            return int(cap)
    except Exception:
        pass
    return 64 << 20          # conservative (v7x-sized) default


def _choose_tile_n(n, c_in, c_out, p_pad, m, in_bytes, out_bytes):
    """Samples per grid step.  The per-step VMEM model counts every
    double-buffered pipeline block plus the ~7 f32 slab temporaries that are
    live inside the kernel (not just one slab), and the budget is derived from
    the actual chip's VMEM (64 MiB/TC on v7x, 128 MiB on v5e/v6e).  Grid
    length is kept >= 2 whenever n >= 2 so the 'parallel' batch axis can use
    both v7x TensorCores."""
    vmem_cap = _vmem_capacity_bytes()
    # resident weights/biases; charged at 2 pipeline buffers
    w_bytes = 2 * (c_out * (4 * c_in + 3 * c_out) * in_bytes + 5 * c_out * 4)
    per_sample = p_pad * (
        2 * (2 * c_in) * in_bytes        # x2 block, double-buffered
        + 2 * 2 * 4                      # mask + mask^T blocks, f32, 2 buffers
        + 2 * c_out * out_bytes          # out block, double-buffered
        + 7 * c_out * 4                  # f32 slab temporaries (h, g, mlp1t, mlp2, mult, out, slack)
        + 2 * c_out * in_bytes           # low-precision casts fed to the MXU
    )
    per_sample = int(per_sample * 1.25)  # headroom / fudge
    budget = max(4 << 20, int(vmem_cap * 0.55) - w_bytes)
    tile = 1
    for cand in (2, 4, 8, 16):
        if cand * per_sample > budget:
            break
        if n >= 2 and cand > max(1, n // 2):   # keep grid_n >= 2
            break
        if cand * m > 256:                     # bound in-kernel unrolling
            break
        tile = cand
    return tile, vmem_cap


@functools.partial(jax.jit, static_argnames=("compute_dtype", "tile_n"))
def ppgn_block_forward(x, mask, params, *, compute_dtype=jnp.bfloat16, tile_n=None):
    n, c_in, m, _ = x.shape
    c_out = params['w1b'].shape[0]
    p = m * m
    p_pad = _round_up(p, 128)                  # lane-dense per-sample block
    out_dtype = x.dtype                        # could be bf16 for downstream wins
    in_bytes = jnp.dtype(compute_dtype).itemsize
    out_bytes = jnp.dtype(out_dtype).itemsize

    if tile_n is None:
        tile_n, vmem_cap = _choose_tile_n(n, c_in, c_out, p_pad, m,
                                          in_bytes, out_bytes)
    else:
        vmem_cap = _vmem_capacity_bytes()
    n_pad = (-n) % tile_n
    n_full = n + n_pad
    grid_n = n_full // tile_n
    L_blk = tile_n * p_pad

    # ---- lane-dense, channel-major slabs (all layout plumbing in wrapper) ----
    x_cm = jnp.transpose(x, (1, 0, 2, 3))                    # (c_in, n, m, m)
    xt_cm = jnp.swapaxes(x_cm, -1, -2)                       # spatial transpose
    x2_cm = jnp.concatenate([x_cm, xt_cm], axis=0)           # (2*c_in, n, m, m)
    mask_cm = jnp.transpose(mask, (1, 0, 2, 3))              # (1, n, m, m)
    maskt_cm = jnp.swapaxes(mask_cm, -1, -2)

    def to_slab(a, dtype):
        c = a.shape[0]
        a = a.reshape(c, n, p)
        if p_pad > p:
            a = jnp.pad(a, ((0, 0), (0, 0), (0, p_pad - p)))
        if n_pad:
            a = jnp.pad(a, ((0, 0), (0, n_pad), (0, 0)))
        return a.reshape(c, n_full * p_pad).astype(dtype)

    x2_slab = to_slab(x2_cm, compute_dtype)
    mask_slab = to_slab(mask_cm, jnp.float32)      # keep mask exact in f32
    maskt_slab = to_slab(maskt_cm, jnp.float32)

    # ---- pre-split / pre-fused weights (no in-kernel concat or transpose) ----
    cd = compute_dtype
    col = lambda v: v.reshape(-1, 1).astype(jnp.float32)
    w1a, ws = params['w1a'], params['ws']
    # mlp1 is computed spatially transposed -> swap the two weight halves.
    w1a_t = jnp.concatenate([w1a[:, c_in:], w1a[:, :c_in]], axis=1).astype(cd)
    w_args = (
        w1a_t, col(params['b1a']),
        params['w1b'].astype(cd), col(params['b1b']),
        params['w2a'].astype(cd), col(params['b2a']),
        params['w2b'].astype(cd), col(params['b2b']),
        ws[:, :c_in].astype(cd), ws[:, c_in:].astype(cd), col(params['bs']),
    )

    slab_spec = lambda c: pl.BlockSpec((c, L_blk), lambda i: (0, i))
    full = lambda a: pl.BlockSpec(a.shape, lambda i: (0, 0))  # resident weights
    in_specs = ([slab_spec(2 * c_in), slab_spec(1), slab_spec(1)]
                + [full(a) for a in w_args])
    out_spec = pl.BlockSpec((c_out, L_blk), lambda i: (0, i))

    kernel = functools.partial(_ppgn_kernel, c_in=c_in, c_out=c_out,
                               tile_n=tile_n, m=m, p_pad=p_pad)

    flops = (2 * n_full * p_pad * c_out * (4 * c_in + 3 * c_out)
             + 2 * n_full * c_out * m ** 3)
    bytes_accessed = (x2_slab.size * x2_slab.dtype.itemsize
                      + mask_slab.size * 4 + maskt_slab.size * 4
                      + c_out * n_full * p_pad * out_bytes
                      + sum(a.size * a.dtype.itemsize for a in w_args))

    vmem_limit = int(max(32 << 20, min(vmem_cap * 0.85, 100 << 20)))

    out_cm = pl.pallas_call(
        kernel,
        out_shape=jax.ShapeDtypeStruct((c_out, n_full * p_pad), out_dtype),
        grid_spec=pltpu.PrefetchScalarGridSpec(
            num_scalar_prefetch=0,
            grid=(grid_n,),
            in_specs=in_specs,
            out_specs=out_spec,
        ),
        compiler_params=pltpu.CompilerParams(
            dimension_semantics=("parallel",),
            vmem_limit_bytes=vmem_limit),
        cost_estimate=pl.CostEstimate(flops=flops, transcendentals=0,
                                      bytes_accessed=bytes_accessed),
    )(x2_slab, mask_slab, maskt_slab, *w_args)

    out = out_cm.reshape(c_out, n_full, p_pad)[:, :n, :p].reshape(c_out, n, m, m)
    return jnp.transpose(out, (1, 0, 2, 3))                   # back to NCHW


# --------------------------------------------------------------------------- #
# Deterministic parameter init (xavier_uniform weights, zero biases), matching
# nn.Conv2d(kernel_size=1) shapes collapsed to 2D (out_ch, in_ch).
# --------------------------------------------------------------------------- #
def _xavier_uniform(key, out_ch, in_ch):
    bound = (6.0 / (in_ch + out_ch)) ** 0.5
    return jax.random.uniform(key, (out_ch, in_ch), jnp.float32, -bound, bound)


def init_params(key, in_features, out_features):
    ks = jax.random.split(key, 5)
    return {
        # mlp1: 2*in -> out -> out
        'w1a': _xavier_uniform(ks[0], out_features, 2 * in_features),
        'b1a': jnp.zeros((out_features,), jnp.float32),
        'w1b': _xavier_uniform(ks[1], out_features, out_features),
        'b1b': jnp.zeros((out_features,), jnp.float32),
        # mlp2: in -> out -> out
        'w2a': _xavier_uniform(ks[2], out_features, in_features),
        'b2a': jnp.zeros((out_features,), jnp.float32),
        'w2b': _xavier_uniform(ks[3], out_features, out_features),
        'b2b': jnp.zeros((out_features,), jnp.float32),
        # skip: in + out -> out
        'ws': _xavier_uniform(ks[4], out_features, in_features + out_features),
        'bs': jnp.zeros((out_features,), jnp.float32),
    }


# --------------------------------------------------------------------------- #
# Pure-JAX reference (mirrors the PyTorch forward) for correctness checks.
# --------------------------------------------------------------------------- #
def ppgn_block_reference(x, mask, p):
    def conv1x1(h, w, bias):
        return jnp.einsum('oc,ncij->noij', w, h) + bias[None, :, None, None]

    xt = jnp.swapaxes(x, -1, -2)
    h = jnp.concatenate([x, xt], axis=1)
    h = jax.nn.relu(conv1x1(h, p['w1a'], p['b1a']))
    h = jax.nn.relu(conv1x1(h, p['w1b'], p['b1b']))
    mlp1 = h * mask
    g = jax.nn.relu(conv1x1(x, p['w2a'], p['b2a']))
    g = jax.nn.relu(conv1x1(g, p['w2b'], p['b2b']))
    mlp2 = g * mask
    mult = jnp.matmul(mlp1, mlp2)
    out = conv1x1(jnp.concatenate([x, mult], axis=1), p['ws'], p['bs']) * mask
    return out


if __name__ == "__main__":
    key = jax.random.PRNGKey(0)
    k_x, k_p = jax.random.split(key)

    N, C_IN, C_OUT, M = 2, 4, 8, 16

    x = jax.random.normal(k_x, (N, C_IN, M, M), jnp.float32)
    # Asymmetric 0/1 mask (exercises the mask / mask^T paths independently).
    # n_list is consumed only through the mask, matching the torch forward.
    n_rows = jnp.array([12, 16], jnp.int32)
    n_cols = jnp.array([10, 14], jnp.int32)
    idx = jnp.arange(M)
    valid = (idx[None, :, None] < n_rows[:, None, None]) & \
            (idx[None, None, :] < n_cols[:, None, None])
    mask = valid[:, None, :, :].astype(jnp.float32)             # (N, 1, m, m)

    params = init_params(k_p, C_IN, C_OUT)
    ref = ppgn_block_reference(x, mask, params)

    # Exact path (f32 MXU inputs): tight correctness check.
    out_f32 = jax.block_until_ready(
        ppgn_block_forward(x, mask, params, compute_dtype=jnp.float32))
    assert out_f32.shape == (N, C_OUT, M, M)
    assert jnp.allclose(out_f32, ref, atol=1e-3, rtol=1e-3)

    # Default fast path (bf16 MXU inputs, f32 accumulate): loosened tolerance
    # vs the f32 reference, as expected for bf16 matmul operands.
    out_bf16 = jax.block_until_ready(ppgn_block_forward(x, mask, params))
    assert out_bf16.shape == (N, C_OUT, M, M)
    assert jnp.allclose(out_bf16.astype(jnp.float32), ref, atol=1e-1, rtol=1e-1)

    print("KERNEL_OK")
</pallas_src>

<mosaic_0001>
module attributes {stable_mosaic.version = 11 : i64} {
  func.func @_ppgn_kernel(%arg0: i32, %arg1: memref<8x256xf32, #tpu.memory_space<vmem>>, %arg2: memref<1x256xf32, #tpu.memory_space<vmem>>, %arg3: memref<1x256xf32, #tpu.memory_space<vmem>>, %arg4: memref<8x8xf32, #tpu.memory_space<vmem>>, %arg5: memref<8x1xf32, #tpu.memory_space<vmem>>, %arg6: memref<8x8xf32, #tpu.memory_space<vmem>>, %arg7: memref<8x1xf32, #tpu.memory_space<vmem>>, %arg8: memref<8x4xf32, #tpu.memory_space<vmem>>, %arg9: memref<8x1xf32, #tpu.memory_space<vmem>>, %arg10: memref<8x8xf32, #tpu.memory_space<vmem>>, %arg11: memref<8x1xf32, #tpu.memory_space<vmem>>, %arg12: memref<8x4xf32, #tpu.memory_space<vmem>>, %arg13: memref<8x8xf32, #tpu.memory_space<vmem>>, %arg14: memref<8x1xf32, #tpu.memory_space<vmem>>, %arg15: memref<8x256xf32, #tpu.memory_space<vmem>>) attributes {dimension_semantics = [#tpu.dimension_semantics<parallel>], iteration_bounds = array<i64: 2>, scalar_prefetch = 0 : i64, scratch_operands = 0 : i64, tpu.core_type = #tpu.core_type<tc>, window_params = [{transform_indices = @transform_0, window_bounds = array<i64: 8, 256>}, {transform_indices = @transform_1, window_bounds = array<i64: 1, 256>}, {transform_indices = @transform_2, window_bounds = array<i64: 1, 256>}, {pipeline_mode = #tpu.pipeline_mode<synchronous>, transform_indices = @transform_3, window_bounds = array<i64: 8, 8>}, {pipeline_mode = #tpu.pipeline_mode<synchronous>, transform_indices = @transform_4, window_bounds = array<i64: 8, 1>}, {pipeline_mode = #tpu.pipeline_mode<synchronous>, transform_indices = @transform_5, window_bounds = array<i64: 8, 8>}, {pipeline_mode = #tpu.pipeline_mode<synchronous>, transform_indices = @transform_6, window_bounds = array<i64: 8, 1>}, {pipeline_mode = #tpu.pipeline_mode<synchronous>, transform_indices = @transform_7, window_bounds = array<i64: 8, 4>}, {pipeline_mode = #tpu.pipeline_mode<synchronous>, transform_indices = @transform_8, window_bounds = array<i64: 8, 1>}, {pipeline_mode = #tpu.pipeline_mode<synchronous>, transform_indices = @transform_9, window_bounds = array<i64: 8, 8>}, {pipeline_mode = #tpu.pipeline_mode<synchronous>, transform_indices = @transform_10, window_bounds = array<i64: 8, 1>}, {pipeline_mode = #tpu.pipeline_mode<synchronous>, transform_indices = @transform_11, window_bounds = array<i64: 8, 4>}, {pipeline_mode = #tpu.pipeline_mode<synchronous>, transform_indices = @transform_12, window_bounds = array<i64: 8, 8>}, {pipeline_mode = #tpu.pipeline_mode<synchronous>, transform_indices = @transform_13, window_bounds = array<i64: 8, 1>}, {transform_indices = @transform_14, window_bounds = array<i64: 8, 256>}]} {
    %c0 = arith.constant 0 : index
    %c0_0 = arith.constant 0 : index
    %0 = vector.load %arg1[%c0, %c0_0] : memref<8x256xf32, #tpu.memory_space<vmem>>, vector<8x256xf32>
    %1 = vector.extract_strided_slice %0 {offsets = [0, 0], sizes = [4, 256], strides = [1, 1]} : vector<8x256xf32> to vector<4x256xf32>
    %c0_1 = arith.constant 0 : index
    %c0_2 = arith.constant 0 : index
    %2 = vector.load %arg2[%c0_1, %c0_2] : memref<1x256xf32, #tpu.memory_space<vmem>>, vector<1x256xf32>
    %c0_3 = arith.constant 0 : index
    %c0_4 = arith.constant 0 : index
    %3 = vector.load %arg3[%c0_3, %c0_4] : memref<1x256xf32, #tpu.memory_space<vmem>>, vector<1x256xf32>
    %c0_5 = arith.constant 0 : index
    %c0_6 = arith.constant 0 : index
    %4 = vector.load %arg4[%c0_5, %c0_6] : memref<8x8xf32, #tpu.memory_space<vmem>>, vector<8x8xf32>
    %cst = arith.constant dense<0.000000e+00> : vector<8x256xf32>
    %5 = tpu.matmul %4, %0, %cst {dimension_numbers = #tpu.dot_dimension_numbers<[1], [0], [0], [1], [0, 0, 1, 1], [], []>} : vector<8x8xf32>, vector<8x256xf32>, vector<8x256xf32> -> vector<8x256xf32>
    %c0_7 = arith.constant 0 : index
    %c0_8 = arith.constant 0 : index
    %6 = vector.load %arg5[%c0_7, %c0_8] : memref<8x1xf32, #tpu.memory_space<vmem>>, vector<8x1xf32>
    %7 = vector.broadcast %6 : vector<8x1xf32> to vector<8x256xf32>
    %8 = arith.addf %5, %7 : vector<8x256xf32>
    %cst_9 = arith.constant 0.000000e+00 : f32
    %9 = vector.broadcast %cst_9 : f32 to vector<8x256xf32>
    %10 = arith.maximumf %8, %9 : vector<8x256xf32>
    %c0_10 = arith.constant 0 : index
    %c0_11 = arith.constant 0 : index
    %11 = vector.load %arg6[%c0_10, %c0_11] : memref<8x8xf32, #tpu.memory_space<vmem>>, vector<8x8xf32>
    %cst_12 = arith.constant dense<0.000000e+00> : vector<8x256xf32>
    %12 = tpu.matmul %11, %10, %cst_12 {dimension_numbers = #tpu.dot_dimension_numbers<[1], [0], [0], [1], [0, 0, 1, 1], [], []>} : vector<8x8xf32>, vector<8x256xf32>, vector<8x256xf32> -> vector<8x256xf32>
    %c0_13 = arith.constant 0 : index
    %c0_14 = arith.constant 0 : index
    %13 = vector.load %arg7[%c0_13, %c0_14] : memref<8x1xf32, #tpu.memory_space<vmem>>, vector<8x1xf32>
    %14 = vector.broadcast %13 : vector<8x1xf32> to vector<8x256xf32>
    %15 = arith.addf %12, %14 : vector<8x256xf32>
    %cst_15 = arith.constant 0.000000e+00 : f32
    %16 = vector.broadcast %cst_15 : f32 to vector<8x256xf32>
    %17 = arith.maximumf %15, %16 : vector<8x256xf32>
    %18 = vector.broadcast %3 : vector<1x256xf32> to vector<8x256xf32>
    %19 = arith.mulf %17, %18 : vector<8x256xf32>
    %c0_16 = arith.constant 0 : index
    %c0_17 = arith.constant 0 : index
    %20 = vector.load %arg8[%c0_16, %c0_17] : memref<8x4xf32, #tpu.memory_space<vmem>>, vector<8x4xf32>
    %cst_18 = arith.constant dense<0.000000e+00> : vector<8x256xf32>
    %21 = tpu.matmul %20, %1, %cst_18 {dimension_numbers = #tpu.dot_dimension_numbers<[1], [0], [0], [1], [0, 0, 1, 1], [], []>} : vector<8x4xf32>, vector<4x256xf32>, vector<8x256xf32> -> vector<8x256xf32>
    %c0_19 = arith.constant 0 : index
    %c0_20 = arith.constant 0 : index
    %22 = vector.load %arg9[%c0_19, %c0_20] : memref<8x1xf32, #tpu.memory_space<vmem>>, vector<8x1xf32>
    %23 = vector.broadcast %22 : vector<8x1xf32> to vector<8x256xf32>
    %24 = arith.addf %21, %23 : vector<8x256xf32>
    %cst_21 = arith.constant 0.000000e+00 : f32
    %25 = vector.broadcast %cst_21 : f32 to vector<8x256xf32>
    %26 = arith.maximumf %24, %25 : vector<8x256xf32>
    %c0_22 = arith.constant 0 : index
    %c0_23 = arith.constant 0 : index
    %27 = vector.load %arg10[%c0_22, %c0_23] : memref<8x8xf32, #tpu.memory_space<vmem>>, vector<8x8xf32>
    %cst_24 = arith.constant dense<0.000000e+00> : vector<8x256xf32>
    %28 = tpu.matmul %27, %26, %cst_24 {dimension_numbers = #tpu.dot_dimension_numbers<[1], [0], [0], [1], [0, 0, 1, 1], [], []>} : vector<8x8xf32>, vector<8x256xf32>, vector<8x256xf32> -> vector<8x256xf32>
    %c0_25 = arith.constant 0 : index
    %c0_26 = arith.constant 0 : index
    %29 = vector.load %arg11[%c0_25, %c0_26] : memref<8x1xf32, #tpu.memory_space<vmem>>, vector<8x1xf32>
    %30 = vector.broadcast %29 : vector<8x1xf32> to vector<8x256xf32>
    %31 = arith.addf %28, %30 : vector<8x256xf32>
    %cst_27 = arith.constant 0.000000e+00 : f32
    %32 = vector.broadcast %cst_27 : f32 to vector<8x256xf32>
    %33 = arith.maximumf %31, %32 : vector<8x256xf32>
    %34 = vector.broadcast %2 : vector<1x256xf32> to vector<8x256xf32>
    %35 = arith.mulf %33, %34 : vector<8x256xf32>
    %36 = vector.extract_strided_slice %19 {offsets = [0, 0], sizes = [8, 16], strides = [1, 1]} : vector<8x256xf32> to vector<8x16xf32>
    %37 = vector.extract_strided_slice %35 {offsets = [0, 0], sizes = [8, 16], strides = [1, 1]} : vector<8x256xf32> to vector<8x16xf32>
    %38 = vector.shape_cast %36 : vector<8x16xf32> to vector<8x16x1xf32>
    %39 = vector.shape_cast %37 : vector<8x16xf32> to vector<8x1x16xf32>
    %40 = vector.broadcast %38 : vector<8x16x1xf32> to vector<8x16x16xf32>
    %41 = vector.broadcast %39 : vector<8x1x16xf32> to vector<8x16x16xf32>
    %42 = arith.mulf %40, %41 : vector<8x16x16xf32>
    %43 = vector.extract_strided_slice %19 {offsets = [0, 16], sizes = [8, 16], strides = [1, 1]} : vector<8x256xf32> to vector<8x16xf32>
    %44 = vector.extract_strided_slice %35 {offsets = [0, 16], sizes = [8, 16], strides = [1, 1]} : vector<8x256xf32> to vector<8x16xf32>
    %45 = vector.shape_cast %43 : vector<8x16xf32> to vector<8x16x1xf32>
    %46 = vector.shape_cast %44 : vector<8x16xf32> to vector<8x1x16xf32>
    %47 = vector.broadcast %45 : vector<8x16x1xf32> to vector<8x16x16xf32>
    %48 = vector.broadcast %46 : vector<8x1x16xf32> to vector<8x16x16xf32>
    %49 = arith.mulf %47, %48 : vector<8x16x16xf32>
    %50 = arith.addf %42, %49 : vector<8x16x16xf32>
    %51 = vector.extract_strided_slice %19 {offsets = [0, 32], sizes = [8, 16], strides = [1, 1]} : vector<8x256xf32> to vector<8x16xf32>
    %52 = vector.extract_strided_slice %35 {offsets = [0, 32], sizes = [8, 16], strides = [1, 1]} : vector<8x256xf32> to vector<8x16xf32>
    %53 = vector.shape_cast %51 : vector<8x16xf32> to vector<8x16x1xf32>
    %54 = vector.shape_cast %52 : vector<8x16xf32> to vector<8x1x16xf32>
    %55 = vector.broadcast %53 : vector<8x16x1xf32> to vector<8x16x16xf32>
    %56 = vector.broadcast %54 : vector<8x1x16xf32> to vector<8x16x16xf32>
    %57 = arith.mulf %55, %56 : vector<8x16x16xf32>
    %58 = arith.addf %50, %57 : vector<8x16x16xf32>
    %59 = vector.extract_strided_slice %19 {offsets = [0, 48], sizes = [8, 16], strides = [1, 1]} : vector<8x256xf32> to vector<8x16xf32>
    %60 = vector.extract_strided_slice %35 {offsets = [0, 48], sizes = [8, 16], strides = [1, 1]} : vector<8x256xf32> to vector<8x16xf32>
    %61 = vector.shape_cast %59 : vector<8x16xf32> to vector<8x16x1xf32>
    %62 = vector.shape_cast %60 : vector<8x16xf32> to vector<8x1x16xf32>
    %63 = vector.broadcast %61 : vector<8x16x1xf32> to vector<8x16x16xf32>
    %64 = vector.broadcast %62 : vector<8x1x16xf32> to vector<8x16x16xf32>
    %65 = arith.mulf %63, %64 : vector<8x16x16xf32>
    %66 = arith.addf %58, %65 : vector<8x16x16xf32>
    %67 = vector.extract_strided_slice %19 {offsets = [0, 64], sizes = [8, 16], strides = [1, 1]} : vector<8x256xf32> to vector<8x16xf32>
    %68 = vector.extract_strided_slice %35 {offsets = [0, 64], sizes = [8, 16], strides = [1, 1]} : vector<8x256xf32> to vector<8x16xf32>
    %69 = vector.shape_cast %67 : vector<8x16xf32> to vector<8x16x1xf32>
    %70 = vector.shape_cast %68 : vector<8x16xf32> to vector<8x1x16xf32>
    %71 = vector.broadcast %69 : vector<8x16x1xf32> to vector<8x16x16xf32>
    %72 = vector.broadcast %70 : vector<8x1x16xf32> to vector<8x16x16xf32>
    %73 = arith.mulf %71, %72 : vector<8x16x16xf32>
    %74 = arith.addf %66, %73 : vector<8x16x16xf32>
    %75 = vector.extract_strided_slice %19 {offsets = [0, 80], sizes = [8, 16], strides = [1, 1]} : vector<8x256xf32> to vector<8x16xf32>
    %76 = vector.extract_strided_slice %35 {offsets = [0, 80], sizes = [8, 16], strides = [1, 1]} : vector<8x256xf32> to vector<8x16xf32>
    %77 = vector.shape_cast %75 : vector<8x16xf32> to vector<8x16x1xf32>
    %78 = vector.shape_cast %76 : vector<8x16xf32> to vector<8x1x16xf32>
    %79 = vector.broadcast %77 : vector<8x16x1xf32> to vector<8x16x16xf32>
    %80 = vector.broadcast %78 : vector<8x1x16xf32> to vector<8x16x16xf32>
    %81 = arith.mulf %79, %80 : vector<8x16x16xf32>
    %82 = arith.addf %74, %81 : vector<8x16x16xf32>
    %83 = vector.extract_strided_slice %19 {offsets = [0, 96], sizes = [8, 16], strides = [1, 1]} : vector<8x256xf32> to vector<8x16xf32>
    %84 = vector.extract_strided_slice %35 {offsets = [0, 96], sizes = [8, 16], strides = [1, 1]} : vector<8x256xf32> to vector<8x16xf32>
    %85 = vector.shape_cast %83 : vector<8x16xf32> to vector<8x16x1xf32>
    %86 = vector.shape_cast %84 : vector<8x16xf32> to vector<8x1x16xf32>
    %87 = vector.broadcast %85 : vector<8x16x1xf32> to vector<8x16x16xf32>
    %88 = vector.broadcast %86 : vector<8x1x16xf32> to vector<8x16x16xf32>
    %89 = arith.mulf %87, %88 : vector<8x16x16xf32>
    %90 = arith.addf %82, %89 : vector<8x16x16xf32>
    %91 = vector.extract_strided_slice %19 {offsets = [0, 112], sizes = [8, 16], strides = [1, 1]} : vector<8x256xf32> to vector<8x16xf32>
    %92 = vector.extract_strided_slice %35 {offsets = [0, 112], sizes = [8, 16], strides = [1, 1]} : vector<8x256xf32> to vector<8x16xf32>
    %93 = vector.shape_cast %91 : vector<8x16xf32> to vector<8x16x1xf32>
    %94 = vector.shape_cast %92 : vector<8x16xf32> to vector<8x1x16xf32>
    %95 = vector.broadcast %93 : vector<8x16x1xf32> to vector<8x16x16xf32>
    %96 = vector.broadcast %94 : vector<8x1x16xf32> to vector<8x16x16xf32>
    %97 = arith.mulf %95, %96 : vector<8x16x16xf32>
    %98 = arith.addf %90, %97 : vector<8x16x16xf32>
    %99 = vector.extract_strided_slice %19 {offsets = [0, 128], sizes = [8, 16], strides = [1, 1]} : vector<8x256xf32> to vector<8x16xf32>
    %100 = vector.extract_strided_slice %35 {offsets = [0, 128], sizes = [8, 16], strides = [1, 1]} : vector<8x256xf32> to vector<8x16xf32>
    %101 = vector.shape_cast %99 : vector<8x16xf32> to vector<8x16x1xf32>
    %102 = vector.shape_cast %100 : vector<8x16xf32> to vector<8x1x16xf32>
    %103 = vector.broadcast %101 : vector<8x16x1xf32> to vector<8x16x16xf32>
    %104 = vector.broadcast %102 : vector<8x1x16xf32> to vector<8x16x16xf32>
    %105 = arith.mulf %103, %104 : vector<8x16x16xf32>
    %106 = arith.addf %98, %105 : vector<8x16x16xf32>
    %107 = vector.extract_strided_slice %19 {offsets = [0, 144], sizes = [8, 16], strides = [1, 1]} : vector<8x256xf32> to vector<8x16xf32>
    %108 = vector.extract_strided_slice %35 {offsets = [0, 144], sizes = [8, 16], strides = [1, 1]} : vector<8x256xf32> to vector<8x16xf32>
    %109 = vector.shape_cast %107 : vector<8x16xf32> to vector<8x16x1xf32>
    %110 = vector.shape_cast %108 : vector<8x16xf32> to vector<8x1x16xf32>
    %111 = vector.broadcast %109 : vector<8x16x1xf32> to vector<8x16x16xf32>
    %112 = vector.broadcast %110 : vector<8x1x16xf32> to vector<8x16x16xf32>
    %113 = arith.mulf %111, %112 : vector<8x16x16xf32>
    %114 = arith.addf %106, %113 : vector<8x16x16xf32>
    %115 = vector.extract_strided_slice %19 {offsets = [0, 160], sizes = [8, 16], strides = [1, 1]} : vector<8x256xf32> to vector<8x16xf32>
    %116 = vector.extract_strided_slice %35 {offsets = [0, 160], sizes = [8, 16], strides = [1, 1]} : vector<8x256xf32> to vector<8x16xf32>
    %117 = vector.shape_cast %115 : vector<8x16xf32> to vector<8x16x1xf32>
    %118 = vector.shape_cast %116 : vector<8x16xf32> to vector<8x1x16xf32>
    %119 = vector.broadcast %117 : vector<8x16x1xf32> to vector<8x16x16xf32>
    %120 = vector.broadcast %118 : vector<8x1x16xf32> to vector<8x16x16xf32>
    %121 = arith.mulf %119, %120 : vector<8x16x16xf32>
    %122 = arith.addf %114, %121 : vector<8x16x16xf32>
    %123 = vector.extract_strided_slice %19 {offsets = [0, 176], sizes = [8, 16], strides = [1, 1]} : vector<8x256xf32> to vector<8x16xf32>
    %124 = vector.extract_strided_slice %35 {offsets = [0, 176], sizes = [8, 16], strides = [1, 1]} : vector<8x256xf32> to vector<8x16xf32>
    %125 = vector.shape_cast %123 : vector<8x16xf32> to vector<8x16x1xf32>
    %126 = vector.shape_cast %124 : vector<8x16xf32> to vector<8x1x16xf32>
    %127 = vector.broadcast %125 : vector<8x16x1xf32> to vector<8x16x16xf32>
    %128 = vector.broadcast %126 : vector<8x1x16xf32> to vector<8x16x16xf32>
    %129 = arith.mulf %127, %128 : vector<8x16x16xf32>
    %130 = arith.addf %122, %129 : vector<8x16x16xf32>
    %131 = vector.extract_strided_slice %19 {offsets = [0, 192], sizes = [8, 16], strides = [1, 1]} : vector<8x256xf32> to vector<8x16xf32>
    %132 = vector.extract_strided_slice %35 {offsets = [0, 192], sizes = [8, 16], strides = [1, 1]} : vector<8x256xf32> to vector<8x16xf32>
    %133 = vector.shape_cast %131 : vector<8x16xf32> to vector<8x16x1xf32>
    %134 = vector.shape_cast %132 : vector<8x16xf32> to vector<8x1x16xf32>
    %135 = vector.broadcast %133 : vector<8x16x1xf32> to vector<8x16x16xf32>
    %136 = vector.broadcast %134 : vector<8x1x16xf32> to vector<8x16x16xf32>
    %137 = arith.mulf %135, %136 : vector<8x16x16xf32>
    %138 = arith.addf %130, %137 : vector<8x16x16xf32>
    %139 = vector.extract_strided_slice %19 {offsets = [0, 208], sizes = [8, 16], strides = [1, 1]} : vector<8x256xf32> to vector<8x16xf32>
    %140 = vector.extract_strided_slice %35 {offsets = [0, 208], sizes = [8, 16], strides = [1, 1]} : vector<8x256xf32> to vector<8x16xf32>
    %141 = vector.shape_cast %139 : vector<8x16xf32> to vector<8x16x1xf32>
    %142 = vector.shape_cast %140 : vector<8x16xf32> to vector<8x1x16xf32>
    %143 = vector.broadcast %141 : vector<8x16x1xf32> to vector<8x16x16xf32>
    %144 = vector.broadcast %142 : vector<8x1x16xf32> to vector<8x16x16xf32>
    %145 = arith.mulf %143, %144 : vector<8x16x16xf32>
    %146 = arith.addf %138, %145 : vector<8x16x16xf32>
    %147 = vector.extract_strided_slice %19 {offsets = [0, 224], sizes = [8, 16], strides = [1, 1]} : vector<8x256xf32> to vector<8x16xf32>
    %148 = vector.extract_strided_slice %35 {offsets = [0, 224], sizes = [8, 16], strides = [1, 1]} : vector<8x256xf32> to vector<8x16xf32>
    %149 = vector.shape_cast %147 : vector<8x16xf32> to vector<8x16x1xf32>
    %150 = vector.shape_cast %148 : vector<8x16xf32> to vector<8x1x16xf32>
    %151 = vector.broadcast %149 : vector<8x16x1xf32> to vector<8x16x16xf32>
    %152 = vector.broadcast %150 : vector<8x1x16xf32> to vector<8x16x16xf32>
    %153 = arith.mulf %151, %152 : vector<8x16x16xf32>
    %154 = arith.addf %146, %153 : vector<8x16x16xf32>
    %155 = vector.extract_strided_slice %19 {offsets = [0, 240], sizes = [8, 16], strides = [1, 1]} : vector<8x256xf32> to vector<8x16xf32>
    %156 = vector.extract_strided_slice %35 {offsets = [0, 240], sizes = [8, 16], strides = [1, 1]} : vector<8x256xf32> to vector<8x16xf32>
    %157 = vector.shape_cast %155 : vector<8x16xf32> to vector<8x16x1xf32>
    %158 = vector.shape_cast %156 : vector<8x16xf32> to vector<8x1x16xf32>
    %159 = vector.broadcast %157 : vector<8x16x1xf32> to vector<8x16x16xf32>
    %160 = vector.broadcast %158 : vector<8x1x16xf32> to vector<8x16x16xf32>
    %161 = arith.mulf %159, %160 : vector<8x16x16xf32>
    %162 = arith.addf %154, %161 : vector<8x16x16xf32>
    %163 = vector.shape_cast %162 : vector<8x16x16xf32> to vector<8x256xf32>
    %c0_28 = arith.constant 0 : index
    %c0_29 = arith.constant 0 : index
    %164 = vector.load %arg12[%c0_28, %c0_29] : memref<8x4xf32, #tpu.memory_space<vmem>>, vector<8x4xf32>
    %cst_30 = arith.constant dense<0.000000e+00> : vector<8x256xf32>
    %165 = tpu.matmul %164, %1, %cst_30 {dimension_numbers = #tpu.dot_dimension_numbers<[1], [0], [0], [1], [0, 0, 1, 1], [], []>} : vector<8x4xf32>, vector<4x256xf32>, vector<8x256xf32> -> vector<8x256xf32>
    %c0_31 = arith.constant 0 : index
    %c0_32 = arith.constant 0 : index
    %166 = vector.load %arg13[%c0_31, %c0_32] : memref<8x8xf32, #tpu.memory_space<vmem>>, vector<8x8xf32>
    %cst_33 = arith.constant dense<0.000000e+00> : vector<8x256xf32>
    %167 = tpu.matmul %166, %163, %cst_33 {dimension_numbers = #tpu.dot_dimension_numbers<[1], [0], [0], [1], [0, 0, 1, 1], [], []>} : vector<8x8xf32>, vector<8x256xf32>, vector<8x256xf32> -> vector<8x256xf32>
    %168 = arith.addf %165, %167 : vector<8x256xf32>
    %c0_34 = arith.constant 0 : index
    %c0_35 = arith.constant 0 : index
    %169 = vector.load %arg14[%c0_34, %c0_35] : memref<8x1xf32, #tpu.memory_space<vmem>>, vector<8x1xf32>
    %170 = vector.broadcast %169 : vector<8x1xf32> to vector<8x256xf32>
    %171 = arith.addf %168, %170 : vector<8x256xf32>
    %172 = vector.broadcast %2 : vector<1x256xf32> to vector<8x256xf32>
    %173 = arith.mulf %171, %172 : vector<8x256xf32>
    %c0_36 = arith.constant 0 : index
    %c0_37 = arith.constant 0 : index
    %174 = vector.load %arg15[%c0_36, %c0_37] : memref<8x256xf32, #tpu.memory_space<vmem>>, vector<8x256xf32>
    tpu.vector_store %arg15[%c0_36, %c0_37], %173 {strides = array<i32>} : memref<8x256xf32, #tpu.memory_space<vmem>>, vector<8x256xf32>,
    return
  }
  func.func @transform_0(%arg0: i32) -> (i32, i32) {
    %c0_i32 = arith.constant 0 : i32
    %c0_i32_0 = arith.constant 0 : i32
    return %c0_i32, %arg0 : i32, i32
  }
  func.func @transform_1(%arg0: i32) -> (i32, i32) {
    %c0_i32 = arith.constant 0 : i32
    %c0_i32_0 = arith.constant 0 : i32
    return %c0_i32, %arg0 : i32, i32
  }
  func.func @transform_2(%arg0: i32) -> (i32, i32) {
    %c0_i32 = arith.constant 0 : i32
    %c0_i32_0 = arith.constant 0 : i32
    return %c0_i32, %arg0 : i32, i32
  }
  func.func @transform_3(%arg0: i32) -> (i32, i32) {
    %c0_i32 = arith.constant 0 : i32
    %c0_i32_0 = arith.constant 0 : i32
    %c0_i32_1 = arith.constant 0 : i32
    return %c0_i32, %c0_i32_0 : i32, i32
  }
  func.func @transform_4(%arg0: i32) -> (i32, i32) {
    %c0_i32 = arith.constant 0 : i32
    %c0_i32_0 = arith.constant 0 : i32
    %c0_i32_1 = arith.constant 0 : i32
    return %c0_i32, %c0_i32_0 : i32, i32
  }
  func.func @transform_5(%arg0: i32) -> (i32, i32) {
    %c0_i32 = arith.constant 0 : i32
    %c0_i32_0 = arith.constant 0 : i32
    %c0_i32_1 = arith.constant 0 : i32
    return %c0_i32, %c0_i32_0 : i32, i32
  }
  func.func @transform_6(%arg0: i32) -> (i32, i32) {
    %c0_i32 = arith.constant 0 : i32
    %c0_i32_0 = arith.constant 0 : i32
    %c0_i32_1 = arith.constant 0 : i32
    return %c0_i32, %c0_i32_0 : i32, i32
  }
  func.func @transform_7(%arg0: i32) -> (i32, i32) {
    %c0_i32 = arith.constant 0 : i32
    %c0_i32_0 = arith.constant 0 : i32
    %c0_i32_1 = arith.constant 0 : i32
    return %c0_i32, %c0_i32_0 : i32, i32
  }
  func.func @transform_8(%arg0: i32) -> (i32, i32) {
    %c0_i32 = arith.constant 0 : i32
    %c0_i32_0 = arith.constant 0 : i32
    %c0_i32_1 = arith.constant 0 : i32
    return %c0_i32, %c0_i32_0 : i32, i32
  }
  func.func @transform_9(%arg0: i32) -> (i32, i32) {
    %c0_i32 = arith.constant 0 : i32
    %c0_i32_0 = arith.constant 0 : i32
    %c0_i32_1 = arith.constant 0 : i32
    return %c0_i32, %c0_i32_0 : i32, i32
  }
  func.func @transform_10(%arg0: i32) -> (i32, i32) {
    %c0_i32 = arith.constant 0 : i32
    %c0_i32_0 = arith.constant 0 : i32
    %c0_i32_1 = arith.constant 0 : i32
    return %c0_i32, %c0_i32_0 : i32, i32
  }
  func.func @transform_11(%arg0: i32) -> (i32, i32) {
    %c0_i32 = arith.constant 0 : i32
    %c0_i32_0 = arith.constant 0 : i32
    %c0_i32_1 = arith.constant 0 : i32
    return %c0_i32, %c0_i32_0 : i32, i32
  }
  func.func @transform_12(%arg0: i32) -> (i32, i32) {
    %c0_i32 = arith.constant 0 : i32
    %c0_i32_0 = arith.constant 0 : i32
    %c0_i32_1 = arith.constant 0 : i32
    return %c0_i32, %c0_i32_0 : i32, i32
  }
  func.func @transform_13(%arg0: i32) -> (i32, i32) {
    %c0_i32 = arith.constant 0 : i32
    %c0_i32_0 = arith.constant 0 : i32
    %c0_i32_1 = arith.constant 0 : i32
    return %c0_i32, %c0_i32_0 : i32, i32
  }
  func.func @transform_14(%arg0: i32) -> (i32, i32) {
    %c0_i32 = arith.constant 0 : i32
    %c0_i32_0 = arith.constant 0 : i32
    return %c0_i32, %arg0 : i32, i32
  }
}

</mosaic_0001>

<bundles_post_ra>
// kernel: ppgn_block_forward.1
= control target key start
LH: loop header
LB: loop body
LE: loop exit
PB: predicated region body
PF: predicated region fallthrough
CT: control target
= control target key end

     0   :  { %s4535_s29 = smov 0   ;;  %s6592_s0 = inlined_call_operand.vmem [shape: f32[8,512], index: 0, kind: input, shape index: {}]   ;;  %s6593_s1 = inlined_call_operand.vmem [shape: f32[1,512], index: 1, kind: input, shape index: {}]   ;;  %s6594_s2 = inlined_call_operand.vmem [shape: f32[1,512], index: 2, kind: input, shape index: {}]   ;;  %s6595_s3 = inlined_call_operand.vmem [shape: f32[8,8], index: 3, kind: input, shape index: {}]   ;;  %s6596_s4 = inlined_call_operand.vmem [shape: f32[8,1], index: 4, kind: input, shape index: {}]   ;;  %s6597_s5 = inlined_call_operand.vmem [shape: f32[8,8], index: 5, kind: input, shape index: {}]   ;;  %s6598_s6 = inlined_call_operand.vmem [shape: f32[8,1], index: 6, kind: input, shape index: {}]   ;;  %s6599_s7 = inlined_call_operand.vmem [shape: f32[8,4], index: 7, kind: input, shape index: {}]   ;;  %s6600_s8 = inlined_call_operand.vmem [shape: f32[8,1], index: 8, kind: input, shape index: {}]   ;;  %s6601_s9 = inlined_call_operand.vmem [shape: f32[8,8], index: 9, kind: input, shape index: {}]   ;;  %s6602_s10 = inlined_call_operand.vmem [shape: f32[8,1], index: 10, kind: input, shape index: {}]   ;;  %s6603_s11 = inlined_call_operand.vmem [shape: f32[8,4], index: 11, kind: input, shape index: {}]   ;;  %s6604_s12 = inlined_call_operand.vmem [shape: f32[8,8], index: 12, kind: input, shape index: {}]   ;;  %s6605_s13 = inlined_call_operand.vmem [shape: f32[8,1], index: 13, kind: input, shape index: {}]   ;;  %s6606_s14 = inlined_call_operand.vmem [shape: f32[8,512], index: 14, kind: output, shape index: {}]  }
   0x1 LB: > { %s4212_s30 = sadd.s32 4294967295, %s4448_s29   ;;  %p4216_p0 = scmp.ge.s32.totalorder %s4448_s29, 1  ;;  %s4448_s29 = sphi %s4535_s29, %s24_s29  }
   0x2   : > { %p433_p1 = scmp.lt.s32.totalorder %s4448_s29, 3 }
   0x4   : > { %p434_p2 = pnand %p4216_p0, %p433_p1 }
   0x6   : > { %437 = sbr.rel (%p434_p2) target bundleno = 3049 (0xbe9), region = 76 }
   0xb   : > { %s4217_s15 = sshll.u32 %s4212_s30, 1  ;;  %v514_v0 = vld [vmem:[%s6596_s4] sm:$0xff]  ;;  %v6608_v1 = vmov 0   ;;  %vm520_vm0 = vcmask 64512   ;;  %vm636_vm1 = vcmask 1043456   ;;  %vm632_vm2 = vcmask 31744  }
   0xc   : > { %p488_p3 = scmp.lt.s32.totalorder %s4217_s15, 3  ;;  %4259 = vset.pattern.permute.xlu0 %v6608_v1  ;;  %4260 = vset.pattern.permute.xlu1 %v6608_v1  ;;  %v626_v2 = vld [vmem:[%s6600_s8] sm:$0xff]  ;;  %v745_v25 = vlaneseq  ;;  %s4451_s30 = smov 112   ;;  %vm3737_vm3 = vcmask 1047556   ;;  %vm4017_vm4 = vcmask 130048   ;;  %vm4019_vm5 = vcmask 261120  }
   0xd   : > { %517 = vperm.xlu0 %4259, %v514_v0   ;;  %629 = vperm.xlu1 %4260, %v626_v2   ;;  %v513_v3 = vld [vmem:[%s6595_s3] sm:$0xff]  ;;  %s4452_s16 = smov 96   ;;  %s4453_s17 = smov 80   ;;  %vm4021_vm6 = vcmask 392192   ;;  %vm4023_vm7 = vcmask 523264   ;;  %vm4025_vm8 = vcmask 654336  }
   0xe   : > { %s6967_s15 = smov (!%p488_p3, %s4217_s15), 3  ;;  %v567_v6 = vld [vmem:[%s6598_s6] sm:$0xff]  ;;  %v4589_v26 = vshrl.u32 %v745_v25, 7  ;;  %s4454_s18 = smov 64   ;;  %vm4027_vm9 = vcmask 785408   ;;  %vm4029_vm10 = vcmask 916480  }
   0xf   : > { %s4218_s20 = sshll.u32 %s6967_s15, 3  ;;  %v625_v7 = vld [vmem:[%s6599_s7] sm:$0xff]  ;;  %s4604_s25 = scalar_lea.vmem %s6594_s2, %s6967_s15 }
  0x10   : > { %s491_s23 = scalar_lea.vmem %s6592_s0, %s4218_s20  ;;  %v686_v8 = vld [vmem:[%s6602_s10] sm:$0xff]  ;;  %4261 = vset.pattern.permute.xlu2 %v4589_v26  ;;  %v4593_v27 = vadd.s32 8, %v4589_v26  ;;  %v4596_v28 = vadd.s32 24, %v4589_v26  ;;  %v4618_v38 = vadd.s32 16, %v4589_v26  ;;  %v4641_v43 = vadd.s32 32, %v4589_v26  ;;  %s4750_s28 = scalar_lea.vmem %s6593_s1, %s6967_s15 }
  0x11   : > { %v509_v4 = vld [vmem:[%s491_s23] sm:$0xff]  ;;  %v510_v5 = vld [vmem:[%s491_s23 + $0x8] sm:$0xff]  ;;  %v4652_v45 = vadd.s32 40, %v4589_v26  ;;  %v4669_v47 = vadd.s32 48, %v4589_v26  ;;  %v4678_v48 = vadd.s32 56, %v4589_v26  ;;  %v4703_v51 = vadd.s32 64, %v4589_v26 }
  0x12   : > { %539 = vmatpush.msra.mxu0 %v509_v4  ;;  %559 = vmatpush.msra.mxu1 %v510_v5  ;;  %v566_v16 = vld [vmem:[%s6597_s5] sm:$0xff]  ;;  %v4720_v56 = vadd.s32 72, %v4589_v26  ;;  %s4455_s19 = smov 48   ;;  %s4456_s21 = smov 32  }
  0x13   : > { %4223 = vmatmul.msk.f32.vlgmr.msra.gmra.mxu0 %vm520_vm0, %v513_v3  ;;  %4224 = vmatmul.msk.f32.vlgmr.msra.gmra.mxu1 %vm520_vm0, %v513_v3  ;;  %v685_v23 = vld [vmem:[%s6601_s9] sm:$0xff]  ;;  %s4457_s22 = smov 16  }
  0x14   : > { %4227 = vmatpush.msk.msrb.mxu0 %vm636_vm1, %v509_v4  ;;  %4229 = vmatpush.msk.msrb.mxu1 %vm636_vm1, %v510_v5  ;;  %v512_v29 = vld [vmem:[%s4604_s25] sm:$0x3] }
  0x15   : > { %570 = vperm.xlu0 %4259, %v567_v6   ;;  %689 = vperm.xlu1 %4260, %v686_v8   ;;  %v619_v33 = vperm.slane %v512_v29, 0 }
  0x1b   : > { %4228 = vmatmul.msk.f32.vlgmr.msrb.gmra.mxu0 %vm632_vm2, %v625_v7  ;;  %4230 = vmatmul.msk.f32.vlgmr.msrb.gmra.mxu1 %vm632_vm2, %v625_v7 }
  0x1d   : > { %4263 = vset.pattern.permute.xlu1 %v4593_v27  ;;  %4270 = vset.pattern.permute.xlu0 %v4596_v28 }
  0x7f   : > { %v518_v9 = vpop.permute.xlu0 %517  ;;  %v630_v17 = vpop.permute.xlu1 %629 }
  0x87   : > { %v4607_v30 = vpop.permute.xlu0 %570  ;;  %v4697_v49 = vpop.permute.xlu1 %689 }
  0x90   : > { %v541_v10 = vpop.f32.mrf.mxu0  ;;  %v561_v11 = vpop.f32.mrf.mxu1 }
  0x91   : > { %v542_v12 = vadd.f32 %v541_v10, %v518_v9  ;;  %v562_v13 = vadd.f32 %v561_v11, %v518_v9 }
  0x93   : > { %v564_v14 = vmax.f32 %v542_v12, 0.0  ;;  %v565_v15 = vmax.f32 %v562_v13, 0.0 }
  0x95   : > { %591 = vmatpush.msra.mxu2 %v564_v14  ;;  %611 = vmatpush.msra.mxu3 %v565_v15 }
  0x96   : > { %4225 = vmatmul.msk.f32.vlgmr.msra.gmra.mxu2 %vm520_vm0, %v566_v16  ;;  %4226 = vmatmul.msk.f32.vlgmr.msra.gmra.mxu3 %vm520_vm0, %v566_v16 }
  0x98   : > { %v660_v18 = vpop.f32.mrf.mxu0  ;;  %v680_v19 = vpop.f32.mrf.mxu1 }
  0x99   : > { %v661_v20 = vadd.f32 %v660_v18, %v630_v17  ;;  %v681_v21 = vadd.f32 %v680_v19, %v630_v17 }
  0x9b   : > { %v683_v22 = vmax.f32 %v661_v20, 0.0  ;;  %v684_v24 = vmax.f32 %v681_v21, 0.0 }
  0x9d   : > { %710 = vmatpush.msrb.mxu2 %v683_v22  ;;  %730 = vmatpush.msrb.mxu3 %v684_v24 }
  0x9e   : > { %4231 = vmatmul.msk.f32.vlgmr.msrb.gmra.mxu2 %vm520_vm0, %v685_v23  ;;  %4232 = vmatmul.msk.f32.vlgmr.msrb.gmra.mxu3 %vm520_vm0, %v685_v23 }
  0x9f   : > { %4235 = vmatpush.msk.msra.mxu2 %vm636_vm1, %v509_v4  ;;  %4237 = vmatpush.msk.msra.mxu3 %vm636_vm1, %v510_v5  ;;  %v4760_v4 = vld [vmem:[%s4750_s28] sm:$0x3] }
  0xa0   : > { %6646 = vst [vmem:[#allocation13_spill] sm:$0xff] %v4760_v4  ;;  %v6607_v6 = vperm.slane %v4760_v4, 0 }
 0x119   : > { %v593_v31 = vpop.f32.mrf.mxu2 }
 0x11a   : > { %v594_v32 = vadd.f32 %v593_v31, %v4607_v30 }
 0x11c   : > { %v616_v34 = vmax.f32 %v594_v32, 0.0 }
 0x11e   : > { %v623_v35 = vmul.f32 %v619_v33, %v616_v34 }
 0x120   : > { %v4610_v36 = vperm.slane %v623_v35, 0  ;;  %v4612_v37 = vperm.slane %v623_v35, 1  ;;  %v4620_v39 = vperm.slane %v623_v35, 2  ;;  %v4625_v40 = vperm.slane %v623_v35, 3 }
 0x121   : > { %v4630_v41 = vperm.slane %v623_v35, 4  ;;  %v4635_v42 = vperm.slane %v623_v35, 5  ;;  %v4646_v44 = vperm.slane %v623_v35, 6  ;;  %v4654_v46 = vperm.slane %v623_v35, 7  ;;  %v712_v63 = vpop.f32.mrf.mxu2 }
 0x122   : > { %768 = vperm.xlu1 %4263, %v4612_v37   ;;  %898 = vperm.xlu0 %4270, %v4610_v36   ;;  %v713_v3 = vadd.f32 %v712_v63, %v4697_v49 }
 0x123   : > { %749 = vperm.xlu2 %4261, %v4610_v36  }
 0x124   : > { %v735_v5 = vmax.f32 %v713_v3, 0.0 }
 0x126   : > { %v4768_v9 = vmul.f32 %v6607_v6, %v735_v5 }
 0x128   : > { %v4774_v10 = vperm.slane %v4768_v9, 0  ;;  %v849_v13 = vrot.slane %v4768_v9, 1  ;;  %v851_v18 = vrot.slane %v4768_v9, 3  ;;  %v852_v24 = vrot.slane %v4768_v9, 4 }
 0x129   : > { %v854_v33 = vrot.slane %v4768_v9, 6  ;;  %v853_v6 = vrot.slane %v4768_v9, 5 }
 0x12a   : > { %781 = vperm.xlu1 %4263, %v4620_v39   ;;  %4273 = vset.pattern.permute.xlu0 %v4618_v38  ;;  %6647 = vst [vmem:[#allocation14_spill] sm:$0xff] %v4774_v10  ;;  %v4785_v16 = vperm.slane %v849_v13, 0  ;;  %v4796_v22 = vperm.slane %v851_v18, 0  ;;  %v4805_v31 = vperm.slane %v852_v24, 0 }
 0x12b   : > { %4262 = vset.pattern.permute.xlu2 %v4593_v27  ;;  %v4814_v63 = vperm.slane %v854_v33, 0 }
 0x12c   : > { %6648 = vst [vmem:[#allocation15_spill] sm:$0xff] %v4785_v16 }
 0x12d   : > { %6649 = vst [vmem:[#allocation16_spill] sm:$0xff] %v4805_v31 }
 0x12e   : > { %6650 = vst [vmem:[#allocation17_spill] sm:$0xff] %v4814_v63 }
 0x132   : > { %4265 = vset.pattern.permute.xlu1 %v4589_v26  ;;  %928 = vperm.xlu0 %4273, %v4625_v40  }
 0x133   : > { %755 = vperm.xlu2 %4262, %v4610_v36  }
 0x13a   : > { %801 = vperm.xlu1 %4265, %v4630_v41   ;;  %4276 = vset.pattern.permute.xlu0 %v4596_v28 }
 0x13b   : > { %4264 = vset.pattern.permute.xlu2 %v4589_v26 }
 0x142   : > { %814 = vperm.xlu1 %4265, %v4635_v42   ;;  %958 = vperm.xlu0 %4276, %v4635_v42  }
 0x143   : > { %775 = vperm.xlu2 %4264, %v4620_v39  }
 0x14a   : > { %4267 = vset.pattern.permute.xlu1 %v4593_v27  ;;  %4281 = vset.pattern.permute.xlu0 %v4641_v43 }
 0x14b   : > { %788 = vperm.xlu2 %4264, %v4625_v40  }
 0x152   : > { %833 = vperm.xlu1 %4267, %v4646_v44   ;;  %1096 = vperm.xlu0 %4281, %v4612_v37  }
 0x153   : > { %4266 = vset.pattern.permute.xlu2 %v4593_v27 }
 0x15a   : > { %846 = vperm.xlu1 %4267, %v4654_v46   ;;  %4284 = vset.pattern.permute.xlu0 %v4652_v45 }
 0x15b   : > { %807 = vperm.xlu2 %4266, %v4630_v41  }
 0x162   : > { %4271 = vset.pattern.permute.xlu1 %v4618_v38  ;;  %1126 = vperm.xlu0 %4284, %v4625_v40  }
 0x163   : > { %820 = vperm.xlu2 %4266, %v4635_v42  }
 0x16a   : > { %904 = vperm.xlu1 %4271, %v4612_v37   ;;  %4287 = vset.pattern.permute.xlu0 %v4641_v43 }
 0x16b   : > { %4268 = vset.pattern.permute.xlu2 %v4589_v26 }
 0x172   : > { %916 = vperm.xlu1 %4271, %v4620_v39   ;;  %1156 = vperm.xlu0 %4287, %v4646_v44  }
 0x173   : > { %840 = vperm.xlu2 %4268, %v4654_v46  }
 0x17a   : > { %4274 = vset.pattern.permute.xlu1 %v4596_v28  ;;  %4290 = vset.pattern.permute.xlu0 %v4669_v47 }
 0x17b   : > { %4269 = vset.pattern.permute.xlu2 %v4618_v38 }
 0x17d   : > { %v4700_v50 = vpop.permute.xlu2 %749 }
 0x17e   : > { %6635 = vst [vmem:[#allocation2_spill] sm:$0xff] %v4700_v50 }
 0x182   : > { %934 = vperm.xlu1 %4274, %v4625_v40   ;;  %1276 = vperm.xlu0 %4290, %v4610_v36  }
 0x183   : > { %892 = vperm.xlu2 %4269, %v4610_v36  }
 0x18a   : > { %946 = vperm.xlu1 %4274, %v4630_v41   ;;  %4293 = vset.pattern.permute.xlu0 %v4678_v48 }
 0x18b   : > { %4272 = vset.pattern.permute.xlu2 %v4596_v28 }
 0x18d   : > { %v4710_v53 = vpop.permute.xlu2 %755 }
 0x18e   : > { %6637 = vst [vmem:[#allocation4_spill] sm:$0xff] %v4710_v53 }
 0x192   : > { %4277 = vset.pattern.permute.xlu1 %v4618_v38  ;;  %1306 = vperm.xlu0 %4293, %v4620_v39  }
 0x193   : > { %910 = vperm.xlu2 %4272, %v4612_v37  }
 0x194   : > { %v4707_v52 = vpop.permute.xlu1 %768  ;;  %v4783_v15 = vpop.permute.xlu0 %898 }
 0x195   : > { %6636 = vst [vmem:[#allocation3_spill] sm:$0xff] %v4707_v52 }
 0x19a   : > { %964 = vperm.xlu1 %4277, %v4646_v44   ;;  %4296 = vset.pattern.permute.xlu0 %v4669_v47 }
 0x19b   : > { %922 = vperm.xlu2 %4272, %v4620_v39  }
 0x19c   : > { %v4715_v54 = vpop.permute.xlu1 %781 }
 0x19d   : > { %6638 = vst [vmem:[#allocation5_spill] sm:$0xff] %v4715_v54  ;;  %v4717_v55 = vpop.permute.xlu2 %775 }
 0x1a2   : > { %976 = vperm.xlu1 %4277, %v4654_v46   ;;  %1336 = vperm.xlu0 %4296, %v4635_v42  }
 0x1a3   : > { %4275 = vset.pattern.permute.xlu2 %v4618_v38 }
 0x1a4   : > { %v929_v21 = vpop.permute.xlu0 %928 }
 0x1a5   : > { %v4727_v58 = vpop.permute.xlu2 %788  ;;  %v990_v23 = vmul.f32 %v929_v21, %v4796_v22 }
 0x1a6   : > { %6640 = vst [vmem:[#allocation7_spill] sm:$0xff] %v4727_v58 }
 0x1aa   : > { %4279 = vset.pattern.permute.xlu1 %v4641_v43  ;;  %4299 = vset.pattern.permute.xlu0 %v4678_v48 }
 0x1ab   : > { %940 = vperm.xlu2 %4275, %v4630_v41  }
 0x1ac   : > { %v4725_v57 = vpop.permute.xlu1 %801 }
 0x1ad   : > { %6639 = vst [vmem:[#allocation6_spill] sm:$0xff] %v4725_v57  ;;  %v985_v57 = vmul.f32 %v4783_v15, %v4774_v10 }
 0x1b2   : > { %1084 = vperm.xlu1 %4279, %v4610_v36   ;;  %1366 = vperm.xlu0 %4299, %v4654_v46  }
 0x1b3   : > { %952 = vperm.xlu2 %4275, %v4635_v42  }
 0x1b4   : > { %v4732_v59 = vpop.permute.xlu1 %814 }
 0x1b5   : > { %v4734_v60 = vpop.permute.xlu2 %807 }
 0x1b6   : > { %6641 = vst [vmem:[#allocation8_spill] sm:$0xff] %v4734_v60 }
 0x1ba   : > { %4282 = vset.pattern.permute.xlu1 %v4652_v45  ;;  %4300 = vset.pattern.permute.xlu0 %v4703_v51 }
 0x1bb   : > { %4278 = vset.pattern.permute.xlu2 %v4596_v28 }
 0x1bd   : > { %v4741_v62 = vpop.permute.xlu2 %820 }
 0x1be   : > { %6643 = vst [vmem:[#allocation10_spill] sm:$0xff] %v4741_v62 }
 0x1c2   : > { %1102 = vperm.xlu1 %4282, %v4612_v37   ;;  %1468 = vperm.xlu0 %4300, %v4610_v36  }
 0x1c3   : > { %970 = vperm.xlu2 %4278, %v4646_v44  }
 0x1c4   : > { %v4739_v61 = vpop.permute.xlu1 %833 }
 0x1c5   : > { %6642 = vst [vmem:[#allocation9_spill] sm:$0xff] %v4739_v61 }
 0x1ca   : > { %1114 = vperm.xlu1 %4282, %v4620_v39   ;;  %4303 = vset.pattern.permute.xlu0 %v4720_v56 }
 0x1cb   : > { %982 = vperm.xlu2 %4278, %v4654_v46  }
 0x1cc   : > { %v4752_v0 = vpop.permute.xlu1 %846 }
 0x1cd   : > { %6644 = vst [vmem:[#allocation11_spill] sm:$0xff] %v4752_v0  ;;  %v4754_v2 = vpop.permute.xlu2 %840 }
 0x1ce   : > { %6645 = vst [vmem:[#allocation12_spill] sm:$0xff] %v4754_v2 }
 0x1d2   : > { %4285 = vset.pattern.permute.xlu1 %v4641_v43  ;;  %1498 = vperm.xlu0 %4303, %v4620_v39  }
 0x1d3   : > { %4280 = vset.pattern.permute.xlu2 %v4652_v45 }
 0x1da   : > { %1132 = vperm.xlu1 %4285, %v4630_v41   ;;  %4306 = vset.pattern.permute.xlu0 %v4703_v51 }
 0x1db   : > { %1090 = vperm.xlu2 %4280, %v4610_v36  }
 0x1dc   : > { %v4764_v7 = vpop.permute.xlu1 %904 }
 0x1dd   : > { %v893_v8 = vpop.permute.xlu2 %892 }
 0x1de   : > { %v984_v11 = vmul.f32 %v893_v8, %v4774_v10  ;;  %v855_v8 = vrot.slane %v4768_v9, 7 }
 0x1e2   : > { %1144 = vperm.xlu1 %4285, %v4635_v42   ;;  %1528 = vperm.xlu0 %4306, %v4635_v42  }
 0x1e3   : > { %4283 = vset.pattern.permute.xlu2 %v4641_v43 }
 0x1e4   : > { %v4780_v14 = vpop.permute.xlu1 %916 }
 0x1ea   : > { %4288 = vset.pattern.permute.xlu1 %v4652_v45  ;;  %4309 = vset.pattern.permute.xlu0 %v4720_v56 }
 0x1eb   : > { %1108 = vperm.xlu2 %4283, %v4620_v39  }
 0x1ed   : > { %v911_v12 = vpop.permute.xlu2 %910 }
 0x1ee   : > { %v987_v17 = vmul.f32 %v911_v12, %v4785_v16 }
 0x1f2   : > { %1162 = vperm.xlu1 %4288, %v4646_v44   ;;  %1558 = vperm.xlu0 %4309, %v4654_v46  }
 0x1f3   : > { %1120 = vperm.xlu2 %4283, %v4625_v40  }
 0x1f4   : > { %v4791_v19 = vpop.permute.xlu1 %934 }
 0x1f5   : > { %v4793_v20 = vpop.permute.xlu2 %922  ;;  %v991_v50 = vmul.f32 %v4791_v19, %v4796_v22 }
 0x1fa   : > { %1174 = vperm.xlu1 %4288, %v4654_v46   ;;  %1016 = vrot.lane.b32.xlu0 %v984_v11, %s4451_s30  ;;  %v4825_v11 = vperm.slane %v855_v8, 0 }
 0x1fb   : > { %4286 = vset.pattern.permute.xlu2 %v4652_v45 }
 0x1fc   : > { %v947_v29 = vpop.permute.xlu1 %946  ;;  %6651 = vst [vmem:[#allocation18_spill] sm:$0xff] %v4825_v11 }
 0x1fd   : > { %v993_v32 = vmul.f32 %v947_v29, %v4805_v31  ;;  %v4842_v29 = vpop.permute.xlu0 %958 }
 0x202   : > { %4291 = vset.pattern.permute.xlu1 %v4678_v48  ;;  %1022 = vrot.lane.b32.xlu0 %v987_v17, %s4451_s30 }
 0x203   : > { %1138 = vperm.xlu2 %4286, %v4630_v41  }
 0x205   : > { %v4802_v25 = vpop.permute.xlu2 %940  ;;  %v4847_v33 = vpop.permute.xlu0 %1096 }
 0x206   : > { %v1178_v53 = vmul.f32 %v4847_v33, %v4785_v16 }
 0x20a   : > { %1282 = vperm.xlu1 %4291, %v4610_v36   ;;  %1028 = vrot.lane.b32.xlu0 %v990_v23, %s4451_s30 }
 0x20b   : > { %1150 = vperm.xlu2 %4286, %v4635_v42  }
 0x20c   : > { %v965_v34 = vpop.permute.xlu1 %964 }
 0x20d   : > { %v4812_v35 = vpop.permute.xlu2 %952  ;;  %v996_v3 = vmul.f32 %v965_v34, %v4814_v63 }
 0x212   : > { %1294 = vperm.xlu1 %4291, %v4612_v37   ;;  %1034 = vrot.lane.b32.xlu0 %v993_v32, %s4451_s30  ;;  %v850_v32 = vrot.slane %v4768_v9, 2 }
 0x213   : > { %4289 = vset.pattern.permute.xlu2 %v4641_v43 }
 0x214   : > { %v4829_v17 = vpop.permute.xlu1 %976  ;;  %v4850_v34 = vperm.slane %v850_v32, 0  ;;  %v4864_v32 = vperm.slane %v853_v6, 0 }
 0x216   : > { %v988_v60 = vmul.f32 %v4780_v14, %v4850_v34  ;;  %v995_v33 = vmul.f32 %v4842_v29, %v4864_v32 }
 0x21a   : > { %4294 = vset.pattern.permute.xlu1 %v4669_v47  ;;  %1040 = vrot.lane.b32.xlu0 %v996_v3, %s4451_s30 }
 0x21b   : > { %1168 = vperm.xlu2 %4289, %v4654_v46  }
 0x21d   : > { %v4820_v5 = vpop.permute.xlu2 %970 }
 0x222   : > { %1312 = vperm.xlu1 %4294, %v4625_v40  }
 0x223   : > { %4292 = vset.pattern.permute.xlu2 %v4669_v47 }
 0x224   : > { %v4833_v18 = vpop.permute.xlu1 %1084 }
 0x225   : > { %v983_v12 = vpop.permute.xlu2 %982 }
 0x226   : > { %v999_v13 = vmul.f32 %v983_v12, %v4825_v11 }
 0x228   : > { %1046 = vrot.lane.b32.xlu0 %v999_v13, %s4451_s30  ;;  %v1127_v13 = vpop.permute.xlu0 %1126 }
 0x22a   : > { %1324 = vperm.xlu1 %4294, %v4630_v41  }
 0x22b   : > { %1288 = vperm.xlu2 %4292, %v4612_v37  }
 0x230   : > { %v4897_v4 = vpop.permute.xlu0 %1156 }
 0x232   : > { %4297 = vset.pattern.permute.xlu1 %v4678_v48 }
 0x233   : > { %1300 = vperm.xlu2 %4292, %v4620_v39  }
 0x234   : > { %v4839_v24 = vpop.permute.xlu1 %1102 }
 0x235   : > { %v1091_v21 = vpop.permute.xlu2 %1090 }
 0x236   : > { %v1177_v23 = vmul.f32 %v1091_v21, %v4774_v10 }
 0x238   : > { %1210 = vrot.lane.b32.xlu0 %v1177_v23, %s4452_s16  ;;  %v1183_v23 = vmul.f32 %v1127_v13, %v4796_v22  ;;  %v4905_v0 = vpop.permute.xlu0 %1276 }
 0x23a   : > { %1342 = vperm.xlu1 %4297, %v4635_v42  }
 0x23b   : > { %4295 = vset.pattern.permute.xlu2 %v4678_v48 }
 0x23c   : > { %v4852_v3 = vpop.permute.xlu1 %1114 }
 0x240   : > { %v4913_v58 = vpop.permute.xlu0 %1306 }
 0x242   : > { %1354 = vperm.xlu1 %4297, %v4646_v44  }
 0x243   : > { %1318 = vperm.xlu2 %4295, %v4625_v40  }
 0x245   : > { %v1109_v8 = vpop.permute.xlu2 %1108 }
 0x246   : > { %v1180_v12 = vmul.f32 %v1109_v8, %v4850_v34 }
 0x248   : > { %1216 = vrot.lane.b32.xlu0 %v1180_v12, %s4452_s16 }
 0x24a   : > { %4301 = vset.pattern.permute.xlu1 %v4720_v56 }
 0x24b   : > { %1330 = vperm.xlu2 %4295, %v4630_v41  }
 0x24c   : > { %v4858_v21 = vpop.permute.xlu1 %1132 }
 0x24d   : > { %v4872_v9 = vpop.permute.xlu2 %1120 }
 0x250   : > { %1222 = vrot.lane.b32.xlu0 %v1183_v23, %s4452_s16 }
 0x252   : > { %1474 = vperm.xlu1 %4301, %v4610_v36  }
 0x253   : > { %4298 = vset.pattern.permute.xlu2 %v4669_v47 }
 0x254   : > { %v1145_v8 = vpop.permute.xlu1 %1144 }
 0x255   : > { %v1186_v12 = vmul.f32 %v1145_v8, %v4864_v32 }
 0x258   : > { %1228 = vrot.lane.b32.xlu0 %v1186_v12, %s4452_s16 }
 0x25a   : > { %1486 = vperm.xlu1 %4301, %v4612_v37  }
 0x25b   : > { %1348 = vperm.xlu2 %4298, %v4646_v44  }
 0x25d   : > { %v4878_v23 = vpop.permute.xlu2 %1138 }
 0x262   : > { %4304 = vset.pattern.permute.xlu1 %v4703_v51 }
 0x263   : > { %1360 = vperm.xlu2 %4298, %v4654_v46  }
 0x264   : > { %v1163_v13 = vpop.permute.xlu1 %1162 }
 0x265   : > { %v1189_v6 = vmul.f32 %v1163_v13, %v4814_v63  ;;  %v4883_v8 = vpop.permute.xlu2 %1150 }
 0x267   : > { %1234 = vrot.lane.b32.xlu0 %v1189_v6, %s4452_s16 }
 0x26a   : > { %1504 = vperm.xlu1 %4304, %v4625_v40  }
 0x26b   : > { %4302 = vset.pattern.permute.xlu2 %v4703_v51 }
 0x26c   : > { %v4889_v13 = vpop.permute.xlu1 %1174 }
 0x272   : > { %1516 = vperm.xlu1 %4304, %v4630_v41  }
 0x273   : > { %1480 = vperm.xlu2 %4302, %v4612_v37  }
 0x275   : > { %v4887_v12 = vpop.permute.xlu2 %1168 }
 0x27a   : > { %4307 = vset.pattern.permute.xlu1 %v4720_v56 }
 0x27b   : > { %1492 = vperm.xlu2 %4302, %v4620_v39  }
 0x27c   : > { %v4895_v1 = vpop.permute.xlu1 %1282 }
 0x282   : > { %1534 = vperm.xlu1 %4307, %v4635_v42  }
 0x283   : > { %4305 = vset.pattern.permute.xlu2 %v4720_v56 }
 0x284   : > { %v4907_v54 = vpop.permute.xlu1 %1294 }
 0x285   : > { %v4893_v6 = vpop.permute.xlu2 %1288 }
 0x28a   : > { %1546 = vperm.xlu1 %4307, %v4646_v44  }
 0x28b   : > { %1510 = vperm.xlu2 %4305, %v4625_v40  }
 0x28d   : > { %v1301_v2 = vpop.permute.xlu2 %1300 }
 0x28e   : > { %v1372_v62 = vmul.f32 %v1301_v2, %v4850_v34 }
 0x290   : > { %1408 = vrot.lane.b32.xlu0 %v1372_v62, %s4453_s17 }
 0x292   : > { %1018 = vrot.lane.b32.xlu1 %v985_v57, %s4451_s30  ;;  %v1337_v57 = vpop.permute.xlu0 %1336 }
 0x293   : > { %1522 = vperm.xlu2 %4305, %v4630_v41   ;;  %v1378_v52 = vmul.f32 %v1337_v57, %v4864_v32 }
 0x294   : > { %v4915_v2 = vpop.permute.xlu1 %1312 }
 0x29a   : > { %1024 = vrot.lane.b32.xlu1 %v988_v60, %s4451_s30  ;;  %v994_v60 = vmul.f32 %v4812_v35, %v4864_v32 }
 0x29b   : > { %4308 = vset.pattern.permute.xlu2 %v4703_v51 }
 0x29c   : > { %v4925_v14 = vpop.permute.xlu1 %1324 }
 0x29d   : > { %v1319_v62 = vpop.permute.xlu2 %1318 }
 0x29e   : > { %v1375_v15 = vmul.f32 %v1319_v62, %v4796_v22  ;;  %v4931_v62 = vpop.permute.xlu0 %1366 }
 0x2a0   : > { %1414 = vrot.lane.b32.xlu0 %v1375_v15, %s4453_s17  ;;  %v986_v15 = vmul.f32 %v4764_v7, %v4785_v16 }
 0x2a2   : > { %1030 = vrot.lane.b32.xlu1 %v991_v50, %s4451_s30  ;;  %v997_v50 = vmul.f32 %v4820_v5, %v4814_v63  ;;  %v989_v5 = vmul.f32 %v4793_v20, %v4850_v34 }
 0x2a3   : > { %1540 = vperm.xlu2 %4308, %v4646_v44  }
 0x2a5   : > { %v4944_v35 = vpop.permute.xlu2 %1330 }
 0x2a6   : > { %v4941_v57 = vpop.permute.xlu0 %1468 }
 0x2a8   : > { %1420 = vrot.lane.b32.xlu0 %v1378_v52, %s4453_s17 }
 0x2aa   : > { %1036 = vrot.lane.b32.xlu1 %v994_v60, %s4451_s30 }
 0x2ab   : > { %1552 = vperm.xlu2 %4308, %v4654_v46  }
 0x2ac   : > { %v4935_v19 = vpop.permute.xlu1 %1342 }
 0x2ae   : > { %v4953_v7 = vpop.permute.xlu0 %1498 }
 0x2b2   : > { %1042 = vrot.lane.b32.xlu1 %v997_v50, %s4451_s30 }
 0x2b3   : > { %1020 = vrot.lane.b32.xlu2 %v986_v15, %s4451_s30  ;;  %v1181_v15 = vmul.f32 %v4852_v3, %v4850_v34  ;;  %v1187_v3 = vmul.f32 %v4883_v8, %v4864_v32  ;;  %v1176_v8 = vmul.f32 %v4833_v18, %v4774_v10  ;;  %v1179_v18 = vmul.f32 %v4839_v24, %v4785_v16 }
 0x2b4   : > { %v1355_v52 = vpop.permute.xlu1 %1354 }
 0x2b5   : > { %v1381_v60 = vmul.f32 %v1355_v52, %v4814_v63  ;;  %v4956_v50 = vpop.permute.xlu2 %1348  ;;  %v992_v52 = vmul.f32 %v4802_v25, %v4805_v31 }
 0x2b7   : > { %1426 = vrot.lane.b32.xlu0 %v1381_v60, %s4453_s17  ;;  %v1529_v60 = vpop.permute.xlu0 %1528 }
 0x2ba   : > { %1212 = vrot.lane.b32.xlu1 %v1178_v53, %s4452_s16  ;;  %v1184_v53 = vmul.f32 %v4858_v21, %v4805_v31 }
 0x2bb   : > { %1026 = vrot.lane.b32.xlu2 %v989_v5, %s4451_s30 }
 0x2bd   : > { %v4965_v20 = vpop.permute.xlu2 %1360 }
 0x2bf   : > { %v4971_v5 = vpop.permute.xlu0 %1558 }
 0x2c2   : > { %1218 = vrot.lane.b32.xlu1 %v1181_v15, %s4452_s16 }
 0x2c3   : > { %1032 = vrot.lane.b32.xlu2 %v992_v52, %s4451_s30  ;;  %v998_v52 = vmul.f32 %v4829_v17, %v4825_v11 }
 0x2c4   : > { %v4979_v15 = vpop.permute.xlu1 %1474 }
 0x2c7   : > { %v4984_v21 = vpop.permute.xlu0 %1016 }
 0x2c8   : > { %6652 = vst [vmem:[#allocation19_spill] sm:$0xff] %v4984_v21 }
 0x2ca   : > { %1224 = vrot.lane.b32.xlu1 %v1184_v53, %s4452_s16 }
 0x2cb   : > { %1038 = vrot.lane.b32.xlu2 %v995_v33, %s4451_s30  ;;  %v1190_v33 = vmul.f32 %v4887_v12, %v4825_v11  ;;  %v1368_v12 = vmul.f32 %v4905_v0, %v4774_v10  ;;  %v1370_v0 = vmul.f32 %v4893_v6, %v4785_v16  ;;  %v1185_v6 = vmul.f32 %v4878_v23, %v4805_v31 }
 0x2cc   : > { %v4993_v61 = vpop.permute.xlu1 %1486  ;;  %v1188_v23 = vmul.f32 %v4897_v4, %v4814_v63 }
 0x2cd   : > { %v4975_v25 = vpop.permute.xlu2 %1480 }
 0x2cf   : > { %v4997_v17 = vpop.permute.xlu0 %1022 }
 0x2d0   : > { %6653 = vst [vmem:[#allocation20_spill] sm:$0xff] %v4997_v17 }
 0x2d2   : > { %1230 = vrot.lane.b32.xlu1 %v1187_v3, %s4452_s16  ;;  %v5000_v3 = vadd.s32 80, %v4589_v26 }
 0x2d3   : > { %1044 = vrot.lane.b32.xlu2 %v998_v52, %s4451_s30 }
 0x2d4   : > { %4310 = vset.pattern.permute.xlu0 %v5000_v3  ;;  %4312 = vset.pattern.permute.xlu2 %v5000_v3 }
 0x2d5   : > { %v1493_v29 = vpop.permute.xlu2 %1492 }
 0x2d6   : > { %v1564_v53 = vmul.f32 %v1493_v29, %v4850_v34 }
 0x2d8   : > { %1600 = vrot.lane.b32.xlu0 %v1564_v53, %s4454_s18 }
 0x2da   : > { %1236 = vrot.lane.b32.xlu1 %v1190_v33, %s4452_s16  ;;  %v5013_v33 = vpop.permute.xlu0 %1028 }
 0x2db   : > { %1208 = vrot.lane.b32.xlu2 %v1176_v8, %s4452_s16  ;;  %6654 = vst [vmem:[#allocation21_spill] sm:$0xff] %v5013_v33  ;;  %v1182_v8 = vmul.f32 %v4872_v9, %v4796_v22 }
 0x2dc   : > { %v5008_v52 = vpop.permute.xlu1 %1504 }
 0x2e2   : > { %1400 = vrot.lane.b32.xlu1 %v1368_v12, %s4453_s17  ;;  %v1570_v12 = vmul.f32 %v1529_v60, %v4864_v32 }
 0x2e3   : > { %1214 = vrot.lane.b32.xlu2 %v1179_v18, %s4452_s16  ;;  %v1373_v18 = vmul.f32 %v4913_v58, %v4850_v34  ;;  %v1376_v58 = vmul.f32 %v4925_v14, %v4805_v31  ;;  %v1379_v14 = vmul.f32 %v4935_v19, %v4864_v32  ;;  %v1369_v19 = vmul.f32 %v4895_v1, %v4774_v10 }
 0x2e4   : > { %v1517_v24 = vpop.permute.xlu1 %1516 }
 0x2e5   : > { %v1511_v29 = vpop.permute.xlu2 %1510 }
 0x2e6   : > { %v1567_v53 = vmul.f32 %v1511_v29, %v4796_v22  ;;  %v5028_v29 = vpop.permute.xlu0 %1034 }
 0x2e7   : > { %6655 = vst [vmem:[#allocation22_spill] sm:$0xff] %v5028_v29  ;;  %v1383_v29 = vmul.f32 %v4931_v62, %v4825_v11 }
 0x2e8   : > { %1606 = vrot.lane.b32.xlu0 %v1567_v53, %s4454_s18 }
 0x2ea   : > { %1404 = vrot.lane.b32.xlu1 %v1370_v0, %s4453_s17  ;;  %v5035_v0 = vadd.s32 88, %v4589_v26 }
 0x2eb   : > { %1220 = vrot.lane.b32.xlu2 %v1182_v8, %s4452_s16 }
 0x2ec   : > { %6656 = vst [vmem:[#allocation23_spill] sm:$0xff] %v5035_v0  ;;  %4311 = vset.pattern.permute.xlu1 %v5035_v0 }
 0x2ed   : > { %v5032_v53 = vpop.permute.xlu2 %1522 }
 0x2ee   : > { %v5043_v60 = vpop.permute.xlu0 %1040 }
 0x2ef   : > { %6657 = vst [vmem:[#allocation24_spill] sm:$0xff] %v5043_v60 }
 0x2f0   : > { %1612 = vrot.lane.b32.xlu0 %v1570_v12, %s4454_s18 }
 0x2f2   : > { %1410 = vrot.lane.b32.xlu1 %v1373_v18, %s4453_s17 }
 0x2f3   : > { %1226 = vrot.lane.b32.xlu2 %v1185_v6, %s4452_s16  ;;  %v1191_v6 = vmul.f32 %v4889_v13, %v4825_v11 }
 0x2f4   : > { %v1535_v9 = vpop.permute.xlu1 %1534 }
 0x2f6   : > { %v5055_v4 = vpop.permute.xlu0 %1046 }
 0x2f7   : > { %6658 = vst [vmem:[#allocation25_spill] sm:$0xff] %v5055_v4  ;;  %v1562_v4 = vmul.f32 %v4975_v25, %v4785_v16  ;;  %v1377_v25 = vmul.f32 %v4944_v35, %v4805_v31 }
 0x2fa   : > { %1416 = vrot.lane.b32.xlu1 %v1376_v58, %s4453_s17 }
 0x2fb   : > { %1232 = vrot.lane.b32.xlu2 %v1188_v23, %s4452_s16 }
 0x2fc   : > { %v1547_v8 = vpop.permute.xlu1 %1546 }
 0x2fd   : > { %v1573_v12 = vmul.f32 %v1547_v8, %v4814_v63  ;;  %v5047_v18 = vpop.permute.xlu2 %1540  ;;  %v1382_v8 = vmul.f32 %v4965_v20, %v4825_v11  ;;  %v1371_v20 = vmul.f32 %v4907_v54, %v4785_v16 }
 0x2fe   : > { %v5066_v13 = vpop.permute.xlu0 %1210 }
 0x2ff   : > { %1618 = vrot.lane.b32.xlu0 %v1573_v12, %s4454_s18  ;;  %6660 = vst [vmem:[#allocation27_spill] sm:$0xff] %v5066_v13 }
 0x302   : > { %1422 = vrot.lane.b32.xlu1 %v1379_v14, %s4453_s17 }
 0x303   : > { %1238 = vrot.lane.b32.xlu2 %v1191_v6, %s4452_s16  ;;  %v1560_v6 = vmul.f32 %v4941_v57, %v4774_v10  ;;  %v1374_v57 = vmul.f32 %v4915_v2, %v4796_v22 }
 0x304   : > { %v5058_v58 = vpop.permute.xlu1 %1018 }
 0x305   : > { %6659 = vst [vmem:[#allocation26_spill] sm:$0xff] %v5058_v58  ;;  %v1553_v23 = vpop.permute.xlu2 %1552 }
 0x306   : > { %v5079_v1 = vpop.permute.xlu0 %1216 }
 0x307   : > { %1660 = vperm.xlu0 %4310, %v4610_v36  }
 0x30a   : > { %1428 = vrot.lane.b32.xlu1 %v1382_v8, %s4453_s17 }
 0x30b   : > { %1402 = vrot.lane.b32.xlu2 %v1369_v19, %s4453_s17 }
 0x30c   : > { %v5069_v12 = vpop.permute.xlu1 %1024 }
 0x30d   : > { %v5071_v14 = vpop.permute.xlu2 %1020 }
 0x30e   : > { %6661 = vst [vmem:[#allocation28_spill] sm:$0xff] %v5071_v14 }
 0x30f   : > { %1720 = vperm.xlu0 %4310, %v4635_v42  }
 0x312   : > { %1592 = vrot.lane.b32.xlu1 %v1560_v6, %s4454_s18  ;;  %v5095_v6 = vpop.permute.xlu0 %1222 }
 0x313   : > { %1406 = vrot.lane.b32.xlu2 %v1371_v20, %s4453_s17 }
 0x314   : > { %v5082_v8 = vpop.permute.xlu1 %1030 }
 0x315   : > { %v5084_v19 = vpop.permute.xlu2 %1026 }
 0x316   : > { %6662 = vst [vmem:[#allocation29_spill] sm:$0xff] %v5084_v19  ;;  %v1565_v19 = vmul.f32 %v4953_v7, %v4850_v34  ;;  %v1380_v7 = vmul.f32 %v4956_v50, %v4814_v63 }
 0x317   : > { %4315 = vset.pattern.permute.xlu0 %v5035_v0 }
 0x31a   : > { %1596 = vrot.lane.b32.xlu1 %v1562_v4, %s4454_s18 }
 0x31b   : > { %1412 = vrot.lane.b32.xlu2 %v1374_v57, %s4453_s17  ;;  %v5110_v57 = vpop.permute.xlu0 %1228 }
 0x31c   : > { %v5093_v54 = vpop.permute.xlu1 %1036 }
 0x31d   : > { %v5097_v20 = vpop.permute.xlu2 %1032 }
 0x31e   : > { %6663 = vst [vmem:[#allocation30_spill] sm:$0xff] %v5097_v20  ;;  %v1568_v20 = vmul.f32 %v1517_v24, %v4805_v31 }
 0x31f   : > { %1690 = vperm.xlu0 %4315, %v4620_v39  }
 0x322   : > { %1602 = vrot.lane.b32.xlu1 %v1565_v19, %s4454_s18 }
 0x323   : > { %1418 = vrot.lane.b32.xlu2 %v1377_v25, %s4453_s17  ;;  %v5122_v25 = vpop.permute.xlu0 %1234 }
 0x324   : > { %v5106_v2 = vpop.permute.xlu1 %1042  ;;  %6668 = vst [vmem:[#allocation35_spill] sm:$0xff] %v5122_v25 }
 0x325   : > { %6664 = vst [vmem:[#allocation31_spill] sm:$0xff] %v5106_v2  ;;  %v5108_v4 = vpop.permute.xlu2 %1038 }
 0x326   : > { %6665 = vst [vmem:[#allocation32_spill] sm:$0xff] %v5108_v4  ;;  %v1571_v4 = vmul.f32 %v1535_v9, %v4864_v32 }
 0x327   : > { %1750 = vperm.xlu0 %4315, %v4654_v46  }
 0x32a   : > { %1608 = vrot.lane.b32.xlu1 %v1568_v20, %s4454_s18 }
 0x32b   : > { %1424 = vrot.lane.b32.xlu2 %v1380_v7, %s4453_s17  ;;  %v5133_v20 = vpop.permute.xlu0 %1408  ;;  %v1574_v7 = vmul.f32 %v1553_v23, %v4825_v11 }
 0x32c   : > { %v5118_v35 = vpop.permute.xlu1 %1212 }
 0x32d   : > { %6666 = vst [vmem:[#allocation33_spill] sm:$0xff] %v5118_v35  ;;  %v5120_v19 = vpop.permute.xlu2 %1044 }
 0x32e   : > { %6667 = vst [vmem:[#allocation34_spill] sm:$0xff] %v5120_v19  ;;  %v1561_v19 = vmul.f32 %v4979_v15, %v4774_v10 }
 0x332   : > { %1614 = vrot.lane.b32.xlu1 %v1571_v4, %s4454_s18  ;;  %v1563_v4 = vmul.f32 %v4993_v61, %v4785_v16 }
 0x333   : > { %1430 = vrot.lane.b32.xlu2 %v1383_v29, %s4453_s17  ;;  %v5144_v29 = vpop.permute.xlu0 %1414 }
 0x334   : > { %v5129_v50 = vpop.permute.xlu1 %1218 }
 0x335   : > { %6669 = vst [vmem:[#allocation36_spill] sm:$0xff] %v5129_v50  ;;  %v5131_v24 = vpop.permute.xlu2 %1208 }
 0x336   : > { %6670 = vst [vmem:[#allocation37_spill] sm:$0xff] %v5131_v24 }
 0x33a   : > { %1620 = vrot.lane.b32.xlu1 %v1574_v7, %s4454_s18 }
 0x33b   : > { %1594 = vrot.lane.b32.xlu2 %v1561_v19, %s4454_s18  ;;  %v1566_v19 = vmul.f32 %v5008_v52, %v4796_v22  ;;  %v5156_v7 = vpop.permute.xlu0 %1420 }
 0x33c   : > { %v5140_v62 = vpop.permute.xlu1 %1224 }
 0x33d   : > { %6671 = vst [vmem:[#allocation38_spill] sm:$0xff] %v5140_v62  ;;  %v5142_v9 = vpop.permute.xlu2 %1214 }
 0x33e   : > { %6672 = vst [vmem:[#allocation39_spill] sm:$0xff] %v5142_v9 }
 0x342   : > { %1666 = vperm.xlu1 %4311, %v4610_v36  }
 0x343   : > { %1598 = vrot.lane.b32.xlu2 %v1563_v4, %s4454_s18  ;;  %v1569_v4 = vmul.f32 %v5032_v53, %v4805_v31  ;;  %v5166_v50 = vpop.permute.xlu0 %1426 }
 0x344   : > { %v5150_v23 = vpop.permute.xlu1 %1230  ;;  %6677 = vst [vmem:[#allocation44_spill] sm:$0xff] %v5166_v50 }
 0x345   : > { %6673 = vst [vmem:[#allocation40_spill] sm:$0xff] %v5150_v23  ;;  %v5152_v15 = vpop.permute.xlu2 %1220 }
 0x346   : > { %6674 = vst [vmem:[#allocation41_spill] sm:$0xff] %v5152_v15 }
 0x34a   : > { %1678 = vperm.xlu1 %4311, %v4612_v37  }
 0x34b   : > { %1604 = vrot.lane.b32.xlu2 %v1566_v19, %s4454_s18  ;;  %v1572_v19 = vmul.f32 %v5047_v18, %v4814_v63  ;;  %v5176_v60 = vpop.permute.xlu0 %1600 }
 0x34c   : > { %v5160_v62 = vpop.permute.xlu1 %1236 }
 0x34d   : > { %6675 = vst [vmem:[#allocation42_spill] sm:$0xff] %v5160_v62  ;;  %v5162_v61 = vpop.permute.xlu2 %1226 }
 0x34e   : > { %6676 = vst [vmem:[#allocation43_spill] sm:$0xff] %v5162_v61 }
 0x352   : > { %4313 = vset.pattern.permute.xlu1 %v5000_v3 }
 0x353   : > { %1610 = vrot.lane.b32.xlu2 %v1569_v4, %s4454_s18  ;;  %v1575_v4 = vmul.f32 %v4971_v5, %v4825_v11 }
 0x354   : > { %v5170_v52 = vpop.permute.xlu1 %1400 }
 0x355   : > { %6678 = vst [vmem:[#allocation45_spill] sm:$0xff] %v5170_v52  ;;  %v5172_v23 = vpop.permute.xlu2 %1232 }
 0x356   : > { %6679 = vst [vmem:[#allocation46_spill] sm:$0xff] %v5172_v23 }
 0x35a   : > { %1696 = vperm.xlu1 %4313, %v4625_v40   ;;  %v5186_v61 = vpop.permute.xlu0 %1606 }
 0x35b   : > { %1616 = vrot.lane.b32.xlu2 %v1572_v19, %s4454_s18 }
 0x35c   : > { %v5180_v53 = vpop.permute.xlu1 %1404 }
 0x35d   : > { %6680 = vst [vmem:[#allocation47_spill] sm:$0xff] %v5180_v53  ;;  %v5182_v62 = vpop.permute.xlu2 %1238 }
 0x35e   : > { %6681 = vst [vmem:[#allocation48_spill] sm:$0xff] %v5182_v62 }
 0x362   : > { %1708 = vperm.xlu1 %4313, %v4630_v41   ;;  %v5195_v19 = vpop.permute.xlu0 %1612 }
 0x363   : > { %1622 = vrot.lane.b32.xlu2 %v1575_v4, %s4454_s18 }
 0x364   : > { %v5190_v18 = vpop.permute.xlu1 %1410 }
 0x365   : > { %6682 = vst [vmem:[#allocation49_spill] sm:$0xff] %v5190_v18  ;;  %v5192_v23 = vpop.permute.xlu2 %1402 }
 0x366   : > { %6683 = vst [vmem:[#allocation50_spill] sm:$0xff] %v5192_v23 }
 0x36a   : > { %4316 = vset.pattern.permute.xlu1 %v5035_v0 }
 0x36b   : > { %1672 = vperm.xlu2 %4312, %v4612_v37  }
 0x36c   : > { %v5198_v62 = vpop.permute.xlu1 %1416 }
 0x36d   : > { %6684 = vst [vmem:[#allocation51_spill] sm:$0xff] %v5198_v62  ;;  %v5200_v53 = vpop.permute.xlu2 %1406 }
 0x36e   : > { %6685 = vst [vmem:[#allocation52_spill] sm:$0xff] %v5200_v53 }
 0x371   : > { %v5203_v5 = vpop.permute.xlu0 %1618 }
 0x372   : > { %1726 = vperm.xlu1 %4316, %v4635_v42   ;;  %6686 = vst [vmem:[#allocation53_spill] sm:$0xff] %v5203_v5 }
 0x373   : > { %1684 = vperm.xlu2 %4312, %v4620_v39  }
 0x374   : > { %v5206_v4 = vpop.permute.xlu1 %1422 }
 0x375   : > { %6687 = vst [vmem:[#allocation54_spill] sm:$0xff] %v5206_v4  ;;  %v5208_v18 = vpop.permute.xlu2 %1412 }
 0x376   : > { %6688 = vst [vmem:[#allocation55_spill] sm:$0xff] %v5208_v18 }
 0x379   : > { %v1661_v15 = vpop.permute.xlu0 %1660 }
 0x37a   : > { %1738 = vperm.xlu1 %4316, %v4646_v44   ;;  %v1752_v35 = vmul.f32 %v1661_v15, %v4774_v10 }
 0x37b   : > { %4314 = vset.pattern.permute.xlu2 %v5035_v0 }
 0x37c   : > { %v5212_v52 = vpop.permute.xlu1 %1428 }
 0x37d   : > { %6689 = vst [vmem:[#allocation56_spill] sm:$0xff] %v5212_v52  ;;  %v5214_v62 = vpop.permute.xlu2 %1418 }
 0x37e   : > { %6690 = vst [vmem:[#allocation57_spill] sm:$0xff] %v5214_v62 }
 0x382   : > { %1784 = vrot.lane.b32.xlu1 %v1752_v35, %s4455_s19 }
 0x383   : > { %1702 = vperm.xlu2 %4314, %v4625_v40  }
 0x384   : > { %v5219_v24 = vpop.permute.xlu1 %1592 }
 0x385   : > { %6691 = vst [vmem:[#allocation58_spill] sm:$0xff] %v5219_v24  ;;  %v5221_v4 = vpop.permute.xlu2 %1424 }
 0x386   : > { %6692 = vst [vmem:[#allocation59_spill] sm:$0xff] %v5221_v4 }
 0x38b   : > { %1714 = vperm.xlu2 %4314, %v4630_v41  }
 0x38c   : > { %v5224_v18 = vpop.permute.xlu1 %1596 }
 0x38d   : > { %6693 = vst [vmem:[#allocation60_spill] sm:$0xff] %v5224_v18  ;;  %v5226_v33 = vpop.permute.xlu2 %1430 }
 0x38e   : > { %6694 = vst [vmem:[#allocation61_spill] sm:$0xff] %v5226_v33 }
 0x393   : > { %4317 = vset.pattern.permute.xlu2 %v5000_v3 }
 0x394   : > { %v5229_v52 = vpop.permute.xlu1 %1602 }
 0x395   : > { %6695 = vst [vmem:[#allocation62_spill] sm:$0xff] %v5229_v52  ;;  %v5231_v15 = vpop.permute.xlu2 %1594 }
 0x396   : > { %6696 = vst [vmem:[#allocation63_spill] sm:$0xff] %v5231_v15 }
 0x39b   : > { %1732 = vperm.xlu2 %4317, %v4646_v44  }
 0x39c   : > { %v5234_v35 = vpop.permute.xlu1 %1608 }
 0x39d   : > { %6697 = vst [vmem:[#allocation64_spill] sm:$0xff] %v5234_v35  ;;  %v5236_v62 = vpop.permute.xlu2 %1598 }
 0x39e   : > { %6698 = vst [vmem:[#allocation65_spill] sm:$0xff] %v5236_v62 }
 0x3a3   : > { %1744 = vperm.xlu2 %4317, %v4654_v46  }
 0x3a4   : > { %v5239_v4 = vpop.permute.xlu1 %1614 }
 0x3a5   : > { %6699 = vst [vmem:[#allocation66_spill] sm:$0xff] %v5239_v4  ;;  %v5241_v24 = vpop.permute.xlu2 %1604  ;;  %v1721_v4 = vpop.permute.xlu0 %1720 }
 0x3a6   : > { %6700 = vst [vmem:[#allocation67_spill] sm:$0xff] %v5241_v24 }
 0x3ac   : > { %v5243_v18 = vpop.permute.xlu1 %1620 }
 0x3ad   : > { %6701 = vst [vmem:[#allocation68_spill] sm:$0xff] %v5243_v18  ;;  %v5245_v33 = vpop.permute.xlu2 %1610 }
 0x3ae   : > { %6702 = vst [vmem:[#allocation69_spill] sm:$0xff] %v5245_v33  ;;  %v1691_v33 = vpop.permute.xlu0 %1690 }
 0x3b4   : > { %v1667_v21 = vpop.permute.xlu1 %1666 }
 0x3b5   : > { %v1753_v52 = vmul.f32 %v1667_v21, %v4774_v10  ;;  %v5248_v14 = vpop.permute.xlu2 %1616 }
 0x3b6   : > { %6703 = vst [vmem:[#allocation70_spill] sm:$0xff] %v5248_v14 }
 0x3b7   : > { %1786 = vrot.lane.b32.xlu2 %v1753_v52, %s4455_s19  ;;  %v5259_v52 = vadd.s32 96, %v4589_v26 }
 0x3b9   : > { %6705 = vst [vmem:[#allocation72_spill] sm:$0xff] %v5259_v52  ;;  %4318 = vset.pattern.permute.xlu0 %v5259_v52  ;;  %4320 = vset.pattern.permute.xlu2 %v5259_v52 }
 0x3bc   : > { %v1679_v35 = vpop.permute.xlu1 %1678 }
 0x3bd   : > { %v1755_v62 = vmul.f32 %v1679_v35, %v4785_v16  ;;  %v5252_v53 = vpop.permute.xlu2 %1622  ;;  %v1757_v35 = vmul.f32 %v1691_v33, %v4850_v34 }
 0x3be   : > { %6704 = vst [vmem:[#allocation71_spill] sm:$0xff] %v5252_v53 }
 0x3bf   : > { %1790 = vrot.lane.b32.xlu2 %v1755_v62, %s4455_s19 }
 0x3c5   : > { %v1673_v24 = vpop.permute.xlu2 %1672 }
 0x3c6   : > { %v1754_v18 = vmul.f32 %v1673_v24, %v4785_v16 }
 0x3c8   : > { %1788 = vrot.lane.b32.xlu1 %v1754_v18, %s4455_s19 }
 0x3cc   : > { %v1697_v9 = vpop.permute.xlu1 %1696 }
 0x3cd   : > { %v1758_v21 = vmul.f32 %v1697_v9, %v4796_v22  ;;  %v1685_v14 = vpop.permute.xlu2 %1684 }
 0x3ce   : > { %v1756_v53 = vmul.f32 %v1685_v14, %v4850_v34  ;;  %v5272_v14 = vadd.s32 104, %v4589_v26 }
 0x3cf   : > { %1796 = vrot.lane.b32.xlu2 %v1758_v21, %s4455_s19 }
 0x3d0   : > { %1794 = vrot.lane.b32.xlu1 %v1757_v35, %s4455_s19  ;;  %1792 = vrot.lane.b32.xlu0 %v1756_v53, %s4455_s19  ;;  %6706 = vst [vmem:[#allocation73_spill] sm:$0xff] %v5272_v14  ;;  %v1762_v35 = vmul.f32 %v1721_v4, %v4864_v32  ;;  %v1751_v4 = vpop.permute.xlu0 %1750 }
 0x3d1   : > { %4319 = vset.pattern.permute.xlu1 %v5272_v14 }
 0x3d4   : > { %v1709_v24 = vpop.permute.xlu1 %1708 }
 0x3d5   : > { %v1760_v62 = vmul.f32 %v1709_v24, %v4805_v31 }
 0x3d8   : > { %1800 = vrot.lane.b32.xlu1 %v1760_v62, %s4455_s19 }
 0x3dd   : > { %v1703_v9 = vpop.permute.xlu2 %1702 }
 0x3de   : > { %v1759_v33 = vmul.f32 %v1703_v9, %v4796_v22 }
 0x3e0   : > { %1798 = vrot.lane.b32.xlu0 %v1759_v33, %s4455_s19 }
 0x3e4   : > { %v1727_v18 = vpop.permute.xlu1 %1726 }
 0x3e5   : > { %v1763_v53 = vmul.f32 %v1727_v18, %v4864_v32  ;;  %v1715_v21 = vpop.permute.xlu2 %1714 }
 0x3e6   : > { %v1761_v24 = vmul.f32 %v1715_v21, %v4805_v31 }
 0x3e7   : > { %1806 = vrot.lane.b32.xlu1 %v1763_v53, %s4455_s19  ;;  %v1767_v53 = vmul.f32 %v1751_v4, %v4825_v11 }
 0x3e8   : > { %1804 = vrot.lane.b32.xlu0 %v1762_v35, %s4455_s19  ;;  %1802 = vrot.lane.b32.xlu2 %v1761_v24, %s4455_s19 }
 0x3ec   : > { %v1739_v62 = vpop.permute.xlu1 %1738 }
 0x3ed   : > { %v1765_v9 = vmul.f32 %v1739_v62, %v4814_v63 }
 0x3f0   : > { %1810 = vrot.lane.b32.xlu0 %v1765_v9, %s4455_s19 }
 0x3f4   : > { %v5317_v62 = vpop.permute.xlu1 %1784 }
 0x3f5   : > { %v1733_v33 = vpop.permute.xlu2 %1732  ;;  %6710 = vst [vmem:[#allocation77_spill] sm:$0xff] %v5317_v62 }
 0x3f6   : > { %v1764_v17 = vmul.f32 %v1733_v33, %v4814_v63 }
 0x3f8   : > { %1852 = vperm.xlu0 %4318, %v4610_v36   ;;  %1808 = vrot.lane.b32.xlu2 %v1764_v17, %s4455_s19 }
 0x3fd   : > { %v1745_v18 = vpop.permute.xlu2 %1744 }
 0x3fe   : > { %v1766_v21 = vmul.f32 %v1745_v18, %v4825_v11 }
 0x400   : > { %1912 = vperm.xlu0 %4318, %v4635_v42   ;;  %1814 = vrot.lane.b32.xlu2 %v1767_v53, %s4455_s19 }
 0x401   : > { %1812 = vrot.lane.b32.xlu1 %v1766_v21, %s4455_s19 }
 0x408   : > { %4323 = vset.pattern.permute.xlu0 %v5272_v14  ;;  %1864 = vperm.xlu2 %4320, %v4612_v37  }
 0x409   : > { %1858 = vperm.xlu1 %4319, %v4610_v36  }
 0x410   : > { %1882 = vperm.xlu0 %4323, %v4620_v39   ;;  %1876 = vperm.xlu2 %4320, %v4620_v39  }
 0x411   : > { %1870 = vperm.xlu1 %4319, %v4612_v37   ;;  %v5305_v17 = vpop.permute.xlu2 %1786 }
 0x412   : > { %6707 = vst [vmem:[#allocation74_spill] sm:$0xff] %v5305_v17 }
 0x418   : > { %1942 = vperm.xlu0 %4323, %v4654_v46   ;;  %4322 = vset.pattern.permute.xlu2 %v5272_v14 }
 0x419   : > { %4321 = vset.pattern.permute.xlu1 %v5259_v52  ;;  %v5311_v35 = vpop.permute.xlu2 %1790 }
 0x41a   : > { %6708 = vst [vmem:[#allocation75_spill] sm:$0xff] %v5311_v35 }
 0x420   : > { %1894 = vperm.xlu2 %4322, %v4625_v40  }
 0x421   : > { %1888 = vperm.xlu1 %4321, %v4625_v40  }
 0x428   : > { %1906 = vperm.xlu2 %4322, %v4630_v41  }
 0x429   : > { %1900 = vperm.xlu1 %4321, %v4630_v41   ;;  %v5315_v24 = vpop.permute.xlu2 %1796 }
 0x42a   : > { %6709 = vst [vmem:[#allocation76_spill] sm:$0xff] %v5315_v24 }
 0x430   : > { %4325 = vset.pattern.permute.xlu2 %v5259_v52 }
 0x431   : > { %4324 = vset.pattern.permute.xlu1 %v5272_v14 }
 0x438   : > { %1924 = vperm.xlu2 %4325, %v4646_v44  }
 0x439   : > { %1918 = vperm.xlu1 %4324, %v4635_v42  }
 0x43a   : > { %v5323_v4 = vpop.permute.xlu1 %1788 }
 0x43b   : > { %6712 = vst [vmem:[#allocation79_spill] sm:$0xff] %v5323_v4 }
 0x440   : > { %1936 = vperm.xlu2 %4325, %v4654_v46  }
 0x441   : > { %1930 = vperm.xlu1 %4324, %v4646_v44  }
 0x442   : > { %v5319_v9 = vpop.permute.xlu0 %1792  ;;  %v5321_v33 = vpop.permute.xlu2 %1802 }
 0x443   : > { %6711 = vst [vmem:[#allocation78_spill] sm:$0xff] %v5321_v33  ;;  %v5329_v21 = vpop.permute.xlu1 %1794 }
 0x444   : > { %6714 = vst [vmem:[#allocation81_spill] sm:$0xff] %v5329_v21 }
 0x44b   : > { %v5337_v62 = vpop.permute.xlu1 %1800 }
 0x44c   : > { %6717 = vst [vmem:[#allocation84_spill] sm:$0xff] %v5337_v62 }
 0x452   : > { %v5325_v18 = vpop.permute.xlu0 %1798  ;;  %v5327_v53 = vpop.permute.xlu2 %1808 }
 0x453   : > { %6713 = vst [vmem:[#allocation80_spill] sm:$0xff] %v5327_v53 }
 0x459   : > { %v5339_v33 = vpop.permute.xlu1 %1806 }
 0x45a   : > { %v5331_v35 = vpop.permute.xlu0 %1804  ;;  %v5333_v14 = vpop.permute.xlu2 %1814  ;;  %6718 = vst [vmem:[#allocation85_spill] sm:$0xff] %v5339_v33 }
 0x45b   : > { %6715 = vst [vmem:[#allocation82_spill] sm:$0xff] %v5333_v14 }
 0x462   : > { %v5335_v52 = vpop.permute.xlu0 %1810  ;;  %v1865_v24 = vpop.permute.xlu2 %1864 }
 0x463   : > { %6716 = vst [vmem:[#allocation83_spill] sm:$0xff] %v5335_v52  ;;  %v1946_v14 = vmul.f32 %v1865_v24, %v4785_v16 }
 0x46a   : > { %v1853_v17 = vpop.permute.xlu0 %1852  ;;  %v1877_v15 = vpop.permute.xlu2 %1876 }
 0x46b   : > { %v1944_v4 = vmul.f32 %v1853_v17, %v4774_v10  ;;  %v1948_v23 = vmul.f32 %v1877_v15, %v4850_v34 }
 0x46d   : > { %1976 = vrot.lane.b32.xlu1 %v1944_v4, %s4456_s21  ;;  %1984 = vrot.lane.b32.xlu0 %v1948_v23, %s4456_s21 }
 0x472   : > { %v1913_v62 = vpop.permute.xlu0 %1912 }
 0x473   : > { %v5346_v21 = vpop.permute.xlu1 %1812  ;;  %v1954_v23 = vmul.f32 %v1913_v62, %v4864_v32 }
 0x474   : > { %6719 = vst [vmem:[#allocation86_spill] sm:$0xff] %v5346_v21 }
 0x475   : > { %1980 = vrot.lane.b32.xlu1 %v1946_v14, %s4456_s21 }
 0x47a   : > { %v1895_v53 = vpop.permute.xlu2 %1894 }
 0x47b   : > { %v1859_v13 = vpop.permute.xlu1 %1858  ;;  %v1951_v33 = vmul.f32 %v1895_v53, %v4796_v22 }
 0x47c   : > { %v1945_v17 = vmul.f32 %v1859_v13, %v4774_v10  ;;  %v5360_v13 = vadd.s32 112, %v4589_v26 }
 0x47d   : > { %1990 = vrot.lane.b32.xlu0 %v1951_v33, %s4456_s21  ;;  %v5366_v33 = vadd.s32 120, %v4589_v26 }
 0x47e   : > { %1978 = vrot.lane.b32.xlu2 %v1945_v17, %s4456_s21  ;;  %6720 = vst [vmem:[#allocation87_spill] sm:$0xff] %v5360_v13  ;;  %4326 = vset.pattern.permute.xlu0 %v5360_v13 }
 0x47f   : > { %4328 = vset.pattern.permute.xlu2 %v5360_v13  ;;  %6721 = vst [vmem:[#allocation88_spill] sm:$0xff] %v5366_v33  ;;  %4327 = vset.pattern.permute.xlu1 %v5366_v33 }
 0x482   : > { %v1883_v15 = vpop.permute.xlu0 %1882  ;;  %v1907_v53 = vpop.permute.xlu2 %1906 }
 0x483   : > { %v1949_v24 = vmul.f32 %v1883_v15, %v4850_v34  ;;  %v1871_v4 = vpop.permute.xlu1 %1870 }
 0x484   : > { %v1947_v21 = vmul.f32 %v1871_v4, %v4785_v16 }
 0x485   : > { %1986 = vrot.lane.b32.xlu1 %v1949_v24, %s4456_s21  ;;  %1996 = vrot.lane.b32.xlu0 %v1954_v23, %s4456_s21 }
 0x486   : > { %1982 = vrot.lane.b32.xlu2 %v1947_v21, %s4456_s21  ;;  %v1953_v21 = vmul.f32 %v1907_v53, %v4805_v31 }
 0x48a   : > { %v1943_v4 = vpop.permute.xlu0 %1942 }
 0x492   : > { %v1925_v23 = vpop.permute.xlu2 %1924 }
 0x493   : > { %v1889_v14 = vpop.permute.xlu1 %1888  ;;  %v1956_v24 = vmul.f32 %v1925_v23, %v4814_v63 }
 0x494   : > { %v1950_v62 = vmul.f32 %v1889_v14, %v4796_v22 }
 0x496   : > { %1988 = vrot.lane.b32.xlu2 %v1950_v62, %s4456_s21  ;;  %v1959_v62 = vmul.f32 %v1943_v4, %v4825_v11 }
 0x49a   : > { %v1937_v53 = vpop.permute.xlu2 %1936 }
 0x49b   : > { %v1901_v17 = vpop.permute.xlu1 %1900 }
 0x49c   : > { %v1952_v15 = vmul.f32 %v1901_v17, %v4805_v31 }
 0x49e   : > { %1992 = vrot.lane.b32.xlu1 %v1952_v15, %s4456_s21  ;;  %1994 = vrot.lane.b32.xlu2 %v1953_v21, %s4456_s21  ;;  %v1958_v21 = vmul.f32 %v1937_v53, %v4825_v11 }
 0x4a6   : > { %2000 = vrot.lane.b32.xlu2 %v1956_v24, %s4456_s21 }
 0x4ab   : > { %v1919_v14 = vpop.permute.xlu1 %1918 }
 0x4ac   : > { %v1955_v58 = vmul.f32 %v1919_v14, %v4864_v32 }
 0x4ae   : > { %1998 = vrot.lane.b32.xlu1 %v1955_v58, %s4456_s21  ;;  %2006 = vrot.lane.b32.xlu2 %v1959_v62, %s4456_s21 }
 0x4b3   : > { %v1931_v17 = vpop.permute.xlu1 %1930 }
 0x4b4   : > { %v1957_v15 = vmul.f32 %v1931_v17, %v4814_v63 }
 0x4b6   : > { %2002 = vrot.lane.b32.xlu0 %v1957_v15, %s4456_s21  ;;  %2056 = vperm.xlu2 %4328, %v4612_v37  }
 0x4b7   : > { %2004 = vrot.lane.b32.xlu1 %v1958_v21, %s4456_s21 }
 0x4be   : > { %2044 = vperm.xlu0 %4326, %v4610_v36   ;;  %2068 = vperm.xlu2 %4328, %v4620_v39  }
 0x4bf   : > { %2050 = vperm.xlu1 %4327, %v4610_v36  }
 0x4c6   : > { %2104 = vperm.xlu0 %4326, %v4635_v42   ;;  %4330 = vset.pattern.permute.xlu2 %v5366_v33 }
 0x4c7   : > { %2062 = vperm.xlu1 %4327, %v4612_v37  }
 0x4ce   : > { %4331 = vset.pattern.permute.xlu0 %v5366_v33  ;;  %2086 = vperm.xlu2 %4330, %v4625_v40  }
 0x4cf   : > { %4329 = vset.pattern.permute.xlu1 %v5360_v13 }
 0x4d6   : > { %2074 = vperm.xlu0 %4331, %v4620_v39   ;;  %2098 = vperm.xlu2 %4330, %v4630_v41  }
 0x4d7   : > { %2080 = vperm.xlu1 %4329, %v4625_v40  }
 0x4d8   : > { %v5397_v58 = vpop.permute.xlu2 %1978 }
 0x4d9   : > { %6722 = vst [vmem:[#allocation89_spill] sm:$0xff] %v5397_v58  ;;  %v5596_v58 = vld [vmem:[%s4750_s28] sm:$0x3] }
 0x4da   : > { %6756 = vst [vmem:[#allocation123_spill] sm:$0xff] %v5596_v58 }
 0x4de   : > { %2134 = vperm.xlu0 %4331, %v4654_v46   ;;  %4333 = vset.pattern.permute.xlu2 %v5360_v13 }
 0x4df   : > { %2092 = vperm.xlu1 %4329, %v4630_v41   ;;  %v5417_v23 = vpop.permute.xlu1 %1976 }
 0x4e0   : > { %v5405_v36 = vpop.permute.xlu2 %1982  ;;  %6726 = vst [vmem:[#allocation93_spill] sm:$0xff] %v5417_v23 }
 0x4e1   : > { %6723 = vst [vmem:[#allocation90_spill] sm:$0xff] %v5405_v36 }
 0x4e6   : > { %4334 = vset.pattern.permute.xlu0 %v4589_v26  ;;  %2116 = vperm.xlu2 %4333, %v4646_v44  }
 0x4e7   : > { %4332 = vset.pattern.permute.xlu1 %v5366_v33 }
 0x4ee   : > { %762 = vperm.xlu0 %4334, %v4612_v37   ;;  %2128 = vperm.xlu2 %4333, %v4654_v46   ;;  %v5422_v37 = vpop.permute.xlu1 %1980 }
 0x4ef   : > { %2110 = vperm.xlu1 %4332, %v4635_v42   ;;  %6728 = vst [vmem:[#allocation95_spill] sm:$0xff] %v5422_v37  ;;  %v5426_v42 = vpop.permute.xlu0 %1984 }
 0x4f0   : > { %v5410_v39 = vpop.permute.xlu2 %1988 }
 0x4f1   : > { %6724 = vst [vmem:[#allocation91_spill] sm:$0xff] %v5410_v39  ;;  %v4440_v39 = vld [vmem:[%s4604_s25] sm:$0x3] }
 0x4f2   : > { %v620_v23 = vperm.slane %v4440_v39, 1 }
 0x4f6   : > { %827 = vperm.xlu0 %4334, %v4646_v44   ;;  %4336 = vset.pattern.permute.xlu2 %v4589_v26 }
 0x4f7   : > { %2122 = vperm.xlu1 %4332, %v4646_v44   ;;  %v5428_v4 = vpop.permute.xlu1 %1986  ;;  %v5430_v62 = vpop.permute.xlu0 %1990 }
 0x4f8   : > { %v5415_v41 = vpop.permute.xlu2 %1994  ;;  %6730 = vst [vmem:[#allocation97_spill] sm:$0xff] %v5428_v4 }
 0x4f9   : > { %6725 = vst [vmem:[#allocation92_spill] sm:$0xff] %v5415_v41 }
 0x4ff   : > { %4335 = vset.pattern.permute.xlu1 %v4593_v27  ;;  %v5436_v15 = vpop.permute.xlu0 %1996 }
 0x500   : > { %v5420_v24 = vpop.permute.xlu2 %2000 }
 0x501   : > { %6727 = vst [vmem:[#allocation94_spill] sm:$0xff] %v5420_v24 }
 0x508   : > { %v5424_v46 = vpop.permute.xlu2 %2006 }
 0x509   : > { %6729 = vst [vmem:[#allocation96_spill] sm:$0xff] %v5424_v46 }
 0x510   : > { %v2057_v14 = vpop.permute.xlu2 %2056  ;;  %v5432_v44 = vpop.permute.xlu1 %1992 }
 0x511   : > { %6731 = vst [vmem:[#allocation98_spill] sm:$0xff] %v5432_v44 }
 0x518   : > { %v2069_v53 = vpop.permute.xlu2 %2068 }
 0x519   : > { %v2140_v17 = vmul.f32 %v2069_v53, %v4850_v34 }
 0x51b   : > { %2176 = vrot.lane.b32.xlu0 %v2140_v17, %s4457_s22 }
 0x520   : > { %v5438_v21 = vpop.permute.xlu1 %1998 }
 0x521   : > { %6732 = vst [vmem:[#allocation99_spill] sm:$0xff] %v5438_v21  ;;  %v2138_v21 = vmul.f32 %v2057_v14, %v4785_v16 }
 0x528   : > { %v5440_v33 = vpop.permute.xlu0 %2002  ;;  %v2087_v46 = vpop.permute.xlu2 %2086 }
 0x529   : > { %6733 = vst [vmem:[#allocation100_spill] sm:$0xff] %v5440_v33  ;;  %v5442_v24 = vpop.permute.xlu1 %2004  ;;  %v2143_v4 = vmul.f32 %v2087_v46, %v4796_v22 }
 0x52a   : > { %6734 = vst [vmem:[#allocation101_spill] sm:$0xff] %v5442_v24 }
 0x52b   : > { %2182 = vrot.lane.b32.xlu0 %v2143_v4, %s4457_s22 }
 0x530   : > { %v2045_v44 = vpop.permute.xlu0 %2044  ;;  %v2099_v14 = vpop.permute.xlu2 %2098 }
 0x531   : > { %v2136_v41 = vmul.f32 %v2045_v44, %v4774_v10  ;;  %v2051_v53 = vpop.permute.xlu1 %2050 }
 0x532   : > { %v2137_v37 = vmul.f32 %v2051_v53, %v4774_v10  ;;  %v6628_v10 = vperm.slane %v5596_v58, 1 }
 0x533   : > { %2168 = vrot.lane.b32.xlu1 %v2136_v41, %s4457_s22 }
 0x534   : > { %2170 = vrot.lane.b32.xlu2 %v2137_v37, %s4457_s22 }
 0x538   : > { %v2105_v17 = vpop.permute.xlu0 %2104 }
 0x539   : > { %v2146_v13 = vmul.f32 %v2105_v17, %v4864_v32  ;;  %v2063_v24 = vpop.permute.xlu1 %2062 }
 0x53a   : > { %v2139_v46 = vmul.f32 %v2063_v24, %v4785_v16  ;;  %v2145_v24 = vmul.f32 %v2099_v14, %v4805_v31 }
 0x53b   : > { %2172 = vrot.lane.b32.xlu1 %v2138_v21, %s4457_s22  ;;  %2188 = vrot.lane.b32.xlu0 %v2146_v13, %s4457_s22 }
 0x53c   : > { %2174 = vrot.lane.b32.xlu2 %v2139_v46, %s4457_s22  ;;  %v613_v46 = vpop.f32.mrf.mxu3 }
 0x540   : > { %v2117_v13 = vpop.permute.xlu2 %2116 }
 0x541   : > { %v2148_v17 = vmul.f32 %v2117_v13, %v4814_v63 }
 0x548   : > { %v2075_v4 = vpop.permute.xlu0 %2074 }
 0x549   : > { %v2141_v44 = vmul.f32 %v2075_v4, %v4850_v34  ;;  %v2081_v41 = vpop.permute.xlu1 %2080  ;;  %v614_v4 = vadd.f32 %v613_v46, %v4607_v30 }
 0x54a   : > { %v2142_v37 = vmul.f32 %v2081_v41, %v4796_v22 }
 0x54b   : > { %2178 = vrot.lane.b32.xlu1 %v2141_v44, %s4457_s22 }
 0x54c   : > { %2180 = vrot.lane.b32.xlu2 %v2142_v37, %s4457_s22  ;;  %v617_v37 = vmax.f32 %v614_v4, 0.0 }
 0x550   : > { %v2135_v44 = vpop.permute.xlu0 %2134 }
 0x551   : > { %v2093_v53 = vpop.permute.xlu1 %2092  ;;  %v2151_v14 = vmul.f32 %v2135_v44, %v4825_v11 }
 0x552   : > { %v2144_v21 = vmul.f32 %v2093_v53, %v4805_v31 }
 0x554   : > { %2184 = vrot.lane.b32.xlu1 %v2144_v21, %s4457_s22  ;;  %2186 = vrot.lane.b32.xlu2 %v2145_v24, %s4457_s22  ;;  %v624_v24 = vmul.f32 %v620_v23, %v617_v37  ;;  %v2129_v21 = vpop.permute.xlu2 %2128 }
 0x556   : > { %v5472_v31 = vperm.slane %v624_v24, 1  ;;  %v5479_v39 = vperm.slane %v624_v24, 0  ;;  %v5481_v46 = vperm.slane %v624_v24, 2  ;;  %v5486_v23 = vperm.slane %v624_v24, 5 }
 0x557   : > { %v5491_v4 = vperm.slane %v624_v24, 3  ;;  %v5496_v44 = vperm.slane %v624_v24, 4  ;;  %v5506_v37 = vperm.slane %v624_v24, 7 }
 0x55c   : > { %2192 = vrot.lane.b32.xlu2 %v2148_v17, %s4457_s22  ;;  %v2150_v17 = vmul.f32 %v2129_v21, %v4825_v11 }
 0x561   : > { %v2111_v41 = vpop.permute.xlu1 %2110 }
 0x562   : > { %v2147_v53 = vmul.f32 %v2111_v41, %v4864_v32  ;;  %v5504_v41 = vperm.slane %v624_v24, 6  ;;  %v5533_v24 = vpop.permute.xlu0 %762 }
 0x563   : > { %6740 = vst [vmem:[#allocation107_spill] sm:$0xff] %v5533_v24  ;;  %v732_v24 = vpop.f32.mrf.mxu3 }
 0x564   : > { %2190 = vrot.lane.b32.xlu1 %v2147_v53, %s4457_s22  ;;  %2198 = vrot.lane.b32.xlu2 %v2151_v14, %s4457_s22  ;;  %v733_v16 = vadd.f32 %v732_v24, %v4697_v49 }
 0x569   : > { %v2123_v13 = vpop.permute.xlu1 %2122 }
 0x56a   : > { %v2149_v30 = vmul.f32 %v2123_v13, %v4814_v63 }
 0x56c   : > { %2194 = vrot.lane.b32.xlu0 %v2149_v30, %s4457_s22  ;;  %2250 = vperm.xlu2 %4336, %v5472_v31   ;;  %v5545_v30 = vpop.permute.xlu0 %827 }
 0x56d   : > { %2196 = vrot.lane.b32.xlu1 %v2150_v17, %s4457_s22  ;;  %6743 = vst [vmem:[#allocation110_spill] sm:$0xff] %v5545_v30 }
 0x574   : > { %2237 = vperm.xlu0 %4334, %v5479_v39   ;;  %2263 = vperm.xlu2 %4336, %v5481_v46  }
 0x575   : > { %2243 = vperm.xlu1 %4335, %v5479_v39  }
 0x57c   : > { %2302 = vperm.xlu0 %4334, %v5486_v23   ;;  %4338 = vset.pattern.permute.xlu2 %v4593_v27 }
 0x57d   : > { %2256 = vperm.xlu1 %4335, %v5472_v31  }
 0x584   : > { %4339 = vset.pattern.permute.xlu0 %v4593_v27  ;;  %2282 = vperm.xlu2 %4338, %v5491_v4  }
 0x585   : > { %4337 = vset.pattern.permute.xlu1 %v4589_v26 }
 0x58c   : > { %794 = vperm.xlu0 %4339, %v4625_v40   ;;  %2295 = vperm.xlu2 %4338, %v5496_v44  }
 0x58d   : > { %2276 = vperm.xlu1 %4337, %v5491_v4  }
 0x58e   : > { %v5511_v40 = vpop.permute.xlu2 %2170 }
 0x58f   : > { %6735 = vst [vmem:[#allocation102_spill] sm:$0xff] %v5511_v40 }
 0x594   : > { %2269 = vperm.xlu0 %4339, %v5481_v46   ;;  %4341 = vset.pattern.permute.xlu2 %v4589_v26 }
 0x595   : > { %2289 = vperm.xlu1 %4337, %v5496_v44  }
 0x596   : > { %v5516_v26 = vpop.permute.xlu2 %2174 }
 0x597   : > { %6736 = vst [vmem:[#allocation103_spill] sm:$0xff] %v5516_v26 }
 0x59c   : > { %2334 = vperm.xlu0 %4339, %v5506_v37   ;;  %2315 = vperm.xlu2 %4341, %v5504_v41  }
 0x59d   : > { %4340 = vset.pattern.permute.xlu1 %v4593_v27 }
 0x5a4   : > { %4346 = vset.pattern.permute.xlu0 %v4596_v28  ;;  %2328 = vperm.xlu2 %4341, %v5506_v37  }
 0x5a5   : > { %2308 = vperm.xlu1 %4340, %v5486_v23   ;;  %v5531_v53 = vpop.permute.xlu1 %2168 }
 0x5a6   : > { %v5521_v14 = vpop.permute.xlu2 %2180  ;;  %6739 = vst [vmem:[#allocation106_spill] sm:$0xff] %v5531_v53 }
 0x5a7   : > { %6737 = vst [vmem:[#allocation104_spill] sm:$0xff] %v5521_v14 }
 0x5ac   : > { %2450 = vperm.xlu0 %4346, %v5496_v44   ;;  %4343 = vset.pattern.permute.xlu2 %v4596_v28 }
 0x5ad   : > { %2321 = vperm.xlu1 %4340, %v5504_v41   ;;  %v5540_v13 = vpop.permute.xlu1 %2172 }
 0x5ae   : > { %v5526_v27 = vpop.permute.xlu2 %2186  ;;  %6742 = vst [vmem:[#allocation109_spill] sm:$0xff] %v5540_v13 }
 0x5af   : > { %6738 = vst [vmem:[#allocation105_spill] sm:$0xff] %v5526_v27 }
 0x5b4   : > { %4347 = vset.pattern.permute.xlu0 %v4618_v38  ;;  %2402 = vperm.xlu2 %4343, %v5479_v39  }
 0x5b5   : > { %4342 = vset.pattern.permute.xlu1 %v4618_v38 }
 0x5b6   : > { %v5535_v21 = vpop.permute.xlu2 %2192 }
 0x5b7   : > { %6741 = vst [vmem:[#allocation108_spill] sm:$0xff] %v5535_v21  ;;  %v5553_v21 = vpop.permute.xlu0 %2176 }
 0x5bc   : > { %2420 = vperm.xlu0 %4347, %v5481_v46   ;;  %2414 = vperm.xlu2 %4343, %v5472_v31  }
 0x5bd   : > { %2396 = vperm.xlu1 %4342, %v5479_v39   ;;  %v5549_v11 = vpop.permute.xlu1 %2178 }
 0x5be   : > { %v5547_v17 = vpop.permute.xlu2 %2198  ;;  %6745 = vst [vmem:[#allocation112_spill] sm:$0xff] %v5549_v11 }
 0x5bf   : > { %6744 = vst [vmem:[#allocation111_spill] sm:$0xff] %v5547_v17  ;;  %v5561_v14 = vpop.permute.xlu0 %2182 }
 0x5c4   : > { %2480 = vperm.xlu0 %4347, %v5506_v37   ;;  %4345 = vset.pattern.permute.xlu2 %v4618_v38 }
 0x5c5   : > { %2408 = vperm.xlu1 %4342, %v5472_v31  }
 0x5c6   : > { %v5555_v27 = vpop.permute.xlu2 %2250  ;;  %v5558_v13 = vpop.permute.xlu1 %2184 }
 0x5c7   : > { %6746 = vst [vmem:[#allocation113_spill] sm:$0xff] %v5555_v27  ;;  %v5569_v11 = vpop.permute.xlu0 %2188 }
 0x5c8   : > { %6747 = vst [vmem:[#allocation114_spill] sm:$0xff] %v5558_v13 }
 0x5cc   : > { %2432 = vperm.xlu2 %4345, %v5491_v4   ;;  %4355 = vset.pattern.permute.xlu0 %v4652_v45 }
 0x5cd   : > { %4344 = vset.pattern.permute.xlu1 %v4596_v28 }
 0x5ce   : > { %v5563_v53 = vpop.permute.xlu2 %2263 }
 0x5d4   : > { %2444 = vperm.xlu2 %4345, %v5496_v44  }
 0x5d5   : > { %2426 = vperm.xlu1 %4344, %v5481_v46  }
 0x5d6   : > { %v5566_v17 = vpop.permute.xlu1 %2190 }
 0x5d7   : > { %6748 = vst [vmem:[#allocation115_spill] sm:$0xff] %v5566_v17 }
 0x5dc   : > { %4349 = vset.pattern.permute.xlu2 %v4596_v28 }
 0x5dd   : > { %2438 = vperm.xlu1 %4344, %v5491_v4  }
 0x5de   : > { %v5571_v30 = vpop.permute.xlu2 %2282  ;;  %v5575_v13 = vpop.permute.xlu0 %2194 }
 0x5df   : > { %6749 = vst [vmem:[#allocation116_spill] sm:$0xff] %v5575_v13  ;;  %v5577_v27 = vpop.permute.xlu1 %2196 }
 0x5e0   : > { %6750 = vst [vmem:[#allocation117_spill] sm:$0xff] %v5577_v27 }
 0x5e4   : > { %2462 = vperm.xlu2 %4349, %v5486_v23  }
 0x5e5   : > { %4348 = vset.pattern.permute.xlu1 %v4618_v38 }
 0x5e6   : > { %v5579_v26 = vpop.permute.xlu2 %2295  ;;  %v5583_v38 = vpop.permute.xlu0 %2237 }
 0x5e7   : > { %6751 = vst [vmem:[#allocation118_spill] sm:$0xff] %v5579_v26  ;;  %v5585_v17 = vpop.permute.xlu1 %2243  ;;  %v736_v26 = vmax.f32 %v733_v16, 0.0 }
 0x5e8   : > { %6752 = vst [vmem:[#allocation119_spill] sm:$0xff] %v5583_v38 }
 0x5e9   : > { %6753 = vst [vmem:[#allocation120_spill] sm:$0xff] %v5585_v17 }
 0x5ec   : > { %2474 = vperm.xlu2 %4349, %v5504_v41  }
 0x5ed   : > { %2456 = vperm.xlu1 %4348, %v5486_v23  }
 0x5ee   : > { %v5591_v40 = vpop.permute.xlu0 %2302 }
 0x5ef   : > { %v5593_v27 = vpop.permute.xlu1 %2256 }
 0x5f0   : > { %6755 = vst [vmem:[#allocation122_spill] sm:$0xff] %v5593_v27 }
 0x5f4   : > { %4352 = vset.pattern.permute.xlu2 %v4652_v45 }
 0x5f5   : > { %2468 = vperm.xlu1 %4348, %v5504_v41  }
 0x5f6   : > { %v5587_v36 = vpop.permute.xlu2 %2315 }
 0x5f7   : > { %6754 = vst [vmem:[#allocation121_spill] sm:$0xff] %v5587_v36  ;;  %v743_v36 = vmul.f32 %v6628_v10, %v736_v26 }
 0x5f9   : > { %v5608_v49 = vperm.slane %v743_v36, 0  ;;  %v2337_v27 = vrot.slane %v743_v36, 1  ;;  %v2339_v52 = vrot.slane %v743_v36, 3  ;;  %v2342_v0 = vrot.slane %v743_v36, 6 }
 0x5fd   : > { %4350 = vset.pattern.permute.xlu1 %v4596_v28 }
 0x5fe   : > { %v5600_v38 = vpop.permute.xlu2 %2328  ;;  %v5604_v28 = vpop.permute.xlu0 %794 }
 0x5ff   : > { %6757 = vst [vmem:[#allocation124_spill] sm:$0xff] %v5600_v38  ;;  %v5606_v17 = vpop.permute.xlu1 %2276  ;;  %v5615_v38 = vperm.slane %v2337_v27, 0 }
 0x600   : > { %6758 = vst [vmem:[#allocation125_spill] sm:$0xff] %v5606_v17 }
 0x605   : > { %2486 = vperm.xlu1 %4350, %v5506_v37  }
 0x606   : > { %v5613_v13 = vpop.permute.xlu0 %2269 }
 0x607   : > { %6759 = vst [vmem:[#allocation126_spill] sm:$0xff] %v5613_v13  ;;  %v5617_v58 = vpop.permute.xlu1 %2289  ;;  %v2338_v13 = vrot.slane %v743_v36, 2 }
 0x608   : > { %6760 = vst [vmem:[#allocation127_spill] sm:$0xff] %v5617_v58  ;;  %v2340_v58 = vrot.slane %v743_v36, 4 }
 0x60d   : > { %4351 = vset.pattern.permute.xlu1 %v4641_v43 }
 0x60e   : > { %v2403_v16 = vpop.permute.xlu2 %2402  ;;  %v5623_v33 = vpop.permute.xlu0 %2334 }
 0x60f   : > { %v2489_v24 = vmul.f32 %v2403_v16, %v5608_v49  ;;  %6762 = vst [vmem:[#allocation129_spill] sm:$0xff] %v5623_v33  ;;  %v5625_v16 = vperm.slane %v2339_v52, 0 }
 0x611   : > { %2522 = vrot.lane.b32.xlu1 %v2489_v24, %s4451_s30 }
 0x616   : > { %v2415_v26 = vpop.permute.xlu2 %2414 }
 0x617   : > { %v2491_v10 = vmul.f32 %v2415_v26, %v5615_v38  ;;  %v5621_v17 = vpop.permute.xlu1 %2308  ;;  %v5631_v26 = vperm.slane %v2338_v13, 0 }
 0x618   : > { %6761 = vst [vmem:[#allocation128_spill] sm:$0xff] %v5621_v17 }
 0x619   : > { %2526 = vrot.lane.b32.xlu0 %v2491_v10, %s4451_s30  ;;  %v5633_v10 = vperm.slane %v2340_v58, 0 }
 0x61e   : > { %v2451_v5 = vpop.permute.xlu0 %2450 }
 0x61f   : > { %v5627_v50 = vpop.permute.xlu1 %2321  ;;  %v2497_v33 = vmul.f32 %v2451_v5, %v5633_v10 }
 0x620   : > { %6763 = vst [vmem:[#allocation130_spill] sm:$0xff] %v5627_v50  ;;  %v2341_v50 = vrot.slane %v743_v36, 5 }
 0x626   : > { %v2433_v24 = vpop.permute.xlu2 %2432 }
 0x627   : > { %v2494_v27 = vmul.f32 %v2433_v24, %v5625_v16 }
 0x629   : > { %2532 = vrot.lane.b32.xlu0 %v2494_v27, %s4451_s30 }
 0x62e   : > { %v2421_v17 = vpop.permute.xlu0 %2420  ;;  %v2445_v5 = vpop.permute.xlu2 %2444 }
 0x62f   : > { %v2492_v52 = vmul.f32 %v2421_v17, %v5631_v26  ;;  %v2397_v25 = vpop.permute.xlu1 %2396 }
 0x630   : > { %v2488_v2 = vmul.f32 %v2397_v25, %v5608_v49  ;;  %v2496_v25 = vmul.f32 %v2445_v5, %v5633_v10 }
 0x631   : > { %2528 = vrot.lane.b32.xlu1 %v2492_v52, %s4451_s30  ;;  %2538 = vrot.lane.b32.xlu0 %v2497_v33, %s4451_s30  ;;  %v5649_v33 = vperm.slane %v2341_v50, 0  ;;  %v5659_v50 = vperm.slane %v2342_v0, 0 }
 0x632   : > { %2520 = vrot.lane.b32.xlu2 %v2488_v2, %s4451_s30 }
 0x633   : > { %6764 = vst [vmem:[#allocation131_spill] sm:$0xff] %v5649_v33 }
 0x637   : > { %v2409_v24 = vpop.permute.xlu1 %2408 }
 0x638   : > { %v2490_v13 = vmul.f32 %v2409_v24, %v5615_v38 }
 0x63a   : > { %2524 = vrot.lane.b32.xlu2 %v2490_v13, %s4451_s30  ;;  %v2343_v13 = vrot.slane %v743_v36, 7 }
 0x63e   : > { %v2463_v2 = vpop.permute.xlu2 %2462 }
 0x63f   : > { %v2499_v24 = vmul.f32 %v2463_v2, %v5649_v33 }
 0x647   : > { %v2427_v58 = vpop.permute.xlu1 %2426 }
 0x648   : > { %v2493_v27 = vmul.f32 %v2427_v58, %v5631_v26  ;;  %v2481_v58 = vpop.permute.xlu0 %2480 }
 0x64a   : > { %2530 = vrot.lane.b32.xlu2 %v2493_v27, %s4451_s30  ;;  %v5653_v27 = vperm.slane %v2343_v13, 0 }
 0x64c   : > { %v2502_v5 = vmul.f32 %v2481_v58, %v5653_v27 }
 0x64f   : > { %v2439_v17 = vpop.permute.xlu1 %2438 }
 0x650   : > { %v2495_v52 = vmul.f32 %v2439_v17, %v5625_v16 }
 0x652   : > { %2534 = vrot.lane.b32.xlu1 %v2495_v52, %s4451_s30  ;;  %2536 = vrot.lane.b32.xlu2 %v2496_v25, %s4451_s30  ;;  %v2475_v25 = vpop.permute.xlu2 %2474 }
 0x65a   : > { %2542 = vrot.lane.b32.xlu2 %v2499_v24, %s4451_s30  ;;  %v2501_v24 = vmul.f32 %v2475_v25, %v5659_v50 }
 0x65f   : > { %v2457_v63 = vpop.permute.xlu1 %2456 }
 0x660   : > { %v2498_v17 = vmul.f32 %v2457_v63, %v5649_v33 }
 0x662   : > { %2540 = vrot.lane.b32.xlu1 %v2498_v17, %s4451_s30  ;;  %2548 = vrot.lane.b32.xlu2 %v2502_v5, %s4451_s30 }
 0x667   : > { %v2469_v52 = vpop.permute.xlu1 %2468 }
 0x668   : > { %v2500_v2 = vmul.f32 %v2469_v52, %v5659_v50 }
 0x66a   : > { %2544 = vrot.lane.b32.xlu0 %v2500_v2, %s4451_s30  ;;  %2594 = vperm.xlu2 %4352, %v5479_v39  }
 0x66b   : > { %2546 = vrot.lane.b32.xlu1 %v2501_v24, %s4451_s30 }
 0x672   : > { %4354 = vset.pattern.permute.xlu2 %v4641_v43 }
 0x673   : > { %2588 = vperm.xlu1 %4351, %v5479_v39  }
 0x677   : > { %v2487_v63 = vpop.permute.xlu1 %2486 }
 0x678   : > { %v2503_v0 = vmul.f32 %v2487_v63, %v5653_v27 }
 0x67a   : > { %2550 = vrot.lane.b32.xlu0 %v2503_v0, %s4451_s30  ;;  %2612 = vperm.xlu2 %4354, %v5481_v46  }
 0x67b   : > { %4353 = vset.pattern.permute.xlu1 %v4652_v45 }
 0x682   : > { %2630 = vperm.xlu0 %4355, %v5491_v4   ;;  %2624 = vperm.xlu2 %4354, %v5491_v4  }
 0x683   : > { %2606 = vperm.xlu1 %4353, %v5472_v31  }
 0x68a   : > { %4356 = vset.pattern.permute.xlu0 %v4641_v43  ;;  %4358 = vset.pattern.permute.xlu2 %v4652_v45 }
 0x68b   : > { %2618 = vperm.xlu1 %4353, %v5481_v46   ;;  %v5711_v24 = vpop.permute.xlu0 %2526 }
 0x68c   : > { %v5678_v36 = vpop.permute.xlu2 %2520  ;;  %6772 = vst [vmem:[#allocation139_spill] sm:$0xff] %v5711_v24 }
 0x68d   : > { %6765 = vst [vmem:[#allocation132_spill] sm:$0xff] %v5678_v36 }
 0x692   : > { %2600 = vperm.xlu0 %4356, %v5472_v31   ;;  %2642 = vperm.xlu2 %4358, %v5496_v44  }
 0x693   : > { %4357 = vset.pattern.permute.xlu1 %v4641_v43 }
 0x694   : > { %v5686_v13 = vpop.permute.xlu2 %2524 }
 0x695   : > { %6766 = vst [vmem:[#allocation133_spill] sm:$0xff] %v5686_v13 }
 0x69a   : > { %2660 = vperm.xlu0 %4356, %v5504_v41   ;;  %2654 = vperm.xlu2 %4358, %v5486_v23  }
 0x69b   : > { %2636 = vperm.xlu1 %4357, %v5496_v44   ;;  %v5715_v0 = vpop.permute.xlu0 %2532 }
 0x69c   : > { %6773 = vst [vmem:[#allocation140_spill] sm:$0xff] %v5715_v0 }
 0x6a2   : > { %4360 = vset.pattern.permute.xlu2 %v4641_v43  ;;  %4361 = vset.pattern.permute.xlu0 %v4669_v47  ;;  %v5702_v43 = vpop.permute.xlu1 %2522 }
 0x6a3   : > { %2648 = vperm.xlu1 %4357, %v5486_v23   ;;  %6770 = vst [vmem:[#allocation137_spill] sm:$0xff] %v5702_v43 }
 0x6a4   : > { %v5691_v58 = vpop.permute.xlu2 %2530 }
 0x6a5   : > { %6767 = vst [vmem:[#allocation134_spill] sm:$0xff] %v5691_v58  ;;  %v5721_v58 = vpop.permute.xlu0 %2538 }
 0x6a6   : > { %6775 = vst [vmem:[#allocation142_spill] sm:$0xff] %v5721_v58 }
 0x6aa   : > { %2672 = vperm.xlu2 %4360, %v5506_v37   ;;  %v5707_v52 = vpop.permute.xlu1 %2528 }
 0x6ab   : > { %4359 = vset.pattern.permute.xlu1 %v4652_v45 }
 0x6ac   : > { %v5695_v5 = vpop.permute.xlu2 %2536 }
 0x6ad   : > { %6768 = vst [vmem:[#allocation135_spill] sm:$0xff] %v5695_v5 }
 0x6b2   : > { %4363 = vset.pattern.permute.xlu2 %v4669_v47 }
 0x6b3   : > { %2666 = vperm.xlu1 %4359, %v5504_v41  }
 0x6b4   : > { %v5699_v17 = vpop.permute.xlu2 %2542 }
 0x6b5   : > { %6769 = vst [vmem:[#allocation136_spill] sm:$0xff] %v5699_v17 }
 0x6bb   : > { %2678 = vperm.xlu1 %4359, %v5506_v37  }
 0x6bc   : > { %v5704_v25 = vpop.permute.xlu2 %2548 }
 0x6bd   : > { %6771 = vst [vmem:[#allocation138_spill] sm:$0xff] %v5704_v25 }
 0x6c3   : > { %4362 = vset.pattern.permute.xlu1 %v4678_v48 }
 0x6c4   : > { %v2595_v2 = vpop.permute.xlu2 %2594  ;;  %v5713_v63 = vpop.permute.xlu1 %2534 }
 0x6c5   : > { %v2681_v45 = vmul.f32 %v2595_v2, %v5608_v49 }
 0x6c7   : > { %2714 = vrot.lane.b32.xlu0 %v2681_v45, %s4452_s16 }
 0x6d4   : > { %v5717_v17 = vpop.permute.xlu1 %2540  ;;  %v2613_v5 = vpop.permute.xlu2 %2612 }
 0x6d5   : > { %6774 = vst [vmem:[#allocation141_spill] sm:$0xff] %v5717_v17  ;;  %v2684_v25 = vmul.f32 %v2613_v5, %v5631_v26 }
 0x6d7   : > { %2720 = vrot.lane.b32.xlu0 %v2684_v25, %s4452_s16 }
 0x6dc   : > { %v5725_v2 = vpop.permute.xlu0 %2544  ;;  %v2625_v25 = vpop.permute.xlu2 %2624 }
 0x6dd   : > { %v5723_v13 = vpop.permute.xlu1 %2546  ;;  %6777 = vst [vmem:[#allocation144_spill] sm:$0xff] %v5725_v2  ;;  %v2686_v2 = vmul.f32 %v2625_v25, %v5625_v16 }
 0x6de   : > { %6776 = vst [vmem:[#allocation143_spill] sm:$0xff] %v5723_v13 }
 0x6e5   : > { %v2589_v45 = vpop.permute.xlu1 %2588 }
 0x6e6   : > { %v2680_v36 = vmul.f32 %v2589_v45, %v5608_v49 }
 0x6e8   : > { %2712 = vrot.lane.b32.xlu2 %v2680_v36, %s4452_s16 }
 0x6ec   : > { %v5729_v24 = vpop.permute.xlu0 %2550  ;;  %v2643_v45 = vpop.permute.xlu2 %2642 }
 0x6ed   : > { %6778 = vst [vmem:[#allocation145_spill] sm:$0xff] %v5729_v24  ;;  %v2689_v13 = vmul.f32 %v2643_v45, %v5633_v10 }
 0x6f4   : > { %v2631_v0 = vpop.permute.xlu0 %2630 }
 0x6f5   : > { %v2687_v43 = vmul.f32 %v2631_v0, %v5625_v16  ;;  %v2607_v17 = vpop.permute.xlu1 %2606 }
 0x6f6   : > { %v2683_v5 = vmul.f32 %v2607_v17, %v5615_v38 }
 0x6f7   : > { %2726 = vrot.lane.b32.xlu0 %v2687_v43, %s4452_s16 }
 0x6f8   : > { %2718 = vrot.lane.b32.xlu2 %v2683_v5, %s4452_s16 }
 0x6fd   : > { %v2619_v36 = vpop.permute.xlu1 %2618 }
 0x6fe   : > { %v2685_v43 = vmul.f32 %v2619_v36, %v5631_v26 }
 0x700   : > { %2724 = vrot.lane.b32.xlu2 %v2686_v2, %s4452_s16 }
 0x704   : > { %v2601_v58 = vpop.permute.xlu0 %2600 }
 0x705   : > { %v2682_v24 = vmul.f32 %v2601_v58, %v5615_v38 }
 0x707   : > { %2716 = vrot.lane.b32.xlu1 %v2682_v24, %s4452_s16 }
 0x708   : > { %2730 = vrot.lane.b32.xlu2 %v2689_v13, %s4452_s16  ;;  %v2655_v13 = vpop.permute.xlu2 %2654 }
 0x709   : > { %v2691_v24 = vmul.f32 %v2655_v13, %v5649_v33 }
 0x70c   : > { %v2661_v17 = vpop.permute.xlu0 %2660 }
 0x70d   : > { %v2692_v0 = vmul.f32 %v2661_v17, %v5659_v50  ;;  %v2637_v5 = vpop.permute.xlu1 %2636 }
 0x70e   : > { %v2688_v2 = vmul.f32 %v2637_v5, %v5633_v10 }
 0x70f   : > { %2722 = vrot.lane.b32.xlu1 %v2685_v43, %s4452_s16 }
 0x710   : > { %2736 = vrot.lane.b32.xlu2 %v2692_v0, %s4452_s16  ;;  %v2673_v45 = vpop.permute.xlu2 %2672 }
 0x711   : > { %v2694_v36 = vmul.f32 %v2673_v45, %v5653_v27 }
 0x715   : > { %v2649_v25 = vpop.permute.xlu1 %2648 }
 0x716   : > { %v2690_v58 = vmul.f32 %v2649_v25, %v5649_v33 }
 0x717   : > { %2728 = vrot.lane.b32.xlu1 %v2688_v2, %s4452_s16 }
 0x718   : > { %2732 = vrot.lane.b32.xlu0 %v2690_v58, %s4452_s16 }
 0x71f   : > { %2734 = vrot.lane.b32.xlu1 %v2691_v24, %s4452_s16 }
 0x725   : > { %v2667_v17 = vpop.permute.xlu1 %2666 }
 0x726   : > { %v2693_v43 = vmul.f32 %v2667_v17, %v5659_v50 }
 0x727   : > { %2740 = vrot.lane.b32.xlu1 %v2694_v36, %s4452_s16 }
 0x728   : > { %2738 = vrot.lane.b32.xlu0 %v2693_v43, %s4452_s16 }
 0x72d   : > { %v2679_v0 = vpop.permute.xlu1 %2678 }
 0x72e   : > { %v2695_v5 = vmul.f32 %v2679_v0, %v5653_v27 }
 0x72f   : > { %2786 = vperm.xlu1 %4362, %v5479_v39  }
 0x730   : > { %2780 = vperm.xlu0 %4361, %v5479_v39   ;;  %2742 = vrot.lane.b32.xlu2 %v2695_v5, %s4452_s16 }
 0x737   : > { %2798 = vperm.xlu1 %4362, %v5472_v31  }
 0x738   : > { %2840 = vperm.xlu0 %4361, %v5486_v23   ;;  %2792 = vperm.xlu2 %4363, %v5472_v31  }
 0x739   : > { %v5791_v24 = vpop.permute.xlu0 %2714 }
 0x73a   : > { %6784 = vst [vmem:[#allocation151_spill] sm:$0xff] %v5791_v24 }
 0x73f   : > { %4364 = vset.pattern.permute.xlu1 %v4669_v47 }
 0x740   : > { %4366 = vset.pattern.permute.xlu0 %v4678_v48  ;;  %2804 = vperm.xlu2 %4363, %v5481_v46  }
 0x742   : > { %v5774_v2 = vpop.permute.xlu2 %2712 }
 0x743   : > { %6779 = vst [vmem:[#allocation146_spill] sm:$0xff] %v5774_v2 }
 0x747   : > { %2816 = vperm.xlu1 %4364, %v5491_v4  }
 0x748   : > { %2810 = vperm.xlu0 %4366, %v5481_v46   ;;  %4365 = vset.pattern.permute.xlu2 %v4678_v48 }
 0x749   : > { %v5795_v45 = vpop.permute.xlu0 %2720 }
 0x74f   : > { %2828 = vperm.xlu1 %4364, %v5496_v44  }
 0x750   : > { %2870 = vperm.xlu0 %4366, %v5506_v37   ;;  %2822 = vperm.xlu2 %4365, %v5491_v4  }
 0x752   : > { %v5778_v25 = vpop.permute.xlu2 %2718 }
 0x753   : > { %6780 = vst [vmem:[#allocation147_spill] sm:$0xff] %v5778_v25 }
 0x757   : > { %4367 = vset.pattern.permute.xlu1 %v4678_v48 }
 0x758   : > { %2834 = vperm.xlu2 %4365, %v5496_v44   ;;  %4369 = vset.pattern.permute.xlu0 %v4703_v51 }
 0x75a   : > { %v5782_v58 = vpop.permute.xlu2 %2724 }
 0x75b   : > { %6781 = vst [vmem:[#allocation148_spill] sm:$0xff] %v5782_v58 }
 0x75f   : > { %2846 = vperm.xlu1 %4367, %v5486_v23  }
 0x760   : > { %4368 = vset.pattern.permute.xlu2 %v4669_v47 }
 0x762   : > { %v5786_v48 = vpop.permute.xlu2 %2730 }
 0x763   : > { %6782 = vst [vmem:[#allocation149_spill] sm:$0xff] %v5786_v48 }
 0x767   : > { %2858 = vperm.xlu1 %4367, %v5504_v41  }
 0x768   : > { %2852 = vperm.xlu2 %4368, %v5504_v41  }
 0x769   : > { %v5801_v43 = vpop.permute.xlu0 %2726 }
 0x76a   : > { %v5797_v36 = vpop.permute.xlu2 %2736 }
 0x76b   : > { %6786 = vst [vmem:[#allocation153_spill] sm:$0xff] %v5797_v36 }
 0x76f   : > { %4370 = vset.pattern.permute.xlu1 %v4720_v56 }
 0x770   : > { %2864 = vperm.xlu2 %4368, %v5506_v37  }
 0x778   : > { %4371 = vset.pattern.permute.xlu2 %v4703_v51 }
 0x779   : > { %v5789_v13 = vpop.permute.xlu1 %2716 }
 0x77a   : > { %6783 = vst [vmem:[#allocation150_spill] sm:$0xff] %v5789_v13 }
 0x781   : > { %v5793_v47 = vpop.permute.xlu1 %2722 }
 0x782   : > { %6785 = vst [vmem:[#allocation152_spill] sm:$0xff] %v5793_v47 }
 0x789   : > { %v5799_v17 = vpop.permute.xlu1 %2728 }
 0x78a   : > { %6787 = vst [vmem:[#allocation154_spill] sm:$0xff] %v5799_v17  ;;  %v5803_v0 = vpop.permute.xlu2 %2742  ;;  %v5807_v48 = vpop.permute.xlu0 %2732 }
 0x78b   : > { %6788 = vst [vmem:[#allocation155_spill] sm:$0xff] %v5803_v0 }
 0x78c   : > { %6790 = vst [vmem:[#allocation157_spill] sm:$0xff] %v5807_v48 }
 0x791   : > { %v5805_v5 = vpop.permute.xlu1 %2734 }
 0x792   : > { %6789 = vst [vmem:[#allocation156_spill] sm:$0xff] %v5805_v5  ;;  %v2793_v58 = vpop.permute.xlu2 %2792 }
 0x799   : > { %v5809_v13 = vpop.permute.xlu1 %2740 }
 0x79a   : > { %6791 = vst [vmem:[#allocation158_spill] sm:$0xff] %v5809_v13  ;;  %v5811_v2 = vpop.permute.xlu0 %2738  ;;  %v2805_v47 = vpop.permute.xlu2 %2804 }
 0x79b   : > { %6792 = vst [vmem:[#allocation159_spill] sm:$0xff] %v5811_v2  ;;  %v2876_v25 = vmul.f32 %v2805_v47, %v5631_v26  ;;  %v2874_v2 = vmul.f32 %v2793_v58, %v5615_v38 }
 0x79d   : > { %2912 = vrot.lane.b32.xlu0 %v2876_v25, %s4453_s17 }
 0x7a1   : > { %v2787_v36 = vpop.permute.xlu1 %2786 }
 0x7a2   : > { %v2781_v17 = vpop.permute.xlu0 %2780  ;;  %v2873_v24 = vmul.f32 %v2787_v36, %v5608_v49 }
 0x7a3   : > { %v2872_v0 = vmul.f32 %v2781_v17, %v5608_v49 }
 0x7a4   : > { %2906 = vrot.lane.b32.xlu2 %v2873_v24, %s4453_s17 }
 0x7a5   : > { %2904 = vrot.lane.b32.xlu1 %v2872_v0, %s4453_s17 }
 0x7a9   : > { %v2799_v5 = vpop.permute.xlu1 %2798 }
 0x7aa   : > { %v2875_v13 = vmul.f32 %v2799_v5, %v5615_v38  ;;  %v2823_v48 = vpop.permute.xlu2 %2822  ;;  %v2841_v25 = vpop.permute.xlu0 %2840 }
 0x7ab   : > { %v2879_v47 = vmul.f32 %v2823_v48, %v5625_v16  ;;  %v2882_v36 = vmul.f32 %v2841_v25, %v5649_v33 }
 0x7ac   : > { %2910 = vrot.lane.b32.xlu2 %v2875_v13, %s4453_s17 }
 0x7ad   : > { %2908 = vrot.lane.b32.xlu1 %v2874_v2, %s4453_s17  ;;  %2918 = vrot.lane.b32.xlu0 %v2879_v47, %s4453_s17 }
 0x7b2   : > { %v2835_v58 = vpop.permute.xlu2 %2834 }
 0x7b3   : > { %v2881_v2 = vmul.f32 %v2835_v58, %v5633_v10 }
 0x7b5   : > { %2924 = vrot.lane.b32.xlu0 %v2882_v36, %s4453_s17 }
 0x7b9   : > { %v2817_v24 = vpop.permute.xlu1 %2816 }
 0x7ba   : > { %v2811_v17 = vpop.permute.xlu0 %2810  ;;  %v2878_v0 = vmul.f32 %v2817_v24, %v5625_v16 }
 0x7bb   : > { %v2877_v5 = vmul.f32 %v2811_v17, %v5631_v26 }
 0x7bc   : > { %2916 = vrot.lane.b32.xlu2 %v2878_v0, %s4453_s17 }
 0x7bd   : > { %2914 = vrot.lane.b32.xlu1 %v2877_v5, %s4453_s17 }
 0x7c1   : > { %v2829_v48 = vpop.permute.xlu1 %2828 }
 0x7c2   : > { %v2880_v13 = vmul.f32 %v2829_v48, %v5633_v10  ;;  %v2853_v47 = vpop.permute.xlu2 %2852  ;;  %v2871_v36 = vpop.permute.xlu0 %2870 }
 0x7c3   : > { %v2884_v25 = vmul.f32 %v2853_v47, %v5659_v50  ;;  %v2887_v17 = vmul.f32 %v2871_v36, %v5653_v27 }
 0x7c4   : > { %2922 = vrot.lane.b32.xlu2 %v2881_v2, %s4453_s17 }
 0x7c5   : > { %2920 = vrot.lane.b32.xlu1 %v2880_v13, %s4453_s17  ;;  %v876_v13 = vmul.f32 %v4850_v34, %v4717_v55 }
 0x7c7   : > { %v1068_v47 = vadd.f32 %v5069_v12, %v876_v13  ;;  %v2370_v13 = vmul.f32 %v5649_v33, %v5591_v40 }
 0x7c9   : > { %v1260_v36 = vadd.f32 %v5079_v1, %v1068_v47 }
 0x7ca   : > { %v2865_v5 = vpop.permute.xlu2 %2864 }
 0x7cb   : > { %v2886_v2 = vmul.f32 %v2865_v5, %v5653_v27 }
 0x7cc   : > { %2928 = vrot.lane.b32.xlu2 %v2884_v25, %s4453_s17  ;;  %v879_v25 = vmul.f32 %v4796_v22, %v5604_v28 }
 0x7d1   : > { %v2847_v24 = vpop.permute.xlu1 %2846 }
 0x7d2   : > { %v2883_v0 = vmul.f32 %v2847_v24, %v5649_v33  ;;  %v1071_v24 = vadd.f32 %v5082_v8, %v879_v25  ;;  %v2364_v8 = vmul.f32 %v5631_v26, %v5563_v53 }
 0x7d4   : > { %2926 = vrot.lane.b32.xlu1 %v2883_v0, %s4453_s17  ;;  %2934 = vrot.lane.b32.xlu2 %v2887_v17, %s4453_s17  ;;  %v1452_v17 = vadd.f32 %v5133_v20, %v1260_v36  ;;  %v1263_v55 = vadd.f32 %v5095_v6, %v1071_v24  ;;  %v6793_v36 = vld [vmem:[#allocation141_spill] sm:$0xff] }
 0x7d6   : > { %v1644_v0 = vadd.f32 %v5176_v60, %v1452_v17  ;;  %v1455_v20 = vadd.f32 %v5144_v29, %v1263_v55  ;;  %v6794_v17 = vld [vmem:[#allocation23_spill] sm:$0xff] }
 0x7d8   : > { %v1836_v12 = vadd.f32 %v5319_v9, %v1644_v0  ;;  %v1647_v6 = vadd.f32 %v5186_v61, %v1455_v20  ;;  %v6797_v20 = vld [vmem:[#allocation17_spill] sm:$0xff] }
 0x7d9   : > { %v2859_v58 = vpop.permute.xlu1 %2858 }
 0x7da   : > { %v2885_v48 = vmul.f32 %v2859_v58, %v5659_v50  ;;  %v2028_v1 = vadd.f32 %v5426_v42, %v1836_v12  ;;  %v1839_v42 = vadd.f32 %v5325_v18, %v1647_v6 }
 0x7dc   : > { %2930 = vrot.lane.b32.xlu0 %v2885_v48, %s4453_s17  ;;  %2984 = vperm.xlu2 %4371, %v5472_v31   ;;  %v2220_v60 = vadd.f32 %v5553_v21, %v2028_v1 }
 0x7dd   : > { %2932 = vrot.lane.b32.xlu1 %v2886_v2, %s4453_s17 }
 0x7de   : > { %v2380_v9 = vadd.f32 %v2364_v8, %v2220_v60  ;;  %v6796_v8 = vld [vmem:[#allocation9_spill] sm:$0xff] }
 0x7df   : > { %v885_v60 = vmul.f32 %v6797_v20, %v6796_v8 }
 0x7e0   : > { %v2572_v28 = vadd.f32 %v5707_v52, %v2380_v9  ;;  %v2031_v52 = vadd.f32 %v5430_v62, %v1839_v42  ;;  %v6798_v9 = vld [vmem:[#allocation31_spill] sm:$0xff] }
 0x7e2   : > { %v2764_v29 = vadd.f32 %v5795_v45, %v2572_v28  ;;  %v2367_v45 = vmul.f32 %v5625_v16, %v5571_v30  ;;  %v1077_v28 = vadd.f32 %v6798_v9, %v885_v60 }
 0x7e4   : > { %2972 = vperm.xlu0 %4369, %v5479_v39   ;;  %2996 = vperm.xlu2 %4371, %v5481_v46  }
 0x7e5   : > { %2978 = vperm.xlu1 %4370, %v5479_v39  }
 0x7ec   : > { %3032 = vperm.xlu0 %4369, %v5486_v23   ;;  %4373 = vset.pattern.permute.xlu2 %v4720_v56 }
 0x7ed   : > { %2990 = vperm.xlu1 %4370, %v5472_v31  }
 0x7f4   : > { %4374 = vset.pattern.permute.xlu0 %v4720_v56  ;;  %3014 = vperm.xlu2 %4373, %v5491_v4  }
 0x7f5   : > { %4372 = vset.pattern.permute.xlu1 %v4703_v51 }
 0x7fc   : > { %3002 = vperm.xlu0 %4374, %v5481_v46   ;;  %3026 = vperm.xlu2 %4373, %v5496_v44  }
 0x7fd   : > { %3008 = vperm.xlu1 %4372, %v5491_v4  }
 0x7fe   : > { %v5869_v5 = vpop.permute.xlu2 %2906 }
 0x804   : > { %3062 = vperm.xlu0 %4374, %v5506_v37   ;;  %4376 = vset.pattern.permute.xlu2 %v4703_v51  ;;  %v882_v51 = vmul.f32 %v4864_v32, %v4732_v59 }
 0x805   : > { %3020 = vperm.xlu1 %4372, %v5496_v44  }
 0x806   : > { %v5888_v53 = vpop.permute.xlu2 %2910  ;;  %v1074_v61 = vadd.f32 %v5093_v54, %v882_v51  ;;  %v6799_v51 = vld [vmem:[#allocation35_spill] sm:$0xff] }
 0x807   : > { %v1269_v42 = vadd.f32 %v6799_v51, %v1077_v28 }
 0x808   : > { %v1266_v48 = vadd.f32 %v5110_v57, %v1074_v61  ;;  %v6800_v61 = vld [vmem:[#allocation44_spill] sm:$0xff] }
 0x80a   : > { %v1458_v18 = vadd.f32 %v5156_v7, %v1266_v48 }
 0x80c   : > { %3044 = vperm.xlu2 %4376, %v5504_v41   ;;  %4377 = vset.pattern.permute.xlu0 %v5000_v3  ;;  %v1650_v54 = vadd.f32 %v5195_v19, %v1458_v18 }
 0x80d   : > { %4375 = vset.pattern.permute.xlu1 %v4720_v56  ;;  %v2223_v56 = vadd.f32 %v5561_v14, %v2031_v52  ;;  %v1461_v52 = vadd.f32 %v6800_v61, %v1269_v42 }
 0x80e   : > { %v1842_v62 = vadd.f32 %v5331_v35, %v1650_v54 }
 0x80f   : > { %v2913_v21 = vpop.permute.xlu0 %2912  ;;  %v2383_v2 = vadd.f32 %v2367_v45, %v2223_v56  ;;  %v6801_v56 = vld [vmem:[#allocation53_spill] sm:$0xff]  ;;  %v6802_v45 = vld [vmem:[#allocation83_spill] sm:$0xff] }
 0x810   : > { %v5891_v58 = vadd.f32 %v2913_v21, %v2764_v29  ;;  %v2034_v14 = vadd.f32 %v5436_v15, %v1842_v62  ;;  %v6795_v15 = vld [vmem:[#allocation157_spill] sm:$0xff]  ;;  %v1653_v18 = vadd.f32 %v6801_v56, %v1461_v52 }
 0x811   : > { %v2575_v57 = vadd.f32 %v5713_v63, %v2383_v2  ;;  %v6803_v2 = vld [vmem:[#allocation100_spill] sm:$0xff] }
 0x812   : > { %v2226_v19 = vadd.f32 %v5569_v11, %v2034_v14  ;;  %v1845_v54 = vadd.f32 %v6802_v45, %v1653_v18 }
 0x813   : > { %v2767_v7 = vadd.f32 %v5801_v43, %v2575_v57  ;;  %v6804_v57 = vld [vmem:[#allocation130_spill] sm:$0xff] }
 0x814   : > { %3056 = vperm.xlu2 %4376, %v5506_v37   ;;  %v2386_v35 = vadd.f32 %v2370_v13, %v2226_v19  ;;  %v2037_v62 = vadd.f32 %v6803_v2, %v1845_v54  ;;  %v2373_v14 = vmul.f32 %v5659_v50, %v6804_v57 }
 0x815   : > { %3038 = vperm.xlu1 %4375, %v5486_v23  }
 0x816   : > { %v5898_v59 = vpop.permute.xlu2 %2916  ;;  %v2578_v24 = vadd.f32 %v6793_v36, %v2386_v35  ;;  %v6807_v35 = vld [vmem:[#allocation143_spill] sm:$0xff] }
 0x817   : > { %v5917_v63 = vpop.permute.xlu1 %2904 }
 0x818   : > { %v2770_v0 = vadd.f32 %v6795_v15, %v2578_v24  ;;  %v6808_v24 = vld [vmem:[#allocation159_spill] sm:$0xff] }
 0x81c   : > { %4379 = vset.pattern.permute.xlu2 %v5000_v3 }
 0x81d   : > { %3050 = vperm.xlu1 %4375, %v5504_v41  }
 0x81e   : > { %v5912_v47 = vpop.permute.xlu2 %2922 }
 0x81f   : > { %v2919_v30 = vpop.permute.xlu0 %2918  ;;  %v5926_v12 = vpop.permute.xlu1 %2908 }
 0x820   : > { %v5915_v25 = vadd.f32 %v2919_v30, %v2767_v7  ;;  %v6806_v7 = vld [vmem:[#allocation116_spill] sm:$0xff] }
 0x821   : > { %v2229_v30 = vadd.f32 %v6806_v7, %v2037_v62 }
 0x823   : > { %v2389_v19 = vadd.f32 %v2373_v14, %v2229_v30 }
 0x825   : > { %4378 = vset.pattern.permute.xlu1 %v6794_v17  ;;  %v2581_v36 = vadd.f32 %v6807_v35, %v2389_v19 }
 0x826   : > { %v5922_v55 = vpop.permute.xlu2 %2928 }
 0x827   : > { %v2925_v40 = vpop.permute.xlu0 %2924  ;;  %v2773_v15 = vadd.f32 %v6808_v24, %v2581_v36 }
 0x828   : > { %v5924_v43 = vadd.f32 %v2925_v40, %v2770_v0 }
 0x82e   : > { %v5928_v1 = vpop.permute.xlu2 %2934 }
 0x82f   : > { %v5930_v11 = vpop.permute.xlu1 %2914 }
 0x836   : > { %v2985_v6 = vpop.permute.xlu2 %2984 }
 0x837   : > { %v5936_v29 = vpop.permute.xlu1 %2920  ;;  %v3066_v52 = vmul.f32 %v2985_v6, %v5615_v38 }
 0x83e   : > { %v2997_v21 = vpop.permute.xlu2 %2996 }
 0x83f   : > { %v3068_v48 = vmul.f32 %v2997_v21, %v5631_v26 }
 0x841   : > { %3104 = vrot.lane.b32.xlu0 %v3068_v48, %s4454_s18 }
 0x846   : > { %v5946_v13 = vpop.permute.xlu1 %2926 }
 0x847   : > { %6805 = vst [vmem:[#allocation141_spill] sm:$0xff] %v5946_v13  ;;  %v6848_v13 = vld [vmem:[#allocation110_spill] sm:$0xff] }
 0x84e   : > { %v2931_v0 = vpop.permute.xlu0 %2930  ;;  %v3015_v40 = vpop.permute.xlu2 %3014 }
 0x84f   : > { %v5951_v8 = vadd.f32 %v2931_v0, %v2773_v15  ;;  %v5953_v60 = vpop.permute.xlu1 %2932  ;;  %v3071_v9 = vmul.f32 %v3015_v40, %v5625_v16 }
 0x850   : > { %6809 = vst [vmem:[#allocation23_spill] sm:$0xff] %v5953_v60  ;;  %v6839_v60 = vld [vmem:[#allocation28_spill] sm:$0xff] }
 0x851   : > { %3110 = vrot.lane.b32.xlu0 %v3071_v9, %s4454_s18 }
 0x856   : > { %v2973_v28 = vpop.permute.xlu0 %2972  ;;  %v3027_v6 = vpop.permute.xlu2 %3026 }
 0x857   : > { %v3064_v51 = vmul.f32 %v2973_v28, %v5608_v49  ;;  %v2979_v42 = vpop.permute.xlu1 %2978  ;;  %v3073_v14 = vmul.f32 %v3027_v6, %v5633_v10 }
 0x858   : > { %v3065_v21 = vmul.f32 %v2979_v42, %v5608_v49  ;;  %v6811_v42 = vld [vmem:[#allocation14_spill] sm:$0xff] }
 0x859   : > { %3096 = vrot.lane.b32.xlu1 %v3064_v51, %s4454_s18  ;;  %v6810_v51 = vld [vmem:[#allocation4_spill] sm:$0xff] }
 0x85a   : > { %3098 = vrot.lane.b32.xlu2 %v3065_v21, %s4454_s18  ;;  %v873_v21 = vmul.f32 %v6811_v42, %v6810_v51 }
 0x85e   : > { %v3033_v61 = vpop.permute.xlu0 %3032 }
 0x85f   : > { %v3074_v48 = vmul.f32 %v3033_v61, %v5649_v33  ;;  %v2991_v56 = vpop.permute.xlu1 %2990  ;;  %v6812_v61 = vld [vmem:[#allocation26_spill] sm:$0xff] }
 0x860   : > { %v3067_v18 = vmul.f32 %v2991_v56, %v5615_v38 }
 0x861   : > { %3100 = vrot.lane.b32.xlu1 %v3066_v52, %s4454_s18  ;;  %3116 = vrot.lane.b32.xlu0 %v3074_v48, %s4454_s18  ;;  %v1065_v52 = vadd.f32 %v6812_v61, %v873_v21  ;;  %v6813_v48 = vld [vmem:[#allocation27_spill] sm:$0xff] }
 0x862   : > { %3102 = vrot.lane.b32.xlu2 %v3067_v18, %s4454_s18  ;;  %v6814_v18 = vld [vmem:[#allocation50_spill] sm:$0xff] }
 0x863   : > { %v1257_v56 = vadd.f32 %v6813_v48, %v1065_v52  ;;  %v6822_v52 = vld [vmem:[#allocation72_spill] sm:$0xff] }
 0x866   : > { %v3045_v30 = vpop.permute.xlu2 %3044 }
 0x867   : > { %v3076_v19 = vmul.f32 %v3045_v30, %v5659_v50 }
 0x86e   : > { %v3003_v45 = vpop.permute.xlu0 %3002  ;;  %v3057_v0 = vpop.permute.xlu2 %3056 }
 0x86f   : > { %v3069_v54 = vmul.f32 %v3003_v45, %v5631_v26  ;;  %v3009_v2 = vpop.permute.xlu1 %3008  ;;  %v3078_v28 = vmul.f32 %v3057_v0, %v5653_v27  ;;  %v1449_v45 = vadd.f32 %v6814_v18, %v1257_v56  ;;  %v6821_v0 = vld [vmem:[#allocation151_spill] sm:$0xff] }
 0x870   : > { %v3070_v62 = vmul.f32 %v3009_v2, %v5625_v16 }
 0x871   : > { %3106 = vrot.lane.b32.xlu1 %v3069_v54, %s4454_s18  ;;  %v6815_v54 = vld [vmem:[#allocation63_spill] sm:$0xff] }
 0x872   : > { %3108 = vrot.lane.b32.xlu2 %v3070_v62, %s4454_s18  ;;  %v1641_v2 = vadd.f32 %v6815_v54, %v1449_v45  ;;  %v6816_v62 = vld [vmem:[#allocation74_spill] sm:$0xff] }
 0x874   : > { %v1833_v6 = vadd.f32 %v6816_v62, %v1641_v2 }
 0x876   : > { %v3063_v35 = vpop.permute.xlu0 %3062 }
 0x877   : > { %v3021_v57 = vpop.permute.xlu1 %3020  ;;  %v3079_v24 = vmul.f32 %v3063_v35, %v5653_v27 }
 0x878   : > { %v3072_v7 = vmul.f32 %v3021_v57, %v5633_v10  ;;  %v6817_v57 = vld [vmem:[#allocation89_spill] sm:$0xff] }
 0x87a   : > { %3112 = vrot.lane.b32.xlu1 %v3072_v7, %s4454_s18  ;;  %3114 = vrot.lane.b32.xlu2 %v3073_v14, %s4454_s18  ;;  %v2025_v14 = vadd.f32 %v6817_v57, %v1833_v6  ;;  %v6818_v7 = vld [vmem:[#allocation120_spill] sm:$0xff] }
 0x87b   : > { %v2361_v30 = vmul.f32 %v5608_v49, %v6818_v7 }
 0x882   : > { %3120 = vrot.lane.b32.xlu2 %v3076_v19, %s4454_s18  ;;  %v6819_v19 = vld [vmem:[#allocation102_spill] sm:$0xff] }
 0x883   : > { %v2217_v35 = vadd.f32 %v6819_v19, %v2025_v14 }
 0x887   : > { %v3039_v36 = vpop.permute.xlu1 %3038 }
 0x888   : > { %v3075_v15 = vmul.f32 %v3039_v36, %v5649_v33  ;;  %v2377_v36 = vadd.f32 %v2361_v30, %v2217_v35 }
 0x88a   : > { %3118 = vrot.lane.b32.xlu1 %v3075_v15, %s4454_s18  ;;  %3126 = vrot.lane.b32.xlu2 %v3079_v24, %s4454_s18  ;;  %v6820_v24 = vld [vmem:[#allocation137_spill] sm:$0xff] }
 0x88b   : > { %v2569_v15 = vadd.f32 %v6820_v24, %v2377_v36 }
 0x88f   : > { %v3051_v40 = vpop.permute.xlu1 %3050 }
 0x890   : > { %v3077_v9 = vmul.f32 %v3051_v40, %v5659_v50  ;;  %v2761_v40 = vadd.f32 %v6821_v0, %v2569_v15 }
 0x892   : > { %3122 = vrot.lane.b32.xlu0 %v3077_v9, %s4454_s18  ;;  %3176 = vperm.xlu2 %4379, %v5472_v31   ;;  %v2953_v9 = vadd.f32 %v5869_v5, %v2761_v40 }
 0x893   : > { %3124 = vrot.lane.b32.xlu1 %v3078_v28, %s4454_s18 }
 0x89a   : > { %3164 = vperm.xlu0 %4377, %v5479_v39   ;;  %3188 = vperm.xlu2 %4379, %v5481_v46  }
 0x89b   : > { %3170 = vperm.xlu1 %4378, %v5479_v39  }
 0x8a2   : > { %3224 = vperm.xlu0 %4377, %v5486_v23   ;;  %4381 = vset.pattern.permute.xlu2 %v6794_v17 }
 0x8a3   : > { %3182 = vperm.xlu1 %4378, %v5472_v31  }
 0x8aa   : > { %4382 = vset.pattern.permute.xlu0 %v6794_v17  ;;  %3206 = vperm.xlu2 %4381, %v5491_v4  }
 0x8ab   : > { %4380 = vset.pattern.permute.xlu1 %v5000_v3 }
 0x8b2   : > { %3194 = vperm.xlu0 %4382, %v5481_v46   ;;  %3218 = vperm.xlu2 %4381, %v5496_v44  }
 0x8b3   : > { %3200 = vperm.xlu1 %4380, %v5491_v4   ;;  %v3105_v28 = vpop.permute.xlu0 %3104 }
 0x8b4   : > { %v6013_v51 = vadd.f32 %v3105_v28, %v5891_v58  ;;  %v3099_v21 = vpop.permute.xlu2 %3098 }
 0x8b5   : > { %v6015_v61 = vadd.f32 %v3099_v21, %v2953_v9 }
 0x8ba   : > { %3254 = vperm.xlu0 %4382, %v5506_v37   ;;  %4384 = vset.pattern.permute.xlu2 %v5000_v3 }
 0x8bb   : > { %3212 = vperm.xlu1 %4380, %v5496_v44  }
 0x8bc   : > { %v6023_v48 = vpop.permute.xlu2 %3102 }
 0x8c2   : > { %3236 = vperm.xlu2 %4384, %v5504_v41   ;;  %4385 = vset.pattern.permute.xlu0 %v6822_v52 }
 0x8c3   : > { %4383 = vset.pattern.permute.xlu1 %v6794_v17  ;;  %v3111_v5 = vpop.permute.xlu0 %3110 }
 0x8c4   : > { %v6026_v58 = vadd.f32 %v3111_v5, %v5915_v25  ;;  %v6823_v25 = vld [vmem:[#allocation73_spill] sm:$0xff] }
 0x8ca   : > { %3248 = vperm.xlu2 %4384, %v5506_v37  }
 0x8cb   : > { %3230 = vperm.xlu1 %4383, %v5486_v23   ;;  %v6039_v45 = vpop.permute.xlu1 %3096 }
 0x8cc   : > { %v6030_v56 = vpop.permute.xlu2 %3108 }
 0x8d2   : > { %4387 = vset.pattern.permute.xlu2 %v6822_v52 }
 0x8d3   : > { %3242 = vperm.xlu1 %4383, %v5504_v41   ;;  %v3117_v3 = vpop.permute.xlu0 %3116  ;;  %v6044_v2 = vpop.permute.xlu1 %3100 }
 0x8d4   : > { %v6035_v18 = vadd.f32 %v3117_v3, %v5924_v43  ;;  %v6037_v17 = vpop.permute.xlu2 %3114 }
 0x8db   : > { %4386 = vset.pattern.permute.xlu1 %v6823_v25 }
 0x8dc   : > { %v6042_v54 = vpop.permute.xlu2 %3120 }
 0x8e3   : > { %v6048_v6 = vpop.permute.xlu1 %3106 }
 0x8e4   : > { %v6046_v62 = vpop.permute.xlu2 %3126 }
 0x8ec   : > { %v3177_v57 = vpop.permute.xlu2 %3176  ;;  %v6050_v14 = vpop.permute.xlu1 %3112 }
 0x8f4   : > { %v3189_v7 = vpop.permute.xlu2 %3188 }
 0x8f5   : > { %v3260_v43 = vmul.f32 %v3189_v7, %v5631_v26 }
 0x8f7   : > { %3296 = vrot.lane.b32.xlu0 %v3260_v43, %s4455_s19 }
 0x8fc   : > { %v6054_v30 = vpop.permute.xlu1 %3118 }
 0x8fd   : > { %6824 = vst [vmem:[#allocation157_spill] sm:$0xff] %v6054_v30 }
 0x904   : > { %v3123_v19 = vpop.permute.xlu0 %3122  ;;  %v3207_v35 = vpop.permute.xlu2 %3206 }
 0x905   : > { %v6057_v36 = vadd.f32 %v3123_v19, %v5951_v8  ;;  %v6059_v24 = vpop.permute.xlu1 %3124  ;;  %v3263_v15 = vmul.f32 %v3207_v35, %v5625_v16  ;;  %v3258_v8 = vmul.f32 %v3177_v57, %v5615_v38 }
 0x906   : > { %6826 = vst [vmem:[#allocation17_spill] sm:$0xff] %v6059_v24 }
 0x907   : > { %6825 = vst [vmem:[#allocation9_spill] sm:$0xff] %v6057_v36  ;;  %3302 = vrot.lane.b32.xlu0 %v3263_v15, %s4455_s19  ;;  %v6835_v36 = vld [vmem:[#allocation90_spill] sm:$0xff] }
 0x90c   : > { %v3165_v0 = vpop.permute.xlu0 %3164  ;;  %v3219_v57 = vpop.permute.xlu2 %3218 }
 0x90d   : > { %v3256_v40 = vmul.f32 %v3165_v0, %v5608_v49  ;;  %v3171_v9 = vpop.permute.xlu1 %3170 }
 0x90e   : > { %v3257_v28 = vmul.f32 %v3171_v9, %v5608_v49 }
 0x90f   : > { %3288 = vrot.lane.b32.xlu1 %v3256_v40, %s4455_s19  ;;  %v3265_v40 = vmul.f32 %v3219_v57, %v5633_v10  ;;  %v6827_v57 = vld [vmem:[#allocation3_spill] sm:$0xff] }
 0x910   : > { %3290 = vrot.lane.b32.xlu2 %v3257_v28, %s4455_s19 }
 0x914   : > { %v3225_v21 = vpop.permute.xlu0 %3224 }
 0x915   : > { %v3266_v5 = vmul.f32 %v3225_v21, %v5649_v33  ;;  %v3183_v3 = vpop.permute.xlu1 %3182 }
 0x916   : > { %v3259_v7 = vmul.f32 %v3183_v3, %v5615_v38 }
 0x917   : > { %3292 = vrot.lane.b32.xlu1 %v3258_v8, %s4455_s19  ;;  %3308 = vrot.lane.b32.xlu0 %v3266_v5, %s4455_s19 }
 0x918   : > { %3294 = vrot.lane.b32.xlu2 %v3259_v7, %s4455_s19 }
 0x91c   : > { %v3237_v28 = vpop.permute.xlu2 %3236 }
 0x91d   : > { %v3268_v21 = vmul.f32 %v3237_v28, %v5659_v50 }
 0x924   : > { %v3195_v43 = vpop.permute.xlu0 %3194 }
 0x925   : > { %v3261_v19 = vmul.f32 %v3195_v43, %v5631_v26  ;;  %v3201_v35 = vpop.permute.xlu1 %3200  ;;  %v3249_v43 = vpop.permute.xlu2 %3248 }
 0x926   : > { %v3262_v15 = vmul.f32 %v3201_v35, %v5625_v16 }
 0x927   : > { %3298 = vrot.lane.b32.xlu1 %v3261_v19, %s4455_s19 }
 0x928   : > { %3300 = vrot.lane.b32.xlu2 %v3262_v15, %s4455_s19  ;;  %v3270_v15 = vmul.f32 %v3249_v43, %v5653_v27 }
 0x92c   : > { %v3255_v8 = vpop.permute.xlu0 %3254 }
 0x92d   : > { %v3213_v0 = vpop.permute.xlu1 %3212  ;;  %v3271_v3 = vmul.f32 %v3255_v8, %v5653_v27 }
 0x92e   : > { %v3264_v9 = vmul.f32 %v3213_v0, %v5633_v10  ;;  %v6828_v0 = vld [vmem:[#allocation15_spill] sm:$0xff] }
 0x930   : > { %3304 = vrot.lane.b32.xlu1 %v3264_v9, %s4455_s19  ;;  %3306 = vrot.lane.b32.xlu2 %v3265_v40, %s4455_s19  ;;  %v875_v40 = vmul.f32 %v6828_v0, %v6827_v57  ;;  %v6829_v9 = vld [vmem:[#allocation20_spill] sm:$0xff] }
 0x932   : > { %v1067_v28 = vadd.f32 %v6829_v9, %v875_v40  ;;  %v6836_v40 = vld [vmem:[#allocation122_spill] sm:$0xff] }
 0x933   : > { %v2363_v9 = vmul.f32 %v5615_v38, %v6836_v40 }
 0x938   : > { %3312 = vrot.lane.b32.xlu2 %v3268_v21, %s4455_s19  ;;  %v6830_v21 = vld [vmem:[#allocation39_spill] sm:$0xff] }
 0x939   : > { %v1259_v8 = vadd.f32 %v6830_v21, %v1067_v28  ;;  %v6837_v28 = vld [vmem:[#allocation103_spill] sm:$0xff] }
 0x93d   : > { %v3231_v5 = vpop.permute.xlu1 %3230 }
 0x93e   : > { %v3267_v7 = vmul.f32 %v3231_v5, %v5649_v33  ;;  %v6831_v5 = vld [vmem:[#allocation52_spill] sm:$0xff]  ;;  %v6851_v33 = vld [vmem:[#allocation55_spill] sm:$0xff] }
 0x940   : > { %3310 = vrot.lane.b32.xlu1 %v3267_v7, %s4455_s19  ;;  %3318 = vrot.lane.b32.xlu2 %v3271_v3, %s4455_s19  ;;  %v1451_v3 = vadd.f32 %v6831_v5, %v1259_v8  ;;  %v6832_v7 = vld [vmem:[#allocation65_spill] sm:$0xff]  ;;  %v6838_v8 = vld [vmem:[#allocation2_spill] sm:$0xff] }
 0x941   : > { %v872_v5 = vmul.f32 %v6811_v42, %v6838_v8  ;;  %v6843_v42 = vld [vmem:[#allocation21_spill] sm:$0xff] }
 0x942   : > { %v1643_v43 = vadd.f32 %v6832_v7, %v1451_v3  ;;  %v6840_v3 = vld [vmem:[#allocation7_spill] sm:$0xff] }
 0x943   : > { %v878_v7 = vmul.f32 %v4796_v22, %v6840_v3  ;;  %v6846_v22 = vld [vmem:[#allocation33_spill] sm:$0xff] }
 0x945   : > { %v3243_v19 = vpop.permute.xlu1 %3242 }
 0x946   : > { %v3269_v35 = vmul.f32 %v3243_v19, %v5659_v50  ;;  %v6833_v19 = vld [vmem:[#allocation75_spill] sm:$0xff] }
 0x948   : > { %3314 = vrot.lane.b32.xlu0 %v3269_v35, %s4455_s19  ;;  %3368 = vperm.xlu2 %4387, %v5472_v31   ;;  %v1835_v35 = vadd.f32 %v6833_v19, %v1643_v43  ;;  %v6841_v43 = vld [vmem:[#allocation19_spill] sm:$0xff] }
 0x949   : > { %3316 = vrot.lane.b32.xlu1 %v3270_v15, %s4455_s19  ;;  %v6834_v15 = vld [vmem:[#allocation107_spill] sm:$0xff]  ;;  %v1064_v19 = vadd.f32 %v6841_v43, %v872_v5  ;;  %v884_v5 = vmul.f32 %v6797_v20, %v6848_v13 }
 0x94a   : > { %v874_v57 = vmul.f32 %v6828_v0, %v6834_v15  ;;  %v2027_v24 = vadd.f32 %v6835_v36, %v1835_v35  ;;  %v1070_v15 = vadd.f32 %v6843_v42, %v878_v7  ;;  %v6849_v43 = vld [vmem:[#allocation147_spill] sm:$0xff]  ;;  %v6852_v42 = vld [vmem:[#allocation58_spill] sm:$0xff] }
 0x94b   : > { %v6856_v20 = vld [vmem:[#allocation67_spill] sm:$0xff] }
 0x94c   : > { %v2219_v21 = vadd.f32 %v6837_v28, %v2027_v24  ;;  %v1066_v30 = vadd.f32 %v6839_v60, %v874_v57  ;;  %v6844_v60 = vld [vmem:[#allocation139_spill] sm:$0xff]  ;;  %v6845_v28 = vld [vmem:[#allocation37_spill] sm:$0xff] }
 0x94d   : > { %v1256_v8 = vadd.f32 %v6845_v28, %v1064_v19  ;;  %v6855_v19 = vld [vmem:[#allocation16_spill] sm:$0xff] }
 0x94e   : > { %v2379_v0 = vadd.f32 %v2363_v9, %v2219_v21  ;;  %v1258_v9 = vadd.f32 %v6846_v22, %v1066_v30  ;;  %v6847_v21 = vld [vmem:[#allocation41_spill] sm:$0xff]  ;;  %v6854_v30 = vld [vmem:[#allocation8_spill] sm:$0xff]  ;;  %v6859_v22 = vld [vmem:[#allocation22_spill] sm:$0xff] }
 0x94f   : > { %v1262_v3 = vadd.f32 %v6847_v21, %v1070_v15  ;;  %v881_v15 = vmul.f32 %v6855_v19, %v6854_v30  ;;  %v6860_v21 = vld [vmem:[#allocation76_spill] sm:$0xff] }
 0x950   : > { %3356 = vperm.xlu0 %4385, %v5479_v39   ;;  %3380 = vperm.xlu2 %4387, %v5481_v46   ;;  %v2571_v57 = vadd.f32 %v6844_v60, %v2379_v0 }
 0x951   : > { %3362 = vperm.xlu1 %4386, %v5479_v39   ;;  %v1454_v7 = vadd.f32 %v6851_v33, %v1262_v3  ;;  %v6858_v33 = vld [vmem:[#allocation77_spill] sm:$0xff] }
 0x953   : > { %v1646_v13 = vadd.f32 %v6856_v20, %v1454_v7  ;;  %v6863_v7 = vld [vmem:[#allocation119_spill] sm:$0xff]  ;;  %v6866_v20 = vld [vmem:[#allocation46_spill] sm:$0xff] }
 0x955   : > { %v1838_v3 = vadd.f32 %v6860_v21, %v1646_v13  ;;  %v6871_v21 = vld [vmem:[#allocation79_spill] sm:$0xff] }
 0x958   : > { %3428 = vperm.xlu0 %4385, %v5504_v41   ;;  %4389 = vset.pattern.permute.xlu2 %v6823_v25 }
 0x959   : > { %3374 = vperm.xlu1 %4386, %v5472_v31  }
 0x960   : > { %4390 = vset.pattern.permute.xlu0 %v6823_v25  ;;  %3398 = vperm.xlu2 %4389, %v5491_v4  }
 0x961   : > { %4388 = vset.pattern.permute.xlu1 %v6822_v52 }
 0x968   : > { %3386 = vperm.xlu0 %4390, %v5481_v46   ;;  %3410 = vperm.xlu2 %4389, %v5496_v44  }
 0x969   : > { %3392 = vperm.xlu1 %4388, %v5491_v4   ;;  %v3297_v36 = vpop.permute.xlu0 %3296 }
 0x96a   : > { %v6124_v24 = vadd.f32 %v3297_v36, %v6013_v51  ;;  %v3291_v35 = vpop.permute.xlu2 %3290  ;;  %v2763_v51 = vadd.f32 %v6849_v43, %v2571_v57  ;;  %v6850_v36 = vld [vmem:[#allocation45_spill] sm:$0xff]  ;;  %v6857_v57 = vld [vmem:[#allocation24_spill] sm:$0xff] }
 0x96b   : > { %v6129_v40 = vadd.f32 %v3291_v35, %v6015_v61  ;;  %v6853_v35 = vld [vmem:[#allocation47_spill] sm:$0xff]  ;;  %v1076_v28 = vadd.f32 %v6857_v57, %v884_v5  ;;  %v2360_v5 = vmul.f32 %v5608_v49, %v6863_v7  ;;  %v6867_v57 = vld [vmem:[#allocation125_spill] sm:$0xff] }
 0x96c   : > { %6842 = vst [vmem:[#allocation31_spill] sm:$0xff] %v6124_v24  ;;  %v1448_v24 = vadd.f32 %v6850_v36, %v1256_v8  ;;  %v2955_v0 = vadd.f32 %v5888_v53, %v2763_v51  ;;  %v1450_v60 = vadd.f32 %v6853_v35, %v1258_v9  ;;  %v1073_v9 = vadd.f32 %v6859_v22, %v881_v15  ;;  %v6862_v36 = vld [vmem:[#allocation60_spill] sm:$0xff]  ;;  %v6864_v35 = vld [vmem:[#allocation43_spill] sm:$0xff] }
 0x96d   : > { %v2366_v15 = vmul.f32 %v5625_v16, %v6867_v57  ;;  %v6870_v22 = vld [vmem:[#allocation104_spill] sm:$0xff]  ;;  %v6874_v7 = vld [vmem:[#allocation59_spill] sm:$0xff] }
 0x96e   : > { %v1640_v61 = vadd.f32 %v6852_v42, %v1448_v24  ;;  %v3147_v8 = vadd.f32 %v6023_v48, %v2955_v0  ;;  %v1642_v42 = vadd.f32 %v6862_v36, %v1450_v60  ;;  %v1265_v48 = vadd.f32 %v6864_v35, %v1073_v9  ;;  %v6865_v0 = vld [vmem:[#allocation91_spill] sm:$0xff]  ;;  %v6873_v9 = vld [vmem:[#allocation69_spill] sm:$0xff] }
 0x96f   : > { %v2030_v30 = vadd.f32 %v6865_v0, %v1838_v3  ;;  %v6872_v36 = vld [vmem:[#allocation87_spill] sm:$0xff] }
 0x970   : > { %3446 = vperm.xlu0 %4390, %v5506_v37   ;;  %4392 = vset.pattern.permute.xlu2 %v6822_v52  ;;  %v1832_v53 = vadd.f32 %v6858_v33, %v1640_v61  ;;  %v6861_v52 = vld [vmem:[#allocation93_spill] sm:$0xff]  ;;  %v1268_v61 = vadd.f32 %v6866_v20, %v1076_v28  ;;  %v6868_v33 = vld [vmem:[#allocation106_spill] sm:$0xff]  ;;  %v1834_v60 = vadd.f32 %v6871_v21, %v1642_v42 }
 0x971   : > { %3404 = vperm.xlu1 %4388, %v5496_v44   ;;  %v6882_v21 = vld [vmem:[#allocation70_spill] sm:$0xff] }
 0x972   : > { %v3295_v24 = vpop.permute.xlu2 %3294  ;;  %v2024_v51 = vadd.f32 %v6861_v52, %v1832_v53  ;;  %v2222_v53 = vadd.f32 %v6870_v22, %v2030_v30  ;;  %v1460_v28 = vadd.f32 %v6874_v7, %v1268_v61  ;;  %v6876_v30 = vld [vmem:[#allocation78_spill] sm:$0xff] }
 0x973   : > { %v6153_v43 = vadd.f32 %v3295_v24, %v3147_v8  ;;  %v6869_v8 = vld [vmem:[#allocation57_spill] sm:$0xff]  ;;  %v6880_v22 = vld [vmem:[#allocation146_spill] sm:$0xff] }
 0x974   : > { %v2216_v13 = vadd.f32 %v6868_v33, %v2024_v51  ;;  %v1457_v24 = vadd.f32 %v6869_v8, %v1265_v48  ;;  %v2382_v35 = vadd.f32 %v2366_v15, %v2222_v53  ;;  %v6875_v51 = vld [vmem:[#allocation132_spill] sm:$0xff]  ;;  %v6878_v33 = vld [vmem:[#allocation95_spill] sm:$0xff]  ;;  %v6879_v8 = vld [vmem:[#allocation113_spill] sm:$0xff] }
 0x975   : > { %v6881_v15 = vld [vmem:[#allocation92_spill] sm:$0xff]  ;;  %v6883_v7 = vld [vmem:[#allocation118_spill] sm:$0xff] }
 0x976   : > { %v2376_v52 = vadd.f32 %v2360_v5, %v2216_v13  ;;  %v1649_v3 = vadd.f32 %v6873_v9, %v1457_v24  ;;  %v6877_v5 = vld [vmem:[#allocation140_spill] sm:$0xff]  ;;  %v2026_v13 = vadd.f32 %v6878_v33, %v1834_v60  ;;  %v2362_v24 = vmul.f32 %v5615_v38, %v6879_v8  ;;  %v6887_v33 = vld [vmem:[#allocation5_spill] sm:$0xff] }
 0x977   : > { %v2574_v57 = vadd.f32 %v6877_v5, %v2382_v35  ;;  %v1652_v9 = vadd.f32 %v6882_v21, %v1460_v28  ;;  %v6888_v28 = vld [vmem:[#allocation11_spill] sm:$0xff] }
 0x978   : > { %4397 = vset.pattern.permute.xlu0 %v6872_v36  ;;  %3440 = vperm.xlu2 %4392, %v5506_v37   ;;  %v2568_v20 = vadd.f32 %v6875_v51, %v2376_v52  ;;  %v1841_v42 = vadd.f32 %v6876_v30, %v1649_v3  ;;  %v2369_v52 = vmul.f32 %v5633_v10, %v6883_v7  ;;  %v6885_v51 = vld [vmem:[#allocation109_spill] sm:$0xff] }
 0x979   : > { %4391 = vset.pattern.permute.xlu1 %v6823_v25  ;;  %v3303_v0 = vpop.permute.xlu0 %3302  ;;  %v2218_v3 = vadd.f32 %v6885_v51, %v2026_v13  ;;  %v6886_v30 = vld [vmem:[#allocation105_spill] sm:$0xff]  ;;  %v6890_v13 = vld [vmem:[#allocation80_spill] sm:$0xff]  ;;  %v6894_v51 = vld [vmem:[#allocation142_spill] sm:$0xff] }
 0x97a   : > { %v6175_v48 = vadd.f32 %v3303_v0, %v6026_v58  ;;  %v2760_v61 = vadd.f32 %v6880_v22, %v2568_v20  ;;  %v2033_v53 = vadd.f32 %v6881_v15, %v1841_v42  ;;  %v6884_v58 = vld [vmem:[#allocation148_spill] sm:$0xff]  ;;  %v877_v20 = vmul.f32 %v4850_v34, %v6887_v33  ;;  %v6898_v33 = vld [vmem:[#allocation94_spill] sm:$0xff] }
 0x97b   : > { %v2766_v0 = vadd.f32 %v6884_v58, %v2574_v57  ;;  %v2378_v8 = vadd.f32 %v2362_v24, %v2218_v3  ;;  %v6889_v57 = vld [vmem:[#allocation18_spill] sm:$0xff]  ;;  %v1844_v15 = vadd.f32 %v6890_v13, %v1652_v9  ;;  %v6892_v24 = vld [vmem:[#allocation133_spill] sm:$0xff]  ;;  %v6895_v9 = vld [vmem:[#allocation36_spill] sm:$0xff] }
 0x97c   : > { %v2952_v35 = vadd.f32 %v5917_v63, %v2760_v61  ;;  %v2225_v60 = vadd.f32 %v6886_v30, %v2033_v53  ;;  %v887_v22 = vmul.f32 %v6889_v57, %v6888_v28  ;;  %v6891_v53 = vld [vmem:[#allocation29_spill] sm:$0xff]  ;;  %v6896_v30 = vld [vmem:[#allocation150_spill] sm:$0xff] }
 0x97d   : > { %v2958_v5 = vadd.f32 %v5898_v59, %v2766_v0  ;;  %v1069_v34 = vadd.f32 %v6891_v53, %v877_v20  ;;  %v2570_v21 = vadd.f32 %v6892_v24, %v2378_v8  ;;  %v6893_v58 = vld [vmem:[#allocation25_spill] sm:$0xff]  ;;  %v2036_v28 = vadd.f32 %v6898_v33, %v1844_v15  ;;  %v6903_v24 = vld [vmem:[#allocation108_spill] sm:$0xff]  ;;  %v6905_v15 = vld [vmem:[#allocation6_spill] sm:$0xff] }
 0x97e   : > { %v3144_v42 = vadd.f32 %v6039_v45, %v2952_v35  ;;  %v2385_v63 = vadd.f32 %v2369_v52, %v2225_v60  ;;  %v1079_v0 = vadd.f32 %v6893_v58, %v887_v22  ;;  %v6897_v60 = vld [vmem:[#allocation48_spill] sm:$0xff]  ;;  %v6899_v20 = vld [vmem:[#allocation121_spill] sm:$0xff] }
 0x97f   : > { %v3150_v61 = vadd.f32 %v6030_v56, %v2958_v5  ;;  %v1261_v52 = vadd.f32 %v6895_v9, %v1069_v34  ;;  %v2762_v56 = vadd.f32 %v6896_v30, %v2570_v21  ;;  %v2372_v8 = vmul.f32 %v5659_v50, %v6899_v20  ;;  %v6904_v21 = vld [vmem:[#allocation62_spill] sm:$0xff] }
 0x980   : > { %3572 = vperm.xlu0 %4397, %v5481_v46   ;;  %3416 = vperm.xlu2 %4392, %v5486_v23   ;;  %v2577_v3 = vadd.f32 %v6894_v51, %v2385_v63  ;;  %v1271_v5 = vadd.f32 %v6897_v60, %v1079_v0  ;;  %v6902_v63 = vld [vmem:[#allocation61_spill] sm:$0xff]  ;;  %v880_v51 = vmul.f32 %v6855_v19, %v6905_v15  ;;  %v6909_v19 = vld [vmem:[#allocation82_spill] sm:$0xff]  ;;  %v6917_v15 = vld [vmem:[#allocation112_spill] sm:$0xff] }
 0x981   : > { %3434 = vperm.xlu1 %4391, %v5504_v41   ;;  %v3289_v59 = vpop.permute.xlu1 %3288  ;;  %v2954_v22 = vadd.f32 %v5926_v12, %v2762_v56  ;;  %v6907_v56 = vld [vmem:[#allocation81_spill] sm:$0xff] }
 0x982   : > { %v6204_v45 = vadd.f32 %v3289_v59, %v3144_v42  ;;  %v3301_v7 = vpop.permute.xlu2 %3300  ;;  %v6900_v42 = vld [vmem:[#allocation149_spill] sm:$0xff] }
 0x983   : > { %v6208_v35 = vadd.f32 %v3301_v7, %v3150_v61  ;;  %v2769_v13 = vadd.f32 %v6900_v42, %v2577_v3  ;;  %v6901_v59 = vld [vmem:[#allocation49_spill] sm:$0xff]  ;;  %v1463_v61 = vadd.f32 %v6902_v63, %v1271_v5  ;;  %v2228_v7 = vadd.f32 %v6903_v24, %v2036_v28  ;;  %v6906_v3 = vld [vmem:[#allocation71_spill] sm:$0xff]  ;;  %v6908_v28 = vld [vmem:[#allocation30_spill] sm:$0xff] }
 0x984   : > { %v1453_v53 = vadd.f32 %v6901_v59, %v1261_v52  ;;  %v3146_v0 = vadd.f32 %v6044_v2, %v2954_v22  ;;  %v1072_v20 = vadd.f32 %v6908_v28, %v880_v51  ;;  %v6912_v22 = vld [vmem:[#allocation126_spill] sm:$0xff] }
 0x985   : > { %v2961_v34 = vadd.f32 %v5912_v47, %v2769_v13  ;;  %v1655_v9 = vadd.f32 %v6906_v3, %v1463_v61  ;;  %v2388_v12 = vadd.f32 %v2372_v8, %v2228_v7  ;;  %v6910_v13 = vld [vmem:[#allocation144_spill] sm:$0xff]  ;;  %v2365_v63 = vmul.f32 %v5631_v26, %v6912_v22  ;;  %v6913_v61 = vld [vmem:[#allocation38_spill] sm:$0xff]  ;;  %v6918_v3 = vld [vmem:[#allocation51_spill] sm:$0xff] }
 0x986   : > { %v1645_v58 = vadd.f32 %v6904_v21, %v1453_v53  ;;  %v1264_v24 = vadd.f32 %v6913_v61, %v1072_v20  ;;  %v6914_v7 = vld [vmem:[#allocation96_spill] sm:$0xff]  ;;  %v6921_v20 = vld [vmem:[#allocation134_spill] sm:$0xff] }
 0x987   : > { %v3153_v52 = vadd.f32 %v6037_v17, %v2961_v34  ;;  %v1847_v42 = vadd.f32 %v6909_v19, %v1655_v9  ;;  %v2580_v8 = vadd.f32 %v6910_v13, %v2388_v12  ;;  %v6911_v17 = vld [vmem:[#allocation97_spill] sm:$0xff]  ;;  %v6919_v12 = vld [vmem:[#allocation111_spill] sm:$0xff]  ;;  %v6922_v13 = vld [vmem:[#allocation84_spill] sm:$0xff] }
 0x988   : > { %3596 = vperm.xlu0 %4397, %v5496_v44   ;;  %4395 = vset.pattern.permute.xlu2 %v6872_v36  ;;  %v1837_v60 = vadd.f32 %v6907_v56, %v1645_v58  ;;  %v6916_v58 = vld [vmem:[#allocation153_spill] sm:$0xff]  ;;  %v1456_v9 = vadd.f32 %v6918_v3, %v1264_v24  ;;  %v6920_v56 = vld [vmem:[#allocation64_spill] sm:$0xff]  ;;  %v6925_v61 = vld [vmem:[#allocation98_spill] sm:$0xff] }
 0x989   : > { %4393 = vset.pattern.permute.xlu1 %v6872_v36  ;;  %v3293_v30 = vpop.permute.xlu1 %3292  ;;  %v3309_v47 = vpop.permute.xlu0 %3308  ;;  %v2039_v34 = vadd.f32 %v6914_v7, %v1847_v42  ;;  %v6924_v22 = vld [vmem:[#allocation152_spill] sm:$0xff]  ;;  %v6926_v7 = vld [vmem:[#allocation127_spill] sm:$0xff] }
 0x98a   : > { %v6232_v5 = vadd.f32 %v3293_v30, %v3146_v0  ;;  %v6235_v2 = vadd.f32 %v3309_v47, %v6035_v18  ;;  %v3307_v33 = vpop.permute.xlu2 %3306  ;;  %v2029_v53 = vadd.f32 %v6911_v17, %v1837_v60  ;;  %v6915_v18 = vld [vmem:[#allocation129_spill] sm:$0xff]  ;;  %v2772_v0 = vadd.f32 %v6916_v58, %v2580_v8  ;;  %v6928_v58 = vld [vmem:[#allocation114_spill] sm:$0xff]  ;;  %v6929_v3 = vld [vmem:[#allocation88_spill] sm:$0xff] }
 0x98b   : > { %v6240_v59 = vadd.f32 %v3307_v33, %v3153_v52  ;;  %v2375_v21 = vmul.f32 %v5653_v27, %v6915_v18  ;;  %v2231_v52 = vadd.f32 %v6919_v12, %v2039_v34  ;;  %v1648_v60 = vadd.f32 %v6920_v56, %v1456_v9  ;;  %v6923_v17 = vld [vmem:[#allocation145_spill] sm:$0xff]  ;;  %v6927_v18 = vld [vmem:[#allocation155_spill] sm:$0xff]  ;;  %v6930_v9 = vld [vmem:[#allocation10_spill] sm:$0xff] }
 0x98c   : > { %v2221_v51 = vadd.f32 %v6917_v15, %v2029_v53  ;;  %v2964_v30 = vadd.f32 %v5922_v55, %v2772_v0  ;;  %v2368_v34 = vmul.f32 %v5633_v10, %v6926_v7  ;;  %v883_v12 = vmul.f32 %v4864_v32, %v6930_v9  ;;  %v6935_v32 = vld [vmem:[#allocation54_spill] sm:$0xff] }
 0x98d   : > { %v2391_v33 = vadd.f32 %v2375_v21, %v2231_v52  ;;  %v1840_v8 = vadd.f32 %v6922_v13, %v1648_v60  ;;  %v6931_v60 = vld [vmem:[#allocation32_spill] sm:$0xff]  ;;  %v6943_v9 = vld [vmem:[#allocation42_spill] sm:$0xff] }
 0x98e   : > { %v2381_v47 = vadd.f32 %v2365_v63, %v2221_v51  ;;  %v3156_v28 = vadd.f32 %v6042_v54, %v2964_v30 }
 0x98f   : > { %v2583_v53 = vadd.f32 %v6923_v17, %v2391_v33  ;;  %v2032_v24 = vadd.f32 %v6925_v61, %v1840_v8  ;;  %v6932_v33 = vld [vmem:[#allocation135_spill] sm:$0xff]  ;;  %v6936_v17 = vld [vmem:[#allocation66_spill] sm:$0xff] }
 0x990   : > { %3548 = vperm.xlu0 %4397, %v5479_v39   ;;  %3620 = vperm.xlu2 %4395, %v5504_v41   ;;  %v2573_v19 = vadd.f32 %v6921_v20, %v2381_v47  ;;  %v6933_v20 = vld [vmem:[#allocation40_spill] sm:$0xff] }
 0x991   : > { %3584 = vperm.xlu1 %4393, %v5491_v4   ;;  %v2775_v54 = vadd.f32 %v6927_v18, %v2583_v53  ;;  %v2224_v0 = vadd.f32 %v6928_v58, %v2032_v24 }
 0x992   : > { %v3313_v42 = vpop.permute.xlu2 %3312  ;;  %v2765_v63 = vadd.f32 %v6924_v22, %v2573_v19 }
 0x993   : > { %v6262_v55 = vadd.f32 %v3313_v42, %v3156_v28  ;;  %v2967_v15 = vadd.f32 %v5928_v1, %v2775_v54  ;;  %v2384_v52 = vadd.f32 %v2368_v34, %v2224_v0  ;;  %v1075_v1 = vadd.f32 %v6931_v60, %v883_v12  ;;  %v6934_v42 = vld [vmem:[#allocation154_spill] sm:$0xff]  ;;  %v6938_v34 = vld [vmem:[#allocation85_spill] sm:$0xff]  ;;  %v6941_v0 = vld [vmem:[#allocation128_spill] sm:$0xff] }
 0x994   : > { %v2957_v21 = vadd.f32 %v5930_v11, %v2765_v63  ;;  %v6937_v63 = vld [vmem:[#allocation12_spill] sm:$0xff]  ;;  %v6944_v12 = vld [vmem:[#allocation115_spill] sm:$0xff] }
 0x995   : > { %v3159_v30 = vadd.f32 %v6046_v62, %v2967_v15  ;;  %v1267_v19 = vadd.f32 %v6933_v20, %v1075_v1  ;;  %v886_v61 = vmul.f32 %v6889_v57, %v6937_v63  ;;  %v6942_v15 = vld [vmem:[#allocation131_spill] sm:$0xff]  ;;  %v6946_v57 = vmov 0   ;;  %v6954_v63 = vld [vmem:[#allocation117_spill] sm:$0xff] }
 0x996   : > { %v3149_v51 = vadd.f32 %v6048_v6, %v2957_v21  ;;  %v2576_v6 = vadd.f32 %v6932_v33, %v2384_v52  ;;  %v6945_v52 = vld [vmem:[#allocation56_spill] sm:$0xff] }
 0x997   : > { %v1459_v8 = vadd.f32 %v6935_v32, %v1267_v19  ;;  %v6948_v33 = vld [vmem:[#allocation136_spill] sm:$0xff]  ;;  %v6949_v19 = vld [vmem:[#allocation86_spill] sm:$0xff] }
 0x998   : > { %4402 = vset.pattern.permute.xlu0 %v6929_v3  ;;  %3560 = vperm.xlu2 %4395, %v5472_v31   ;;  %v2768_v13 = vadd.f32 %v6934_v42, %v2576_v6 }
 0x999   : > { %4394 = vset.pattern.permute.xlu1 %v6929_v3  ;;  %v3299_v47 = vpop.permute.xlu1 %3298  ;;  %v1651_v53 = vadd.f32 %v6936_v17, %v1459_v8  ;;  %v6951_v8 = vld [vmem:[#allocation101_spill] sm:$0xff]  ;;  %v6952_v17 = vld [vmem:[#allocation124_spill] sm:$0xff] }
 0x99a   : > { %v6279_v11 = vadd.f32 %v3299_v47, %v3149_v51  ;;  %v3319_v56 = vpop.permute.xlu2 %3318  ;;  %v2960_v62 = vadd.f32 %v5936_v29, %v2768_v13  ;;  %v6939_v29 = vld [vmem:[#allocation34_spill] sm:$0xff]  ;;  %v2371_v51 = vmul.f32 %v6942_v15, %v6941_v0  ;;  %v6950_v13 = vld [vmem:[#allocation156_spill] sm:$0xff] }
 0x99b   : > { %v6283_v28 = vadd.f32 %v3319_v56, %v3159_v30  ;;  %v1843_v18 = vadd.f32 %v6938_v34, %v1651_v53  ;;  %v1078_v21 = vadd.f32 %v6939_v29, %v886_v61  ;;  %v6947_v56 = vld [vmem:[#allocation68_spill] sm:$0xff]  ;;  %v2374_v53 = vmul.f32 %v5653_v27, %v6952_v17  ;;  %v6957_v0 = vld [vmem:[#allocation158_spill] sm:$0xff] }
 0x99c   : > { %v3152_v22 = vadd.f32 %v6050_v14, %v2960_v62 }
 0x99d   : > { %v1270_v14 = vadd.f32 %v6943_v9, %v1078_v21  ;;  %v6958_v9 = vld [vmem:[#allocation23_spill] sm:$0xff] }
 0x99f   : > { %v1462_v30 = vadd.f32 %v6945_v52, %v1270_v14  ;;  %v6960_v52 = vld [vmem:[#allocation9_spill] sm:$0xff] }
 0x9a0   : > { %3554 = vperm.xlu0 %4402, %v5479_v39   ;;  %3632 = vperm.xlu2 %4395, %v5506_v37   ;;  %v6940_v39 = vld [vmem:[#allocation99_spill] sm:$0xff] }
 0x9a1   : > { %3590 = vperm.xlu1 %4394, %v5491_v4   ;;  %v2035_v58 = vadd.f32 %v6940_v39, %v1843_v18  ;;  %v1654_v60 = vadd.f32 %v6947_v56, %v1462_v30  ;;  %v6956_v39 = vld [vmem:[#allocation138_spill] sm:$0xff] }
 0x9a2   : > { %v3305_v24 = vpop.permute.xlu1 %3304  ;;  %v3369_v7 = vpop.permute.xlu2 %3368 }
 0x9a3   : > { %v6297_v54 = vadd.f32 %v3305_v24, %v3152_v22  ;;  %v2227_v4 = vadd.f32 %v6944_v12, %v2035_v58  ;;  %v1846_v42 = vadd.f32 %v6949_v19, %v1654_v60  ;;  %v6953_v22 = vld [vmem:[#allocation141_spill] sm:$0xff] }
 0x9a4   : > { %v6955_v24 = vld [vmem:[#allocation157_spill] sm:$0xff] }
 0x9a5   : > { %v2387_v47 = vadd.f32 %v2371_v51, %v2227_v4  ;;  %v2038_v62 = vadd.f32 %v6951_v8, %v1846_v42  ;;  %v6959_v12 = vld [vmem:[#allocation17_spill] sm:$0xff] }
 0x9a7   : > { %v2579_v6 = vadd.f32 %v6948_v33, %v2387_v47  ;;  %v2230_v61 = vadd.f32 %v6954_v63, %v2038_v62 }
 0x9a8   : > { %4399 = vset.pattern.permute.xlu2 %v6929_v3  ;;  %4439 = vset.pattern.permute.xlu0 %v6946_v57 }
 0x9a9   : > { %4396 = vset.pattern.permute.xlu1 %v6823_v25  ;;  %v2771_v32 = vadd.f32 %v6950_v13, %v2579_v6  ;;  %v2390_v18 = vadd.f32 %v2374_v53, %v2230_v61  ;;  %v3450_v6 = vmul.f32 %v3369_v7, %v5615_v38 }
 0x9aa   : > { %v3381_v1 = vpop.permute.xlu2 %3380 }
 0x9ab   : > { %v3452_v20 = vmul.f32 %v3381_v1, %v5631_v26  ;;  %v2963_v25 = vadd.f32 %v6953_v22, %v2771_v32  ;;  %v2582_v58 = vadd.f32 %v6956_v39, %v2390_v18 }
 0x9ad   : > { %3488 = vrot.lane.b32.xlu0 %v3452_v20, %s4456_s21  ;;  %v3155_v34 = vadd.f32 %v6955_v24, %v2963_v25  ;;  %v2774_v51 = vadd.f32 %v6957_v0, %v2582_v58 }
 0x9af   : > { %v2966_v14 = vadd.f32 %v6958_v9, %v2774_v51 }
 0x9b0   : > { %3578 = vperm.xlu2 %4399, %v5481_v46  }
 0x9b1   : > { %3422 = vperm.xlu1 %4396, %v5486_v23   ;;  %v3158_v46 = vadd.f32 %v6959_v12, %v2966_v14 }
 0x9b2   : > { %v3311_v29 = vpop.permute.xlu1 %3310 }
 0x9b3   : > { %v6323_v21 = vadd.f32 %v3311_v29, %v3155_v34 }
 0x9b8   : > { %3638 = vperm.xlu2 %4399, %v5506_v37  }
 0x9b9   : > { %4398 = vset.pattern.permute.xlu1 %v6929_v3 }
 0x9ba   : > { %v3315_v4 = vpop.permute.xlu0 %3314  ;;  %v3399_v60 = vpop.permute.xlu2 %3398 }
 0x9bb   : > { %v6332_v30 = vadd.f32 %v3315_v4, %v6960_v52  ;;  %v3317_v47 = vpop.permute.xlu1 %3316  ;;  %v3455_v1 = vmul.f32 %v3399_v60, %v5625_v16 }
 0x9bc   : > { %v6334_v56 = vadd.f32 %v3317_v47, %v3158_v46 }
 0x9c0   : > { %3614 = vperm.xlu2 %4399, %v5486_v23  }
 0x9c1   : > { %3626 = vperm.xlu1 %4398, %v5504_v41  }
 0x9c2   : > { %v3357_v33 = vpop.permute.xlu0 %3356  ;;  %v6342_v37 = vpop.permute.xlu2 %3410 }
 0x9c3   : > { %v6348_v42 = vpop.permute.xlu1 %3362 }
 0x9c8   : > { %3494 = vrot.lane.b32.xlu2 %v3455_v1, %s4456_s21 }
 0x9c9   : > { %3566 = vperm.xlu1 %4398, %v5472_v31   ;;  %4438 = vset.pattern.permute.xlu2 %v6946_v57 }
 0x9ca   : > { %v3429_v20 = vpop.permute.xlu0 %3428 }
 0x9cb   : > { %v3375_v7 = vpop.permute.xlu1 %3374  ;;  %v3460_v25 = vmul.f32 %v3429_v20, %v5659_v50  ;;  %v3457_v20 = vmul.f32 %v6342_v37, %v5633_v10 }
 0x9cc   : > { %v3451_v58 = vmul.f32 %v3375_v7, %v5615_v38 }
 0x9d0   : > { %3484 = vrot.lane.b32.xlu2 %v3450_v6, %s4456_s21 }
 0x9d1   : > { %4400 = vset.pattern.permute.xlu1 %v6872_v36 }
 0x9d2   : > { %v3441_v19 = vpop.permute.xlu2 %3440 }
 0x9d3   : > { %v3462_v41 = vmul.f32 %v3441_v19, %v5653_v27 }
 0x9d8   : > { %3508 = vrot.lane.b32.xlu2 %v3462_v41, %s4456_s21 }
 0x9d9   : > { %3608 = vperm.xlu1 %4400, %v5486_v23   ;;  %v3448_v23 = vmul.f32 %v3357_v33, %v5608_v49 }
 0x9da   : > { %v3387_v31 = vpop.permute.xlu0 %3386  ;;  %v3417_v13 = vpop.permute.xlu2 %3416 }
 0x9db   : > { %v3453_v57 = vmul.f32 %v3387_v31, %v5631_v26  ;;  %v3393_v8 = vpop.permute.xlu1 %3392  ;;  %v3458_v14 = vmul.f32 %v3417_v13, %v6942_v15 }
 0x9dc   : > { %v3454_v17 = vmul.f32 %v3393_v8, %v5625_v16 }
 0x9e0   : > { %3490 = vrot.lane.b32.xlu2 %v3453_v57, %s4456_s21 }
 0x9e1   : > { %4401 = vset.pattern.permute.xlu1 %v6929_v3 }
 0x9e2   : > { %v3447_v36 = vpop.permute.xlu0 %3446 }
 0x9e3   : > { %v3463_v32 = vmul.f32 %v3447_v36, %v5653_v27  ;;  %v3405_v3 = vpop.permute.xlu1 %3404 }
 0x9e4   : > { %v3456_v9 = vmul.f32 %v3405_v3, %v5633_v10 }
 0x9e8   : > { %3510 = vrot.lane.b32.xlu2 %v3463_v32, %s4456_s21  ;;  %v3449_v32 = vmul.f32 %v6348_v42, %v5608_v49 }
 0x9e9   : > { %3602 = vperm.xlu1 %4401, %v5496_v44  }
 0x9ea   : > { %v3621_v62 = vpop.permute.xlu2 %3620 }
 0x9eb   : > { %v3652_v60 = vmul.f32 %v3621_v62, %v5659_v50 }
 0x9f0   : > { %3480 = vrot.lane.b32.xlu2 %v3448_v23, %s4456_s21 }
 0x9f1   : > { %3492 = vrot.lane.b32.xlu1 %v3454_v17, %s4456_s21 }
 0x9f2   : > { %v3561_v53 = vpop.permute.xlu2 %3560  ;;  %v3573_v44 = vpop.permute.xlu0 %3572 }
 0x9f3   : > { %v3642_v22 = vmul.f32 %v3561_v53, %v5615_v38  ;;  %v3435_v63 = vpop.permute.xlu1 %3434  ;;  %v3644_v7 = vmul.f32 %v3573_v44, %v5631_v26 }
 0x9f4   : > { %v3461_v34 = vmul.f32 %v3435_v63, %v5659_v50 }
 0x9f8   : > { %3676 = vrot.lane.b32.xlu2 %v3642_v22, %s4457_s22 }
 0x9f9   : > { %3504 = vrot.lane.b32.xlu1 %v3460_v25, %s4456_s21 }
 0x9fa   : > { %v3633_v61 = vpop.permute.xlu2 %3632  ;;  %v3597_v39 = vpop.permute.xlu0 %3596 }
 0x9fb   : > { %v3654_v24 = vmul.f32 %v3633_v61, %v5653_v27 }
 0xa00   : > { %3700 = vrot.lane.b32.xlu2 %v3654_v24, %s4457_s22 }
 0xa01   : > { %3506 = vrot.lane.b32.xlu1 %v3461_v34, %s4456_s21 }
 0xa02   : > { %v3549_v12 = vpop.permute.xlu0 %3548 }
 0xa03   : > { %v3585_v18 = vpop.permute.xlu1 %3584  ;;  %v3640_v23 = vmul.f32 %v3549_v12, %v5608_v49 }
 0xa04   : > { %v3646_v29 = vmul.f32 %v3585_v18, %v5625_v16 }
 0xa06   : > { %3684 = vrot.lane.b32.xlu0 %v3646_v29, %s4457_s22 }
 0xa09   : > { %3486 = vrot.lane.b32.xlu1 %v3451_v58, %s4456_s21 }
 0xa0a   : > { %v3579_v0 = vpop.permute.xlu2 %3578 }
 0xa0b   : > { %v3645_v51 = vmul.f32 %v3579_v0, %v5631_v26 }
 0xa0d   : > { %3682 = vrot.lane.b32.xlu2 %v3645_v51, %s4457_s22 }
 0xa0e   : > { %3496 = vrot.lane.b32.xlu0 %v3456_v9, %s4456_s21 }
 0xa11   : > { %3500 = vrot.lane.b32.xlu1 %v3458_v14, %s4456_s21 }
 0xa12   : > { %v3639_v46 = vpop.permute.xlu2 %3638  ;;  %v3555_v1 = vpop.permute.xlu0 %3554 }
 0xa13   : > { %v3591_v4 = vpop.permute.xlu1 %3590  ;;  %v3655_v52 = vmul.f32 %v3639_v46, %v5653_v27  ;;  %v6961_v27 = vld [vmem:[#allocation31_spill] sm:$0xff] }
 0xa14   : > { %v3647_v47 = vmul.f32 %v3591_v4, %v5625_v16 }
 0xa15   : > { %3702 = vrot.lane.b32.xlu2 %v3655_v52, %s4457_s22 }
 0xa16   : > { %3686 = vrot.lane.b32.xlu0 %v3647_v47, %s4457_s22 }
 0xa19   : > { %3696 = vrot.lane.b32.xlu1 %v3652_v60, %s4457_s22 }
 0xa1a   : > { %v3615_v33 = vpop.permute.xlu2 %3614 }
 0xa1b   : > { %v3651_v6 = vmul.f32 %v3615_v33, %v6942_v15 }
 0xa1d   : > { %3694 = vrot.lane.b32.xlu2 %v3651_v6, %s4457_s22 }
 0xa1e   : > { %3498 = vrot.lane.b32.xlu0 %v3457_v20, %s4456_s21 }
 0xa1f   : > { %v3489_v16 = vpop.permute.xlu0 %3488 }
 0xa20   : > { %v6392_v19 = vadd.f32 %v3489_v16, %v6961_v27 }
 0xa22   : > { %v3495_v41 = vpop.permute.xlu2 %3494 }
 0xa23   : > { %v3423_v31 = vpop.permute.xlu1 %3422  ;;  %v6395_v57 = vadd.f32 %v3495_v41, %v6175_v48  ;;  %v3648_v48 = vmul.f32 %v3597_v39, %v5633_v10 }
 0xa24   : > { %v3459_v13 = vmul.f32 %v3423_v31, %v6942_v15 }
 0xa26   : > { %3680 = vrot.lane.b32.xlu0 %v3644_v7, %s4457_s22  ;;  %3502 = vrot.lane.b32.xlu1 %v3459_v13, %s4456_s21 }
 0xa2a   : > { %v3485_v37 = vpop.permute.xlu2 %3484 }
 0xa2b   : > { %v3530_v36 = vadd.f32 %v3485_v37, %v6232_v5  ;;  %v3641_v5 = vmul.f32 %v3555_v1, %v5608_v49 }
 0xa2e   : > { %3482 = vrot.lane.b32.xlu0 %v3449_v32, %s4456_s21 }
 0xa32   : > { %v6415_v42 = vpop.permute.xlu2 %3508 }
 0xa33   : > { %v3627_v8 = vpop.permute.xlu1 %3626 }
 0xa34   : > { %v3653_v62 = vmul.f32 %v3627_v8, %v5659_v50 }
 0xa36   : > { %3688 = vrot.lane.b32.xlu0 %v3648_v48, %s4457_s22  ;;  %3698 = vrot.lane.b32.xlu1 %v3653_v62, %s4457_s22 }
 0xa3a   : > { %v6419_v3 = vpop.permute.xlu2 %3490 }
 0xa3b   : > { %v3567_v26 = vpop.permute.xlu1 %3566 }
 0xa3c   : > { %v3643_v17 = vmul.f32 %v3567_v26, %v5615_v38 }
 0xa3e   : > { %3672 = vrot.lane.b32.xlu0 %v3640_v23, %s4457_s22  ;;  %3678 = vrot.lane.b32.xlu1 %v3643_v17, %s4457_s22 }
 0xa42   : > { %v3511_v25 = vpop.permute.xlu2 %3510 }
 0xa43   : > { %v3543_v60 = vadd.f32 %v3511_v25, %v6283_v28 }
 0xa46   : > { %3674 = vrot.lane.b32.xlu0 %v3641_v5, %s4457_s22 }
 0xa4a   : > { %v3481_v63 = vpop.permute.xlu2 %3480 }
 0xa4b   : > { %v3609_v50 = vpop.permute.xlu1 %3608 }
 0xa4c   : > { %v3650_v53 = vmul.f32 %v3609_v50, %v6942_v15 }
 0xa4e   : > { %3692 = vrot.lane.b32.xlu1 %v3650_v53, %s4457_s22 }
 0xa52   : > { %v3677_v34 = vpop.permute.xlu2 %3676 }
 0xa53   : > { %v3722_v15 = vadd.f32 %v3677_v34, %v3530_v36 }
 0xa55   : > { %v3751_v39 = vrot.slane %v3722_v15, 4 }
 0xa5a   : > { %v6428_v9 = vpop.permute.xlu2 %3700 }
 0xa5b   : > { %v3603_v22 = vpop.permute.xlu1 %3602 }
 0xa5c   : > { %v3649_v38 = vmul.f32 %v3603_v22, %v5633_v10 }
 0xa5e   : > { %3690 = vrot.lane.b32.xlu1 %v3649_v38, %s4457_s22 }
 0xa63   : > { %v3493_v44 = vpop.permute.xlu1 %3492 }
 0xa64   : > { %v3534_v49 = vadd.f32 %v3493_v44, %v6208_v35 }
 0xa67   : > { %v3683_v12 = vpop.permute.xlu2 %3682 }
 0xa6b   : > { %v3505_v61 = vpop.permute.xlu1 %3504 }
 0xa6c   : > { %v3540_v24 = vadd.f32 %v3505_v61, %v6262_v55 }
 0xa6f   : > { %v3703_v4 = vpop.permute.xlu2 %3702 }
 0xa70   : > { %v3735_v1 = vadd.f32 %v3703_v4, %v3543_v60 }
 0xa72   : > { %v3885_v27 = vrot.slane %v3735_v1, 4 }
 0xa73   : > { %v6425_v18 = vpop.permute.xlu1 %3506 }
 0xa77   : > { %v3695_v16 = vpop.permute.xlu2 %3694 }
 0xa78   : > { %v3685_v29 = vpop.permute.xlu0 %3684 }
 0xa79   : > { %v3726_v58 = vadd.f32 %v3685_v29, %v3534_v49 }
 0xa7b   : > { %v3749_v0 = vrot.slane %v3726_v58, 4  ;;  %v3752_v10 = vsel %vm3737_vm3, %v3726_v58, %v3751_v39  ;;  %v3487_v51 = vpop.permute.xlu1 %3486 }
 0xa7c   : > { %v3531_v38 = vadd.f32 %v3487_v51, %v6153_v43 }
 0xa7d   : > { %v3750_v35 = vsel %vm3737_vm3, %v3749_v0, %v3722_v15 }
 0xa80   : > { %v3497_v14 = vpop.permute.xlu0 %3496 }
 0xa81   : > { %v3536_v32 = vadd.f32 %v3497_v14, %v6297_v54  ;;  %v3528_v54 = vadd.f32 %v3481_v63, %v6204_v45 }
 0xa83   : > { %v6431_v46 = vpop.permute.xlu1 %3500 }
 0xa88   : > { %v3687_v55 = vpop.permute.xlu0 %3686 }
 0xa89   : > { %v3727_v5 = vadd.f32 %v3687_v55, %v6395_v57  ;;  %v3533_v57 = vadd.f32 %v6419_v3, %v6279_v11 }
 0xa8b   : > { %v3697_v52 = vpop.permute.xlu1 %3696  ;;  %v3861_v61 = vrot.slane %v3727_v5, 4  ;;  %v3725_v0 = vadd.f32 %v3683_v12, %v3533_v57 }
 0xa8c   : > { %v3732_v36 = vadd.f32 %v3697_v52, %v3540_v24 }
 0xa8e   : > { %v3761_v48 = vrot.slane %v3732_v36, 4 }
 0xa90   : > { %v6433_v47 = vpop.permute.xlu0 %3498 }
 0xa98   : > { %v3681_v33 = vpop.permute.xlu0 %3680  ;;  %v3503_v6 = vpop.permute.xlu1 %3502 }
 0xa99   : > { %v3539_v20 = vadd.f32 %v3503_v6, %v6323_v21  ;;  %v4458_v21 = vmov 1983009808   ;;  %v3724_v50 = vadd.f32 %v3681_v33, %v6392_v19  ;;  %v3849_v33 = vrot.slane %v3725_v0, 4 }
 0xa9a   : > { %v3742_v26 = vunpack.c.l.s4 %v4458_v21 }
 0xa9b   : > { %v3731_v41 = vadd.f32 %v3695_v16, %v3539_v20  ;;  %v3736_v24 = vrot.slane %v3724_v50, 4 }
 0xa9c   : > { %v6450_v22 = vunpack.c.0.s8 %v3742_v26 }
 0xa9d   : > { %v6438_v31 = vsel %vm3737_vm3, %v3885_v27, %v3731_v41  ;;  %v3887_v7 = vrot.slane %v3731_v41, 4  ;;  %v3542_v27 = vadd.f32 %v6415_v42, %v6334_v56  ;;  %v4459_v41 = vmov 1934713408  }
 0xa9e   : > { %v3756_v25 = vperm.slane %v3750_v35, %v6450_v22  ;;  %v3760_v19 = vperm.slane %v3752_v10, %v6450_v22  ;;  %v3538_v56 = vadd.f32 %v6431_v46, %v6235_v2 }
 0xa9f   : > { %v6441_v13 = vsel %vm3737_vm3, %v3735_v1, %v3887_v7  ;;  %v3790_v7 = vunpack.c.l.s4 %v4459_v41 }
 0xaa0   : > { %v3483_v37 = vpop.permute.xlu0 %3482  ;;  %v3785_v43 = vrot.slane %v3756_v25, 4  ;;  %v3797_v14 = vrot.slane %v3760_v19, 4 }
 0xaa1   : > { %v3529_v10 = vadd.f32 %v3483_v37, %v6129_v40  ;;  %v6481_v42 = vunpack.c.0.s8 %v3790_v7 }
 0xaa8   : > { %v3689_v28 = vpop.permute.xlu0 %3688  ;;  %v6444_v8 = vpop.permute.xlu1 %3698 }
 0xaa9   : > { %v3728_v62 = vadd.f32 %v3689_v28, %v3536_v32  ;;  %v3734_v28 = vadd.f32 %v6428_v9, %v3542_v27 }
 0xaab   : > { %v3762_v23 = vsel %vm3737_vm3, %v3761_v48, %v3728_v62  ;;  %v3763_v17 = vrot.slane %v3728_v62, 4 }
 0xaad   : > { %v3764_v53 = vsel %vm3737_vm3, %v3732_v36, %v3763_v17 }
 0xab0   : > { %v3673_v44 = vpop.permute.xlu0 %3672  ;;  %v3679_v49 = vpop.permute.xlu1 %3678 }
 0xab1   : > { %v3720_v34 = vadd.f32 %v3673_v44, %v3528_v54  ;;  %v3723_v15 = vadd.f32 %v3679_v49, %v3531_v38  ;;  %v3772_v44 = vperm.slane %v3764_v53, %v6450_v22 }
 0xab3   : > { %v3738_v29 = vsel %vm3737_vm3, %v3736_v24, %v3720_v34  ;;  %v3739_v39 = vrot.slane %v3720_v34, 4  ;;  %v3862_v45 = vsel %vm3737_vm3, %v3861_v61, %v3723_v15  ;;  %v3863_v63 = vrot.slane %v3723_v15, 4 }
 0xab4   : > { %v3744_v58 = vperm.slane %v3738_v29, %v6450_v22  ;;  %v3868_v1 = vperm.slane %v3862_v45, %v6450_v22  ;;  %v3823_v57 = vrot.slane %v3772_v44, 4 }
 0xab5   : > { %v3740_v51 = vsel %vm3737_vm3, %v3724_v50, %v3739_v39  ;;  %v3864_v35 = vsel %vm3737_vm3, %v3727_v5, %v3863_v63  ;;  %v3768_v5 = vperm.slane %v3762_v23, %v6450_v22 }
 0xab6   : > { %v3748_v55 = vperm.slane %v3740_v51, %v6450_v22  ;;  %v3786_v11 = vsel %vm3737_vm3, %v3785_v43, %v3744_v58  ;;  %v3787_v3 = vrot.slane %v3744_v58, 4  ;;  %v3872_v20 = vperm.slane %v3864_v35, %v6450_v22 }
 0xab7   : > { %v3897_v36 = vrot.slane %v3868_v1, 4  ;;  %v3811_v23 = vrot.slane %v3768_v5, 4  ;;  %v3792_v34 = vperm.slane %v3786_v11, %v6481_v42 }
 0xab8   : > { %v3788_v4 = vsel %vm3737_vm3, %v3756_v25, %v3787_v3  ;;  %v3798_v52 = vsel %vm3737_vm3, %v3797_v14, %v3748_v55  ;;  %v3799_v60 = vrot.slane %v3748_v55, 4  ;;  %v3675_v12 = vpop.permute.xlu0 %3674  ;;  %v3909_v62 = vrot.slane %v3872_v20, 4 }
 0xab9   : > { %v3721_v6 = vadd.f32 %v3675_v12, %v3529_v10  ;;  %v3773_v25 = vrot.slane %v3734_v28, 4  ;;  %v3796_v2 = vperm.slane %v3788_v4, %v6481_v42  ;;  %v3804_v29 = vperm.slane %v3798_v52, %v6481_v42 }
 0xaba   : > { %v3800_v16 = vsel %vm3737_vm3, %v3760_v19, %v3799_v60  ;;  %v3835_v14 = vrot.slane %v3792_v34, 4  ;;  %v3541_v4 = vadd.f32 %v6425_v18, %v6332_v30 }
 0xabb   : > { %v3850_v40 = vsel %vm3737_vm3, %v3849_v33, %v3721_v6  ;;  %v3851_v37 = vrot.slane %v3721_v6, 4  ;;  %v3808_v63 = vperm.slane %v3800_v16, %v6481_v42  ;;  %v3839_v58 = vrot.slane %v3796_v2, 4 }
 0xabc   : > { %v3856_v32 = vperm.slane %v3850_v40, %v6450_v22  ;;  %v3843_v60 = vrot.slane %v3804_v29, 4  ;;  %v3733_v41 = vadd.f32 %v6444_v8, %v3541_v4  ;;  %v3896_v8 = vperm.slane %v6441_v13, %v6450_v22 }
 0xabd   : > { %v3852_v48 = vsel %vm3737_vm3, %v3725_v0, %v3851_v37  ;;  %v3537_v37 = vadd.f32 %v6433_v47, %v6240_v59 }
 0xabe   : > { %v3860_v21 = vperm.slane %v3852_v48, %v6450_v22  ;;  %v3898_v26 = vsel %vm3737_vm3, %v3897_v36, %v3856_v32  ;;  %v3899_v17 = vrot.slane %v3856_v32, 4  ;;  %v3892_v32 = vperm.slane %v6438_v31, %v6450_v22 }
 0xabf   : > { %v3873_v48 = vrot.slane %v3733_v41, 4  ;;  %v3933_v47 = vrot.slane %v3896_v8, 4 }
 0xac0   : > { %v3900_v50 = vsel %vm3737_vm3, %v3868_v1, %v3899_v17  ;;  %v6486_v54 = vsel %vm3737_vm3, %v3909_v62, %v3860_v21  ;;  %v3911_v9 = vrot.slane %v3860_v21, 4  ;;  %v3693_v38 = vpop.permute.xlu1 %3692  ;;  %v3847_v1 = vrot.slane %v3808_v63, 4 }
 0xac1   : > { %v3730_v49 = vadd.f32 %v3693_v38, %v3538_v56  ;;  %v3904_v21 = vperm.slane %v3898_v26, %v6481_v42  ;;  %v3908_v17 = vperm.slane %v3900_v50, %v6481_v42 }
 0xac2   : > { %v6490_v61 = vsel %vm3737_vm3, %v3872_v20, %v3911_v9  ;;  %v3921_v9 = vrot.slane %v3892_v32, 4 }
 0xac3   : > { %v3774_v46 = vsel %vm3737_vm3, %v3773_v25, %v3730_v49  ;;  %v3775_v24 = vrot.slane %v3730_v49, 4  ;;  %v3947_v50 = vrot.slane %v3904_v21, 4  ;;  %v3951_v49 = vrot.slane %v3908_v17, 4 }
 0xac4   : > { %v3780_v15 = vperm.slane %v3774_v46, %v6450_v22 }
 0xac5   : > { %v3776_v19 = vsel %vm3737_vm3, %v3734_v28, %v3775_v24 }
 0xac6   : > { %v3784_v53 = vperm.slane %v3776_v19, %v6450_v22  ;;  %v3809_v39 = vrot.slane %v3780_v15, 4  ;;  %v3812_v45 = vsel %vm3737_vm3, %v3780_v15, %v3811_v23  ;;  %v3920_v23 = vperm.slane %v6490_v61, %v6481_v42 }
 0xac7   : > { %v3820_v43 = vperm.slane %v3812_v45, %v6481_v42 }
 0xac8   : > { %v3810_v0 = vsel %vm3737_vm3, %v3809_v39, %v3768_v5  ;;  %v3821_v51 = vrot.slane %v3784_v53, 4  ;;  %v3824_v35 = vsel %vm3737_vm3, %v3784_v53, %v3823_v57 }
 0xac9   : > { %v3832_v55 = vperm.slane %v3824_v35, %v6481_v42  ;;  %v3816_v11 = vperm.slane %v3810_v0, %v6481_v42  ;;  %v6507_v3 = vsel %vm3737_vm3, %v3820_v43, %v3839_v58  ;;  %v3837_v10 = vrot.slane %v3820_v43, 4 }
 0xaca   : > { %v3822_v52 = vsel %vm3737_vm3, %v3821_v51, %v3772_v44  ;;  %v3916_v44 = vperm.slane %v6486_v54, %v6481_v42  ;;  %v3959_v58 = vrot.slane %v3920_v23, 4 }
 0xacb   : > { %v3836_v12 = vsel %vm3737_vm3, %v3816_v11, %v3835_v14  ;;  %v3838_v33 = vsel %vm3737_vm3, %v3837_v10, %v3796_v2  ;;  %v3828_v6 = vperm.slane %v3822_v52, %v6481_v42  ;;  %v3845_v20 = vrot.slane %v3832_v55, 4 }
 0xacc   : > { %v6516_v16 = vsel %vm3737_vm3, %v3832_v55, %v3847_v1  ;;  %v3833_v27 = vrot.slane %v3816_v11, 4  ;;  %v4126_v1 = vld [vmem:[%s6605_s13] sm:$0xff] }
 0xacd   : > { %v3841_v7 = vrot.slane %v3828_v6, 4  ;;  %v3846_v30 = vsel %vm3737_vm3, %v3845_v20, %v3808_v63  ;;  %v3844_v18 = vsel %vm3737_vm3, %v3828_v6, %v3843_v60  ;;  %v4038_v60 = vld [vmem:[%s6603_s11] sm:$0xff] }
 0xace   : > { %v6522_v40 = vsel %vm3737_vm3, %v3833_v27, %v3792_v34  ;;  %4236 = vmatmul.msk.f32.vlgmr.msra.gmra.mxu2 %vm632_vm2, %v4038_v60  ;;  %4238 = vmatmul.msk.f32.vlgmr.msra.gmra.mxu3 %vm632_vm2, %v4038_v60 }
 0xacf   : > { %v3842_v36 = vsel %vm3737_vm3, %v3841_v7, %v3804_v29  ;;  %v3955_v29 = vrot.slane %v3916_v44, 4 }
 0xad0   : > { %v3691_v28 = vpop.permute.xlu1 %3690 }
 0xad1   : > { %v3729_v62 = vadd.f32 %v3691_v28, %v3537_v37 }
 0xad3   : > { %v3874_v56 = vsel %vm3737_vm3, %v3873_v48, %v3729_v62  ;;  %v3875_v5 = vrot.slane %v3729_v62, 4 }
 0xad4   : > { %v3880_v59 = vperm.slane %v3874_v56, %v6450_v22 }
 0xad5   : > { %v3876_v38 = vsel %vm3737_vm3, %v3733_v41, %v3875_v5 }
 0xad6   : > { %v3884_v31 = vperm.slane %v3876_v38, %v6450_v22  ;;  %v3922_v25 = vsel %vm3737_vm3, %v3921_v9, %v3880_v59  ;;  %v3923_v13 = vrot.slane %v3880_v59, 4 }
 0xad7   : > { %v3928_v26 = vperm.slane %v3922_v25, %v6481_v42 }
 0xad8   : > { %v3924_v2 = vsel %vm3737_vm3, %v3892_v32, %v3923_v13  ;;  %v3934_v46 = vsel %vm3737_vm3, %v3933_v47, %v3884_v31  ;;  %v3935_v24 = vrot.slane %v3884_v31, 4 }
 0xad9   : > { %v3940_v22 = vperm.slane %v3934_v46, %v6481_v42  ;;  %v3948_v34 = vsel %vm3737_vm3, %v3928_v26, %v3947_v50  ;;  %v3932_v15 = vperm.slane %v3924_v2, %v6481_v42  ;;  %v3945_v57 = vrot.slane %v3928_v26, 4  ;;  %v4039_v2 = vld [vmem:[%s6604_s12] sm:$0xff] }
 0xada   : > { %v3936_v54 = vsel %vm3737_vm3, %v3896_v8, %v3935_v24  ;;  %v4403_v19 = vpack.i.bf16 %v3948_v34, %v3836_v12 }
 0xadb   : > { %v3952_v53 = vsel %vm3737_vm3, %v3932_v15, %v3951_v49  ;;  %v3949_v39 = vrot.slane %v3932_v15, 4  ;;  %v3953_v45 = vrot.slane %v3940_v22, 4  ;;  %v3944_v63 = vperm.slane %v3936_v54, %v6481_v42 }
 0xadc   : > { %4404 = vrot.lane.b32.xlu1 %v4403_v19, %s4457_s22  ;;  %v4413_v61 = vpack.i.bf16 %v3952_v53, %v6507_v3  ;;  %v3956_v43 = vsel %vm3737_vm3, %v3940_v22, %v3955_v29  ;;  %v3946_v0 = vsel %vm3737_vm3, %v3945_v57, %v3904_v21 }
 0xadd   : > { %v3950_v51 = vsel %vm3737_vm3, %v3949_v39, %v3908_v17  ;;  %v3954_v35 = vsel %vm3737_vm3, %v3953_v45, %v3916_v44  ;;  %v3957_v14 = vrot.slane %v3944_v63, 4  ;;  %v4423_v55 = vpack.i.bf16 %v3956_v43, %v3844_v18  ;;  %v6962_v39 = vld [vmem:[#allocation13_spill] sm:$0xff] }
 0xade   : > { %4414 = vrot.lane.b32.xlu0 %v4413_v61, %s4455_s19  ;;  %v4408_v11 = vpack.i.bf16 %v3950_v51, %v3838_v33  ;;  %v4418_v10 = vpack.i.bf16 %v3954_v35, %v3842_v36  ;;  %v3960_v42 = vsel %vm3737_vm3, %v3944_v63, %v3959_v58  ;;  %v6963_v45 = vperm.slane %v6962_v39, 0  ;;  %v6964_v61 = vld [vmem:[#allocation123_spill] sm:$0xff] }
 0xadf   : > { %v3958_v4 = vsel %vm3737_vm3, %v3957_v14, %v3920_v23  ;;  %v4433_v3 = vpack.i.bf16 %v3960_v42, %v6516_v16  ;;  %v6965_v43 = vperm.slane %v6964_v61, 1 }
 0xae0   : > { %4409 = vrot.lane.b32.xlu2 %v4408_v11, %s4456_s21  ;;  %v4428_v52 = vpack.i.bf16 %v3958_v4, %v3846_v30 }
 0xae4   : > { %4419 = vrot.lane.b32.xlu1 %v4418_v10, %s4454_s18 }
 0xae6   : > { %4429 = vrot.lane.b32.xlu0 %v4428_v52, %s4452_s16 }
 0xae8   : > { %4424 = vrot.lane.b32.xlu2 %v4423_v55, %s4453_s17  ;;  %s507_s17 = scalar_lea.vmem %s6606_s14, %s4218_s20 }
 0xaec   : > { %4434 = vrot.lane.b32.xlu1 %v4433_v3, %s4451_s30 }
 0xaf0   : > { %4129 = vperm.xlu2 %4438, %v4126_v1  }
 0xb3a   : > { %v4410_v12 = vpop.permute.xlu2 %4409 }
 0xb3b   : > { %v4412_v7 = vunpack.i.h.bf16 %v4410_v12  ;;  %v4411_v30 = vunpack.i.l.bf16 %v4410_v12 }
 0xb42   : > { %v4425_v62 = vpop.permute.xlu2 %4424 }
 0xb43   : > { %v4426_v59 = vunpack.i.l.bf16 %v4425_v62 }
 0xb4a   : > { %v4130_v34 = vpop.permute.xlu2 %4129 }
 0xb4e   : > { %v4405_v33 = vpop.permute.xlu1 %4404 }
 0xb4f   : > { %v4407_v6 = vunpack.i.h.bf16 %v4405_v33  ;;  %v4406_v20 = vunpack.i.l.bf16 %v4405_v33 }
 0xb50   : > { %v4415_v16 = vpop.permute.xlu0 %4414 }
 0xb51   : > { %v4018_v27 = vsel %vm4017_vm4, %v6522_v40, %v4406_v20  ;;  %v4031_v41 = vsel %vm4017_vm4, %v3946_v0, %v4407_v6  ;;  %v4417_v18 = vunpack.i.h.bf16 %v4415_v16  ;;  %v4416_v37 = vunpack.i.l.bf16 %v4415_v16  ;;  %v4103_v23 = vpop.f32.mrf.mxu2  ;;  %v4123_v22 = vpop.f32.mrf.mxu3 }
 0xb52   : > { %v4020_v36 = vsel %vm4019_vm5, %v4018_v27, %v4411_v30  ;;  %v4032_v32 = vsel %vm4019_vm5, %v4031_v41, %v4412_v7  ;;  %v4427_v40 = vunpack.i.h.bf16 %v4425_v62 }
 0xb53   : > { %v4022_v21 = vsel %vm4021_vm6, %v4020_v36, %v4416_v37  ;;  %v4033_v17 = vsel %vm4021_vm6, %v4032_v32, %v4417_v18 }
 0xb56   : > { %v4420_v28 = vpop.permute.xlu1 %4419 }
 0xb57   : > { %v4422_v8 = vunpack.i.h.bf16 %v4420_v28  ;;  %v4421_v48 = vunpack.i.l.bf16 %v4420_v28 }
 0xb58   : > { %v4430_v56 = vpop.permute.xlu0 %4429 }
 0xb59   : > { %v4024_v5 = vsel %vm4023_vm7, %v4022_v21, %v4421_v48  ;;  %v4034_v9 = vsel %vm4023_vm7, %v4033_v17, %v4422_v8  ;;  %v4432_v47 = vunpack.i.h.bf16 %v4430_v56  ;;  %v4431_v38 = vunpack.i.l.bf16 %v4430_v56 }
 0xb5a   : > { %v4026_v31 = vsel %vm4025_vm8, %v4024_v5, %v4426_v59  ;;  %v4035_v25 = vsel %vm4025_vm8, %v4034_v9, %v4427_v40 }
 0xb5b   : > { %v4028_v50 = vsel %vm4027_vm9, %v4026_v31, %v4431_v38  ;;  %v4036_v49 = vsel %vm4027_vm9, %v4035_v25, %v4432_v47 }
 0xb5e   : > { %v4435_v13 = vpop.permute.xlu1 %4434 }
 0xb5f   : > { %v4437_v44 = vunpack.i.h.bf16 %v4435_v13  ;;  %v4436_v26 = vunpack.i.l.bf16 %v4435_v13 }
 0xb61   : > { %v4030_v46 = vsel %vm4029_vm10, %v4028_v50, %v4436_v26  ;;  %v4037_v24 = vsel %vm4029_vm10, %v4036_v49, %v4437_v44 }
 0xb62   : > { %4058 = vmatpush.msra.mxu0 %v4030_v46  ;;  %4078 = vmatpush.msra.mxu1 %v4037_v24 }
 0xb63   : > { %4233 = vmatmul.msk.f32.vlgmr.msra.gmra.mxu0 %vm520_vm0, %v4039_v2  ;;  %4234 = vmatmul.msk.f32.vlgmr.msra.gmra.mxu1 %vm520_vm0, %v4039_v2 }
 0xbe0   : > { %v4060_v15 = vpop.f32.mrf.mxu0  ;;  %v4080_v57 = vpop.f32.mrf.mxu1 }
 0xbe1   : > { %v4104_v54 = vadd.f32 %v4103_v23, %v4060_v15  ;;  %v4124_v19 = vadd.f32 %v4123_v22, %v4080_v57 }
 0xbe3   : > { %v4132_v29 = vadd.f32 %v4130_v34, %v4104_v54  ;;  %v4133_v53 = vadd.f32 %v4130_v34, %v4124_v19 }
 0xbe5   : > { %v4134_v63 = vmul.f32 %v4132_v29, %v6963_v45  ;;  %v4135_v58 = vmul.f32 %v4133_v53, %v6965_v43 }
 0xbe7   : > { %4136 = vst [vmem:[%s507_s17] sm:$0xff] %v4134_v63 }
 0xbe8   : > { %4137 = vst [vmem:[%s507_s17 + $0x8] sm:$0xff] %v4135_v58 }
 0xbe9 PF: > { %s24_s29 = sadd.s32 1, %s4448_s29  }
 0xbea   : > { %p21_p4 = scmp.ge.s32.totalorder %s24_s29, 4  }
 0xbec   :  { %23 = sbr.rel (!%p21_p4) target bundleno = 1 (0x1), region = 112 }

</bundles_post_ra>
